<compile_context>
chip_gen: v5e
topology: v5e:2x2
jax: 0.10.0
libtpu: 0.0.40
codegen_flags: <defaults>
</compile_context>

<pallas_src>
import jax
import jax.numpy as jnp
from jax import lax
from jax.experimental import pallas as pl
from jax.experimental.pallas import tpu as pltpu

# ---- small, module-consistent dimensions ----
SRC_LEN = 6       # src sequence length
TRG_LEN = 5       # trg sequence length
BATCH = 8
SRC_VOCAB = 20    # input_dim  (len(ko_vocab))
TRG_VOCAB = 24    # output_dim (len(en_vocab))
ENC_EMB = 8       # encoder_embedding_dim
DEC_EMB = 8       # decoder_embedding_dim
ENC_HID = 8       # encoder_hidden_dim
DEC_HID = 8       # decoder_hidden_dim

# ---- packed parameter blob layouts (row offsets; blocks 8-aligned) ----
# encoder blob: (ENC_ROWS, 6*ENC_HID) f32
E_EMB_R = 0      # enc_emb                   rows [0, SRC_VOCAB), cols [0, ENC_EMB)
E_WI_R = 24      # [W_ih_f | W_ih_b]         rows [24, 32)
E_WHH_R = 32     # blockdiag(W_hh_f, W_hh_b) rows [32, 48)
E_FC_R = 48      # enc_fc_w                  rows [48, 64), cols [0, DEC_HID)
E_BI_R = 64      # [b_ih_f | b_ih_b]         row 64
E_BH_R = 65      # [b_hh_f | b_hh_b]         row 65
E_FCB_R = 66     # enc_fc_b                  row 66, cols [0, DEC_HID)
ENC_ROWS = 72
# decoder blob: (DEC_ROWS, 3*DEC_HID) f32  (3*DEC_HID == TRG_VOCAB == 24)
D_EMB_R = 0      # dec_emb    rows [0, TRG_VOCAB), cols [0, DEC_EMB)
D_AW_R = 24      # attn_w     rows [24, 48),       cols [0, DEC_HID)
D_WI_R = 48      # dec_wi     rows [48, 72)
D_WH_R = 72      # dec_wh     rows [72, 80)
D_FC_R = 80      # dec_fc_w   rows [80, 112),      cols [0, TRG_VOCAB)
D_AB_R = 112     # attn_b
D_BI_R = 113     # dec_bi
D_BH_R = 114     # dec_bh
D_FCB_R = 115    # dec_fc_b
D_V_R = 120      # attn_v stored as a column: rows [120, 128), col 0
DEC_ROWS = 128


# --------------------------------------------------------------------------
# Single fused kernel: bidirectional encoder GRU + attention decoder loop.
# Whole problem (weights + activations ~ tens of KB) lives in VMEM; no grid.
# --------------------------------------------------------------------------
def seq2seq_kernel(tf_ref, src_ref, trg_ref, enc_p_ref, dec_p_ref,
                   out_ref, enc_out_ref, hid_out_ref, emb_scr):
    T, B, V = out_ref.shape
    S, _, C = enc_out_ref.shape
    He = C // 2
    H3 = 3 * He
    Hd = hid_out_ref.shape[1]
    Ed = emb_scr.shape[1]
    Ee = ENC_EMB
    Vsrc = SRC_VOCAB
    SB = S * B

    # ============================= encoder =============================
    enc_emb = enc_p_ref[E_EMB_R:E_EMB_R + Vsrc, 0:Ee]            # (Vsrc, Ee)
    wi_cat = enc_p_ref[E_WI_R:E_WI_R + Ee, :]                    # (Ee, 6He) [fwd|bwd]
    whh_blk = enc_p_ref[E_WHH_R:E_WHH_R + C, :]                  # (2He, 6He) blockdiag
    efc_w = enc_p_ref[E_FC_R:E_FC_R + C, 0:Hd]                   # (2He, Hd)
    bi_cat = enc_p_ref[E_BI_R:E_BI_R + 1, :]                     # (1, 6He)
    bh_cat = enc_p_ref[E_BH_R:E_BH_R + 1, :]                     # (1, 6He)
    efc_b = enc_p_ref[E_FCB_R:E_FCB_R + 1, 0:Hd]                 # (1, Hd)

    # embedding lookup as one-hot matmul, batched over all S*B tokens
    src_ids = src_ref[...]                                       # (S*B, 1)
    src_oh = (lax.broadcasted_iota(jnp.int32, (SB, Vsrc), 1) == src_ids
              ).astype(jnp.float32)
    emb_all = jnp.dot(src_oh, enc_emb, preferred_element_type=jnp.float32)

    # hoisted input->hidden projections, both directions in ONE matmul
    gi_all = jnp.dot(emb_all, wi_cat, preferred_element_type=jnp.float32) + bi_cat

    # recurrence: fwd & bwd chains fused into one block-diagonal hidden matmul
    h_cat = jnp.zeros((B, C), jnp.float32)                       # [h_fwd | h_bwd]
    hf_list = [None] * S
    hb_list = [None] * S
    for i in range(S):
        tb = S - 1 - i
        gh = jnp.dot(h_cat, whh_blk, preferred_element_type=jnp.float32) + bh_cat
        gi_f = gi_all[i * B:(i + 1) * B, 0:H3]
        gi_b = gi_all[tb * B:(tb + 1) * B, H3:2 * H3]
        r_f = jax.nn.sigmoid(gi_f[:, 0:He] + gh[:, 0:He])
        z_f = jax.nn.sigmoid(gi_f[:, He:2 * He] + gh[:, He:2 * He])
        n_f = jnp.tanh(gi_f[:, 2 * He:H3] + r_f * gh[:, 2 * He:H3])
        h_f = (1.0 - z_f) * n_f + z_f * h_cat[:, 0:He]
        r_b = jax.nn.sigmoid(gi_b[:, 0:He] + gh[:, H3:H3 + He])
        z_b = jax.nn.sigmoid(gi_b[:, He:2 * He] + gh[:, H3 + He:H3 + 2 * He])
        n_b = jnp.tanh(gi_b[:, 2 * He:H3] + r_b * gh[:, H3 + 2 * He:2 * H3])
        h_b = (1.0 - z_b) * n_b + z_b * h_cat[:, He:C]
        hf_list[i] = h_f
        hb_list[tb] = h_b
        h_cat = jnp.concatenate([h_f, h_b], axis=1)

    # encoder outputs, lane-concatenated [fwd | bwd], assembled in vregs,
    # written with a single store (no scratch, no per-step masked stores)
    enc_all = jnp.concatenate(
        [jnp.concatenate(hf_list, axis=0), jnp.concatenate(hb_list, axis=0)],
        axis=1)                                                  # (S*B, 2He)
    enc_out_ref[...] = enc_all.reshape(S, B, C)

    # hidden = tanh(fc([h_fwd_final | h_bwd_final]))  (already concatenated)
    hidden = jnp.tanh(jnp.dot(h_cat, efc_w, preferred_element_type=jnp.float32)
                      + efc_b)
    hid_out_ref[...] = hidden

    # ============================= decoder =============================
    dec_emb = dec_p_ref[D_EMB_R:D_EMB_R + V, 0:Ed]               # (V, Ed)
    attn_wh = dec_p_ref[D_AW_R:D_AW_R + Hd, 0:Hd]                # (Hd, Hd)
    attn_we = dec_p_ref[D_AW_R + Hd:D_AW_R + Hd + C, 0:Hd]       # (2He, Hd)
    dwi_e = dec_p_ref[D_WI_R:D_WI_R + Ed, :]                     # (Ed, 3Hd)
    dwi_c = dec_p_ref[D_WI_R + Ed:D_WI_R + Ed + C, :]            # (2He, 3Hd)
    dwh = dec_p_ref[D_WH_R:D_WH_R + Hd, :]                       # (Hd, 3Hd)
    dfc_o = dec_p_ref[D_FC_R:D_FC_R + Hd, 0:V]                   # (Hd, V)
    dfc_c = dec_p_ref[D_FC_R + Hd:D_FC_R + Hd + C, 0:V]          # (2He, V)
    dfc_e = dec_p_ref[D_FC_R + Hd + C:D_FC_R + Hd + C + Ed, 0:V] # (Ed, V)
    attn_b = dec_p_ref[D_AB_R:D_AB_R + 1, 0:Hd]                  # (1, Hd)
    dbi = dec_p_ref[D_BI_R:D_BI_R + 1, :]                        # (1, 3Hd)
    dbh = dec_p_ref[D_BH_R:D_BH_R + 1, :]                        # (1, 3Hd)
    dfc_b = dec_p_ref[D_FCB_R:D_FCB_R + 1, 0:V]                  # (1, V)
    v_col = dec_p_ref[D_V_R:D_V_R + Hd, 0:1]                     # (Hd, 1)

    # loop-invariant encoder half of the attention energies
    pe_all = jnp.dot(enc_all, attn_we, preferred_element_type=jnp.float32) + attn_b

    # segment-sum matrix rep_t[b, s*B + b'] = (b == b'); single modulo compare
    row_t = lax.broadcasted_iota(jnp.int32, (B, SB), 0)
    col_t = lax.broadcasted_iota(jnp.int32, (B, SB), 1)
    if B & (B - 1) == 0:
        col_mod = jnp.bitwise_and(col_t, B - 1)
    else:
        col_mod = lax.rem(col_t, B)
    rep_t = (col_mod == row_t).astype(jnp.float32)               # (B, S*B)

    # loop-invariant softmax shift: energy in [-1,1] => |scores| <= ||attn_v||_1
    bound = jnp.sum(jnp.abs(v_col), axis=0, keepdims=True)       # (1, 1)

    # teacher-forced embeddings for every step, hoisted out of the loop
    trg_ids = trg_ref[...]                                       # (T*B, 1)
    trg_oh_all = (lax.broadcasted_iota(jnp.int32, (T * B, V), 1) == trg_ids
                  ).astype(jnp.float32)
    trg_emb_all = jnp.dot(trg_oh_all, dec_emb, preferred_element_type=jnp.float32)

    ids = lax.broadcasted_iota(jnp.int32, (B, V), 1)

    out_ref[0] = jnp.zeros((B, V), jnp.float32)                  # outputs[0] stays 0
    emb_scr[...] = trg_emb_all[0:B, :]                           # first input = trg[0]

    # fully unrolled decoder time loop (T is small & static)
    for t in range(1, T):
        embedded = emb_scr[...]                                  # (B, Ed)

        # ---- attention, vectorized over all S source positions ----
        ph = jnp.dot(hidden, attn_wh, preferred_element_type=jnp.float32)   # (B, Hd)
        energy = jnp.tanh(pe_all + jnp.tile(ph, (S, 1)))                     # (S*B, Hd)
        scores = jnp.dot(energy, v_col, preferred_element_type=jnp.float32)  # (S*B, 1)
        exps = jnp.exp(scores - bound)

        # fused softmax denominator + weighted context: ONE segment-sum matmul
        cat = jnp.concatenate([exps, exps * enc_all], axis=1)                # (S*B, 1+2He)
        seg = jnp.dot(rep_t, cat, preferred_element_type=jnp.float32)        # (B, 1+2He)
        weighted = seg[:, 1:] / seg[:, 0:1]                                  # (B, 2He)

        # ---- GRU step: rnn_input = [embedded | weighted] (sum-of-dots) ----
        gi = (jnp.dot(embedded, dwi_e, preferred_element_type=jnp.float32)
              + jnp.dot(weighted, dwi_c, preferred_element_type=jnp.float32)
              + dbi)
        gh = jnp.dot(hidden, dwh, preferred_element_type=jnp.float32) + dbh
        r = jax.nn.sigmoid(gi[:, 0:Hd] + gh[:, 0:Hd])
        z = jax.nn.sigmoid(gi[:, Hd:2 * Hd] + gh[:, Hd:2 * Hd])
        n = jnp.tanh(gi[:, 2 * Hd:] + r * gh[:, 2 * Hd:])
        hidden = (1.0 - z) * n + z * hidden

        # ---- fc_out([output | weighted | embedded]) (sum-of-dots) ----
        pred = (jnp.dot(hidden, dfc_o, preferred_element_type=jnp.float32)
                + jnp.dot(weighted, dfc_c, preferred_element_type=jnp.float32)
                + jnp.dot(embedded, dfc_e, preferred_element_type=jnp.float32)
                + dfc_b)                                         # (B, V)
        out_ref[t] = pred

        # ---- next decoder input (not needed after the last step) ----
        if t < T - 1:
            trg_emb_t = trg_emb_all[t * B:(t + 1) * B, :]

            @pl.when(tf_ref[t] == 1)
            def _teacher():
                emb_scr[...] = trg_emb_t

            @pl.when(tf_ref[t] == 0)
            def _greedy():
                pmax = jnp.max(pred, axis=1, keepdims=True)
                top_idx = jnp.min(jnp.where(pred == pmax, ids, V),
                                  axis=1, keepdims=True)          # first-max index
                greedy_oh = (ids == top_idx).astype(jnp.float32)
                emb_scr[...] = jnp.dot(greedy_oh, dec_emb,
                                       preferred_element_type=jnp.float32)


# --------------------------------------------------------------------------
# Parameter packing (done ONCE, outside the jitted forward): 2 f32 blobs.
# --------------------------------------------------------------------------
def pack_params(p):
    He, Hd, Ee, Ed = ENC_HID, DEC_HID, ENC_EMB, DEC_EMB
    C, W6 = 2 * He, 6 * He
    enc = jnp.zeros((ENC_ROWS, W6), jnp.float32)
    enc = enc.at[E_EMB_R:E_EMB_R + SRC_VOCAB, 0:Ee].set(p['enc_emb'])
    enc = enc.at[E_WI_R:E_WI_R + Ee, :].set(
        jnp.concatenate([p['enc_wi_f'], p['enc_wi_b']], axis=1))
    whh = jnp.zeros((C, W6), jnp.float32)
    whh = whh.at[0:He, 0:3 * He].set(p['enc_wh_f'])
    whh = whh.at[He:C, 3 * He:W6].set(p['enc_wh_b'])
    enc = enc.at[E_WHH_R:E_WHH_R + C, :].set(whh)
    enc = enc.at[E_FC_R:E_FC_R + C, 0:Hd].set(p['enc_fc_w'])
    enc = enc.at[E_BI_R, :].set(
        jnp.concatenate([p['enc_bi_f'], p['enc_bi_b']], axis=1)[0])
    enc = enc.at[E_BH_R, :].set(
        jnp.concatenate([p['enc_bh_f'], p['enc_bh_b']], axis=1)[0])
    enc = enc.at[E_FCB_R, 0:Hd].set(p['enc_fc_b'][0])

    W3 = 3 * Hd
    dec = jnp.zeros((DEC_ROWS, W3), jnp.float32)
    dec = dec.at[D_EMB_R:D_EMB_R + TRG_VOCAB, 0:Ed].set(p['dec_emb'])
    dec = dec.at[D_AW_R:D_AW_R + Hd + C, 0:Hd].set(p['attn_w'])
    dec = dec.at[D_WI_R:D_WI_R + Ed + C, :].set(p['dec_wi'])
    dec = dec.at[D_WH_R:D_WH_R + Hd, :].set(p['dec_wh'])
    dec = dec.at[D_FC_R:D_FC_R + Hd + C + Ed, 0:TRG_VOCAB].set(p['dec_fc_w'])
    dec = dec.at[D_AB_R, 0:Hd].set(p['attn_b'][0])
    dec = dec.at[D_BI_R, :].set(p['dec_bi'][0])
    dec = dec.at[D_BH_R, :].set(p['dec_bh'][0])
    dec = dec.at[D_FCB_R, 0:TRG_VOCAB].set(p['dec_fc_b'][0])
    dec = dec.at[D_V_R:D_V_R + Hd, 0:1].set(p['attn_v'])
    return enc, dec


# --------------------------------------------------------------------------
# Wrapper: a single pallas_call for the whole forward pass (5 inputs).
# --------------------------------------------------------------------------
@jax.jit
def seq2seq_forward(src, trg, tf_flags, enc_blob, dec_blob):
    S, B = src.shape
    T = trg.shape[0]
    src_col = src.astype(jnp.int32).reshape(S * B, 1)
    trg_col = trg.astype(jnp.int32).reshape(T * B, 1)
    out_shape = (
        jax.ShapeDtypeStruct((T, B, TRG_VOCAB), jnp.float32),    # decoder logits
        jax.ShapeDtypeStruct((S, B, 2 * ENC_HID), jnp.float32),  # encoder outputs
        jax.ShapeDtypeStruct((B, DEC_HID), jnp.float32),         # encoder hidden
    )
    vspec = pl.BlockSpec(memory_space=pltpu.MemorySpace.VMEM)
    return pl.pallas_call(
        seq2seq_kernel,
        out_shape=out_shape,
        in_specs=[pl.BlockSpec(memory_space=pltpu.MemorySpace.SMEM),
                  vspec, vspec, vspec, vspec],
        out_specs=(vspec, vspec, vspec),
        scratch_shapes=[pltpu.VMEM((B, DEC_EMB), jnp.float32)],  # next-input embedding
    )(tf_flags.astype(jnp.int32), src_col, trg_col, enc_blob, dec_blob)


# --------------------------------------------------------------------------
# Pure-JAX reference (mirrors the PyTorch forward) for validation
# --------------------------------------------------------------------------
def reference_forward(src, trg, tf_flags, p):
    S, B = src.shape
    T = trg.shape[0]
    He, Hd, V = ENC_HID, DEC_HID, TRG_VOCAB

    def gru_cell(x, h, wi, wh, bi, bh, H):
        gi = x @ wi + bi
        gh = h @ wh + bh
        r = jax.nn.sigmoid(gi[:, :H] + gh[:, :H])
        z = jax.nn.sigmoid(gi[:, H:2 * H] + gh[:, H:2 * H])
        n = jnp.tanh(gi[:, 2 * H:] + r * gh[:, 2 * H:])
        return (1 - z) * n + z * h

    emb = p['enc_emb'][src]                                      # (S, B, E)
    h = jnp.zeros((B, He)); outs_f = []
    for t in range(S):
        h = gru_cell(emb[t], h, p['enc_wi_f'], p['enc_wh_f'],
                     p['enc_bi_f'], p['enc_bh_f'], He)
        outs_f.append(h)
    h_f = h
    h = jnp.zeros((B, He)); outs_b = [None] * S
    for t in range(S - 1, -1, -1):
        h = gru_cell(emb[t], h, p['enc_wi_b'], p['enc_wh_b'],
                     p['enc_bi_b'], p['enc_bh_b'], He)
        outs_b[t] = h
    h_b = h
    enc_outputs = jnp.stack([jnp.concatenate([f, b], axis=1)
                             for f, b in zip(outs_f, outs_b)], 0)  # (S,B,2He)
    hidden0 = jnp.tanh(jnp.concatenate([h_f, h_b], axis=1) @ p['enc_fc_w']
                       + p['enc_fc_b'])

    hidden = hidden0
    outputs = [jnp.zeros((B, V))]
    inp = trg[0]
    eo = jnp.transpose(enc_outputs, (1, 0, 2))                    # (B,S,2He)
    for t in range(1, T):
        embedded = p['dec_emb'][inp]                              # (B,E)
        hid_rep = jnp.broadcast_to(hidden[:, None, :], (B, S, Hd))
        cat = jnp.concatenate([hid_rep, eo], axis=2)
        energy = jnp.tanh(cat @ p['attn_w'] + p['attn_b'])
        att = jnp.squeeze(energy @ p['attn_v'], axis=2)           # (B,S)
        a = jax.nn.softmax(att, axis=1)
        weighted = jnp.einsum('bs,bsc->bc', a, eo)
        rnn_in = jnp.concatenate([embedded, weighted], axis=1)
        hidden = gru_cell(rnn_in, hidden, p['dec_wi'], p['dec_wh'],
                          p['dec_bi'], p['dec_bh'], Hd)
        pred = (jnp.concatenate([hidden, weighted, embedded], axis=1)
                @ p['dec_fc_w'] + p['dec_fc_b'])
        outputs.append(pred)
        top1 = jnp.argmax(pred, axis=1).astype(trg.dtype)
        inp = jnp.where(tf_flags[t] == 1, trg[t], top1)
    return jnp.stack(outputs, 0), enc_outputs, hidden0


# --------------------------------------------------------------------------
# Deterministic parameter init
# --------------------------------------------------------------------------
def init_params(key):
    names_shapes = [
        ('enc_emb', (SRC_VOCAB, ENC_EMB)),
        ('enc_wi_f', (ENC_EMB, 3 * ENC_HID)),
        ('enc_wh_f', (ENC_HID, 3 * ENC_HID)),
        ('enc_bi_f', (1, 3 * ENC_HID)),
        ('enc_bh_f', (1, 3 * ENC_HID)),
        ('enc_wi_b', (ENC_EMB, 3 * ENC_HID)),
        ('enc_wh_b', (ENC_HID, 3 * ENC_HID)),
        ('enc_bi_b', (1, 3 * ENC_HID)),
        ('enc_bh_b', (1, 3 * ENC_HID)),
        ('enc_fc_w', (2 * ENC_HID, DEC_HID)),
        ('enc_fc_b', (1, DEC_HID)),
        ('dec_emb', (TRG_VOCAB, DEC_EMB)),
        ('attn_w', (DEC_HID + 2 * ENC_HID, DEC_HID)),
        ('attn_b', (1, DEC_HID)),
        ('attn_v', (DEC_HID, 1)),
        ('dec_wi', (DEC_EMB + 2 * ENC_HID, 3 * DEC_HID)),
        ('dec_wh', (DEC_HID, 3 * DEC_HID)),
        ('dec_bi', (1, 3 * DEC_HID)),
        ('dec_bh', (1, 3 * DEC_HID)),
        ('dec_fc_w', (DEC_HID + 2 * ENC_HID + DEC_EMB, TRG_VOCAB)),
        ('dec_fc_b', (1, TRG_VOCAB)),
    ]
    keys = jax.random.split(key, len(names_shapes))
    return {name: 0.3 * jax.random.normal(k, shape, dtype=jnp.float32)
            for (name, shape), k in zip(names_shapes, keys)}


if __name__ == "__main__":
    key = jax.random.PRNGKey(0)
    kp, ks, kt, kf = jax.random.split(key, 4)
    params = init_params(kp)
    enc_blob, dec_blob = pack_params(params)   # packed once, off the hot path

    src = jax.random.randint(ks, (SRC_LEN, BATCH), 0, SRC_VOCAB, dtype=jnp.int32)
    trg = jax.random.randint(kt, (TRG_LEN, BATCH), 0, TRG_VOCAB, dtype=jnp.int32)
    teacher_forcing_ratio = 0.5
    # TODO(synk): PyTorch uses python `random.random()` per step; here the coin
    # flips are pre-drawn deterministically with a JAX PRNG.
    tf_flags = (jax.random.uniform(kf, (TRG_LEN,))
                < teacher_forcing_ratio).astype(jnp.int32)

    out, enc_out, hid = seq2seq_forward(src, trg, tf_flags, enc_blob, dec_blob)
    out = jax.block_until_ready(out)

    ref_out, ref_enc, ref_hid = reference_forward(src, trg, tf_flags, params)
    assert out.shape == (TRG_LEN, BATCH, TRG_VOCAB)
    assert enc_out.shape == (SRC_LEN, BATCH, 2 * ENC_HID)
    assert hid.shape == (BATCH, DEC_HID)
    max_err = max(float(jnp.max(jnp.abs(out - ref_out))),
                  float(jnp.max(jnp.abs(enc_out - ref_enc))),
                  float(jnp.max(jnp.abs(hid - ref_hid))))
    assert max_err < 2e-3, f"max abs error vs reference: {max_err}"
    print("KERNEL_OK")
</pallas_src>

<mosaic_0001>
module attributes {stable_mosaic.version = 11 : i64} {
  func.func @seq2seq_kernel(%arg0: memref<5xi32, #tpu.memory_space<smem>>, %arg1: memref<48x1xi32, #tpu.memory_space<vmem>>, %arg2: memref<40x1xi32, #tpu.memory_space<vmem>>, %arg3: memref<72x48xf32, #tpu.memory_space<vmem>>, %arg4: memref<128x24xf32, #tpu.memory_space<vmem>>, %arg5: memref<5x8x24xf32, #tpu.memory_space<vmem>>, %arg6: memref<6x8x16xf32, #tpu.memory_space<vmem>>, %arg7: memref<8x8xf32, #tpu.memory_space<vmem>>, %arg8: memref<8x8xf32, #tpu.memory_space<vmem>>) attributes {dimension_semantics = [], scalar_prefetch = 0 : i64, scratch_operands = 1 : i64, tpu.core_type = #tpu.core_type<tc>} {
    %c0 = arith.constant 0 : index
    %c0_0 = arith.constant 0 : index
    %0 = vector.load %arg3[%c0, %c0_0] : memref<72x48xf32, #tpu.memory_space<vmem>>, vector<20x8xf32>
    %c24 = arith.constant 24 : index
    %c0_1 = arith.constant 0 : index
    %1 = vector.load %arg3[%c24, %c0_1] : memref<72x48xf32, #tpu.memory_space<vmem>>, vector<8x48xf32>
    %c32 = arith.constant 32 : index
    %c0_2 = arith.constant 0 : index
    %2 = vector.load %arg3[%c32, %c0_2] : memref<72x48xf32, #tpu.memory_space<vmem>>, vector<16x48xf32>
    %c48 = arith.constant 48 : index
    %c0_3 = arith.constant 0 : index
    %3 = vector.load %arg3[%c48, %c0_3] : memref<72x48xf32, #tpu.memory_space<vmem>>, vector<16x8xf32>
    %c64 = arith.constant 64 : index
    %c0_4 = arith.constant 0 : index
    %4 = vector.load %arg3[%c64, %c0_4] : memref<72x48xf32, #tpu.memory_space<vmem>>, vector<1x48xf32>
    %c65 = arith.constant 65 : index
    %c0_5 = arith.constant 0 : index
    %5 = vector.load %arg3[%c65, %c0_5] : memref<72x48xf32, #tpu.memory_space<vmem>>, vector<1x48xf32>
    %c66 = arith.constant 66 : index
    %c0_6 = arith.constant 0 : index
    %6 = vector.load %arg3[%c66, %c0_6] : memref<72x48xf32, #tpu.memory_space<vmem>>, vector<1x8xf32>
    %c0_7 = arith.constant 0 : index
    %c0_8 = arith.constant 0 : index
    %7 = vector.load %arg1[%c0_7, %c0_8] : memref<48x1xi32, #tpu.memory_space<vmem>>, vector<48x1xi32>
    %8 = tpu.iota {dimensions = array<i32: 1>} : vector<48x20xi32>
    %9 = vector.broadcast %7 : vector<48x1xi32> to vector<48x20xi32>
    %10 = arith.cmpi eq, %8, %9 : vector<48x20xi32>
    %11 = arith.extui %10 : vector<48x20xi1> to vector<48x20xi32>
    %12 = arith.sitofp %11 : vector<48x20xi32> to vector<48x20xf32>
    %cst = arith.constant dense<0.000000e+00> : vector<48x8xf32>
    %13 = tpu.matmul %12, %0, %cst {dimension_numbers = #tpu.dot_dimension_numbers<[1], [0], [0], [1], [0, 0, 1, 1], [], []>} : vector<48x20xf32>, vector<20x8xf32>, vector<48x8xf32> -> vector<48x8xf32>
    %cst_9 = arith.constant dense<0.000000e+00> : vector<48x48xf32>
    %14 = tpu.matmul %13, %1, %cst_9 {dimension_numbers = #tpu.dot_dimension_numbers<[1], [0], [0], [1], [0, 0, 1, 1], [], []>} : vector<48x8xf32>, vector<8x48xf32>, vector<48x48xf32> -> vector<48x48xf32>
    %15 = vector.broadcast %4 : vector<1x48xf32> to vector<48x48xf32>
    %16 = arith.addf %14, %15 : vector<48x48xf32>
    %cst_10 = arith.constant 0.000000e+00 : f32
    %17 = vector.broadcast %cst_10 : f32 to vector<8x16xf32>
    %cst_11 = arith.constant dense<0.000000e+00> : vector<8x48xf32>
    %18 = tpu.matmul %17, %2, %cst_11 {dimension_numbers = #tpu.dot_dimension_numbers<[1], [0], [0], [1], [0, 0, 1, 1], [], []>} : vector<8x16xf32>, vector<16x48xf32>, vector<8x48xf32> -> vector<8x48xf32>
    %19 = vector.broadcast %5 : vector<1x48xf32> to vector<8x48xf32>
    %20 = arith.addf %18, %19 : vector<8x48xf32>
    %21 = vector.extract_strided_slice %16 {offsets = [0, 0], sizes = [8, 24], strides = [1, 1]} : vector<48x48xf32> to vector<8x24xf32>
    %22 = vector.extract_strided_slice %16 {offsets = [40, 24], sizes = [8, 24], strides = [1, 1]} : vector<48x48xf32> to vector<8x24xf32>
    %23 = vector.extract_strided_slice %21 {offsets = [0, 0], sizes = [8, 8], strides = [1, 1]} : vector<8x24xf32> to vector<8x8xf32>
    %24 = vector.extract_strided_slice %20 {offsets = [0, 0], sizes = [8, 8], strides = [1, 1]} : vector<8x48xf32> to vector<8x8xf32>
    %25 = arith.addf %23, %24 : vector<8x8xf32>
    %26 = arith.negf %25 : vector<8x8xf32>
    %27 = math.exp %26 : vector<8x8xf32>
    %cst_12 = arith.constant 1.000000e+00 : f32
    %28 = vector.broadcast %cst_12 : f32 to vector<8x8xf32>
    %29 = arith.addf %28, %27 : vector<8x8xf32>
    %30 = arith.divf %28, %29 : vector<8x8xf32>
    %31 = vector.extract_strided_slice %21 {offsets = [0, 8], sizes = [8, 8], strides = [1, 1]} : vector<8x24xf32> to vector<8x8xf32>
    %32 = vector.extract_strided_slice %20 {offsets = [0, 8], sizes = [8, 8], strides = [1, 1]} : vector<8x48xf32> to vector<8x8xf32>
    %33 = arith.addf %31, %32 : vector<8x8xf32>
    %34 = arith.negf %33 : vector<8x8xf32>
    %35 = math.exp %34 : vector<8x8xf32>
    %cst_13 = arith.constant 1.000000e+00 : f32
    %36 = vector.broadcast %cst_13 : f32 to vector<8x8xf32>
    %37 = arith.addf %36, %35 : vector<8x8xf32>
    %38 = arith.divf %36, %37 : vector<8x8xf32>
    %39 = vector.extract_strided_slice %21 {offsets = [0, 16], sizes = [8, 8], strides = [1, 1]} : vector<8x24xf32> to vector<8x8xf32>
    %40 = vector.extract_strided_slice %20 {offsets = [0, 16], sizes = [8, 8], strides = [1, 1]} : vector<8x48xf32> to vector<8x8xf32>
    %41 = arith.mulf %30, %40 : vector<8x8xf32>
    %42 = arith.addf %39, %41 : vector<8x8xf32>
    %43 = math.tanh %42 : vector<8x8xf32>
    %cst_14 = arith.constant 1.000000e+00 : f32
    %44 = vector.broadcast %cst_14 : f32 to vector<8x8xf32>
    %45 = arith.subf %44, %38 : vector<8x8xf32>
    %46 = arith.mulf %45, %43 : vector<8x8xf32>
    %47 = vector.extract_strided_slice %17 {offsets = [0, 0], sizes = [8, 8], strides = [1, 1]} : vector<8x16xf32> to vector<8x8xf32>
    %48 = arith.mulf %38, %47 : vector<8x8xf32>
    %49 = arith.addf %46, %48 : vector<8x8xf32>
    %50 = vector.extract_strided_slice %22 {offsets = [0, 0], sizes = [8, 8], strides = [1, 1]} : vector<8x24xf32> to vector<8x8xf32>
    %51 = vector.extract_strided_slice %20 {offsets = [0, 24], sizes = [8, 8], strides = [1, 1]} : vector<8x48xf32> to vector<8x8xf32>
    %52 = arith.addf %50, %51 : vector<8x8xf32>
    %53 = arith.negf %52 : vector<8x8xf32>
    %54 = math.exp %53 : vector<8x8xf32>
    %cst_15 = arith.constant 1.000000e+00 : f32
    %55 = vector.broadcast %cst_15 : f32 to vector<8x8xf32>
    %56 = arith.addf %55, %54 : vector<8x8xf32>
    %57 = arith.divf %55, %56 : vector<8x8xf32>
    %58 = vector.extract_strided_slice %22 {offsets = [0, 8], sizes = [8, 8], strides = [1, 1]} : vector<8x24xf32> to vector<8x8xf32>
    %59 = vector.extract_strided_slice %20 {offsets = [0, 32], sizes = [8, 8], strides = [1, 1]} : vector<8x48xf32> to vector<8x8xf32>
    %60 = arith.addf %58, %59 : vector<8x8xf32>
    %61 = arith.negf %60 : vector<8x8xf32>
    %62 = math.exp %61 : vector<8x8xf32>
    %cst_16 = arith.constant 1.000000e+00 : f32
    %63 = vector.broadcast %cst_16 : f32 to vector<8x8xf32>
    %64 = arith.addf %63, %62 : vector<8x8xf32>
    %65 = arith.divf %63, %64 : vector<8x8xf32>
    %66 = vector.extract_strided_slice %22 {offsets = [0, 16], sizes = [8, 8], strides = [1, 1]} : vector<8x24xf32> to vector<8x8xf32>
    %67 = vector.extract_strided_slice %20 {offsets = [0, 40], sizes = [8, 8], strides = [1, 1]} : vector<8x48xf32> to vector<8x8xf32>
    %68 = arith.mulf %57, %67 : vector<8x8xf32>
    %69 = arith.addf %66, %68 : vector<8x8xf32>
    %70 = math.tanh %69 : vector<8x8xf32>
    %cst_17 = arith.constant 1.000000e+00 : f32
    %71 = vector.broadcast %cst_17 : f32 to vector<8x8xf32>
    %72 = arith.subf %71, %65 : vector<8x8xf32>
    %73 = arith.mulf %72, %70 : vector<8x8xf32>
    %74 = vector.extract_strided_slice %17 {offsets = [0, 8], sizes = [8, 8], strides = [1, 1]} : vector<8x16xf32> to vector<8x8xf32>
    %75 = arith.mulf %65, %74 : vector<8x8xf32>
    %76 = arith.addf %73, %75 : vector<8x8xf32>
    %77 = tpu.concatenate %49, %76 in 1 : vector<8x8xf32>, vector<8x8xf32> -> vector<8x16xf32>
    %cst_18 = arith.constant dense<0.000000e+00> : vector<8x48xf32>
    %78 = tpu.matmul %77, %2, %cst_18 {dimension_numbers = #tpu.dot_dimension_numbers<[1], [0], [0], [1], [0, 0, 1, 1], [], []>} : vector<8x16xf32>, vector<16x48xf32>, vector<8x48xf32> -> vector<8x48xf32>
    %79 = vector.broadcast %5 : vector<1x48xf32> to vector<8x48xf32>
    %80 = arith.addf %78, %79 : vector<8x48xf32>
    %81 = vector.extract_strided_slice %16 {offsets = [8, 0], sizes = [8, 24], strides = [1, 1]} : vector<48x48xf32> to vector<8x24xf32>
    %82 = vector.extract_strided_slice %16 {offsets = [32, 24], sizes = [8, 24], strides = [1, 1]} : vector<48x48xf32> to vector<8x24xf32>
    %83 = vector.extract_strided_slice %81 {offsets = [0, 0], sizes = [8, 8], strides = [1, 1]} : vector<8x24xf32> to vector<8x8xf32>
    %84 = vector.extract_strided_slice %80 {offsets = [0, 0], sizes = [8, 8], strides = [1, 1]} : vector<8x48xf32> to vector<8x8xf32>
    %85 = arith.addf %83, %84 : vector<8x8xf32>
    %86 = arith.negf %85 : vector<8x8xf32>
    %87 = math.exp %86 : vector<8x8xf32>
    %cst_19 = arith.constant 1.000000e+00 : f32
    %88 = vector.broadcast %cst_19 : f32 to vector<8x8xf32>
    %89 = arith.addf %88, %87 : vector<8x8xf32>
    %90 = arith.divf %88, %89 : vector<8x8xf32>
    %91 = vector.extract_strided_slice %81 {offsets = [0, 8], sizes = [8, 8], strides = [1, 1]} : vector<8x24xf32> to vector<8x8xf32>
    %92 = vector.extract_strided_slice %80 {offsets = [0, 8], sizes = [8, 8], strides = [1, 1]} : vector<8x48xf32> to vector<8x8xf32>
    %93 = arith.addf %91, %92 : vector<8x8xf32>
    %94 = arith.negf %93 : vector<8x8xf32>
    %95 = math.exp %94 : vector<8x8xf32>
    %cst_20 = arith.constant 1.000000e+00 : f32
    %96 = vector.broadcast %cst_20 : f32 to vector<8x8xf32>
    %97 = arith.addf %96, %95 : vector<8x8xf32>
    %98 = arith.divf %96, %97 : vector<8x8xf32>
    %99 = vector.extract_strided_slice %81 {offsets = [0, 16], sizes = [8, 8], strides = [1, 1]} : vector<8x24xf32> to vector<8x8xf32>
    %100 = vector.extract_strided_slice %80 {offsets = [0, 16], sizes = [8, 8], strides = [1, 1]} : vector<8x48xf32> to vector<8x8xf32>
    %101 = arith.mulf %90, %100 : vector<8x8xf32>
    %102 = arith.addf %99, %101 : vector<8x8xf32>
    %103 = math.tanh %102 : vector<8x8xf32>
    %cst_21 = arith.constant 1.000000e+00 : f32
    %104 = vector.broadcast %cst_21 : f32 to vector<8x8xf32>
    %105 = arith.subf %104, %98 : vector<8x8xf32>
    %106 = arith.mulf %105, %103 : vector<8x8xf32>
    %107 = vector.extract_strided_slice %77 {offsets = [0, 0], sizes = [8, 8], strides = [1, 1]} : vector<8x16xf32> to vector<8x8xf32>
    %108 = arith.mulf %98, %107 : vector<8x8xf32>
    %109 = arith.addf %106, %108 : vector<8x8xf32>
    %110 = vector.extract_strided_slice %82 {offsets = [0, 0], sizes = [8, 8], strides = [1, 1]} : vector<8x24xf32> to vector<8x8xf32>
    %111 = vector.extract_strided_slice %80 {offsets = [0, 24], sizes = [8, 8], strides = [1, 1]} : vector<8x48xf32> to vector<8x8xf32>
    %112 = arith.addf %110, %111 : vector<8x8xf32>
    %113 = arith.negf %112 : vector<8x8xf32>
    %114 = math.exp %113 : vector<8x8xf32>
    %cst_22 = arith.constant 1.000000e+00 : f32
    %115 = vector.broadcast %cst_22 : f32 to vector<8x8xf32>
    %116 = arith.addf %115, %114 : vector<8x8xf32>
    %117 = arith.divf %115, %116 : vector<8x8xf32>
    %118 = vector.extract_strided_slice %82 {offsets = [0, 8], sizes = [8, 8], strides = [1, 1]} : vector<8x24xf32> to vector<8x8xf32>
    %119 = vector.extract_strided_slice %80 {offsets = [0, 32], sizes = [8, 8], strides = [1, 1]} : vector<8x48xf32> to vector<8x8xf32>
    %120 = arith.addf %118, %119 : vector<8x8xf32>
    %121 = arith.negf %120 : vector<8x8xf32>
    %122 = math.exp %121 : vector<8x8xf32>
    %cst_23 = arith.constant 1.000000e+00 : f32
    %123 = vector.broadcast %cst_23 : f32 to vector<8x8xf32>
    %124 = arith.addf %123, %122 : vector<8x8xf32>
    %125 = arith.divf %123, %124 : vector<8x8xf32>
    %126 = vector.extract_strided_slice %82 {offsets = [0, 16], sizes = [8, 8], strides = [1, 1]} : vector<8x24xf32> to vector<8x8xf32>
    %127 = vector.extract_strided_slice %80 {offsets = [0, 40], sizes = [8, 8], strides = [1, 1]} : vector<8x48xf32> to vector<8x8xf32>
    %128 = arith.mulf %117, %127 : vector<8x8xf32>
    %129 = arith.addf %126, %128 : vector<8x8xf32>
    %130 = math.tanh %129 : vector<8x8xf32>
    %cst_24 = arith.constant 1.000000e+00 : f32
    %131 = vector.broadcast %cst_24 : f32 to vector<8x8xf32>
    %132 = arith.subf %131, %125 : vector<8x8xf32>
    %133 = arith.mulf %132, %130 : vector<8x8xf32>
    %134 = vector.extract_strided_slice %77 {offsets = [0, 8], sizes = [8, 8], strides = [1, 1]} : vector<8x16xf32> to vector<8x8xf32>
    %135 = arith.mulf %125, %134 : vector<8x8xf32>
    %136 = arith.addf %133, %135 : vector<8x8xf32>
    %137 = tpu.concatenate %109, %136 in 1 : vector<8x8xf32>, vector<8x8xf32> -> vector<8x16xf32>
    %cst_25 = arith.constant dense<0.000000e+00> : vector<8x48xf32>
    %138 = tpu.matmul %137, %2, %cst_25 {dimension_numbers = #tpu.dot_dimension_numbers<[1], [0], [0], [1], [0, 0, 1, 1], [], []>} : vector<8x16xf32>, vector<16x48xf32>, vector<8x48xf32> -> vector<8x48xf32>
    %139 = vector.broadcast %5 : vector<1x48xf32> to vector<8x48xf32>
    %140 = arith.addf %138, %139 : vector<8x48xf32>
    %141 = vector.extract_strided_slice %16 {offsets = [16, 0], sizes = [8, 24], strides = [1, 1]} : vector<48x48xf32> to vector<8x24xf32>
    %142 = vector.extract_strided_slice %16 {offsets = [24, 24], sizes = [8, 24], strides = [1, 1]} : vector<48x48xf32> to vector<8x24xf32>
    %143 = vector.extract_strided_slice %141 {offsets = [0, 0], sizes = [8, 8], strides = [1, 1]} : vector<8x24xf32> to vector<8x8xf32>
    %144 = vector.extract_strided_slice %140 {offsets = [0, 0], sizes = [8, 8], strides = [1, 1]} : vector<8x48xf32> to vector<8x8xf32>
    %145 = arith.addf %143, %144 : vector<8x8xf32>
    %146 = arith.negf %145 : vector<8x8xf32>
    %147 = math.exp %146 : vector<8x8xf32>
    %cst_26 = arith.constant 1.000000e+00 : f32
    %148 = vector.broadcast %cst_26 : f32 to vector<8x8xf32>
    %149 = arith.addf %148, %147 : vector<8x8xf32>
    %150 = arith.divf %148, %149 : vector<8x8xf32>
    %151 = vector.extract_strided_slice %141 {offsets = [0, 8], sizes = [8, 8], strides = [1, 1]} : vector<8x24xf32> to vector<8x8xf32>
    %152 = vector.extract_strided_slice %140 {offsets = [0, 8], sizes = [8, 8], strides = [1, 1]} : vector<8x48xf32> to vector<8x8xf32>
    %153 = arith.addf %151, %152 : vector<8x8xf32>
    %154 = arith.negf %153 : vector<8x8xf32>
    %155 = math.exp %154 : vector<8x8xf32>
    %cst_27 = arith.constant 1.000000e+00 : f32
    %156 = vector.broadcast %cst_27 : f32 to vector<8x8xf32>
    %157 = arith.addf %156, %155 : vector<8x8xf32>
    %158 = arith.divf %156, %157 : vector<8x8xf32>
    %159 = vector.extract_strided_slice %141 {offsets = [0, 16], sizes = [8, 8], strides = [1, 1]} : vector<8x24xf32> to vector<8x8xf32>
    %160 = vector.extract_strided_slice %140 {offsets = [0, 16], sizes = [8, 8], strides = [1, 1]} : vector<8x48xf32> to vector<8x8xf32>
    %161 = arith.mulf %150, %160 : vector<8x8xf32>
    %162 = arith.addf %159, %161 : vector<8x8xf32>
    %163 = math.tanh %162 : vector<8x8xf32>
    %cst_28 = arith.constant 1.000000e+00 : f32
    %164 = vector.broadcast %cst_28 : f32 to vector<8x8xf32>
    %165 = arith.subf %164, %158 : vector<8x8xf32>
    %166 = arith.mulf %165, %163 : vector<8x8xf32>
    %167 = vector.extract_strided_slice %137 {offsets = [0, 0], sizes = [8, 8], strides = [1, 1]} : vector<8x16xf32> to vector<8x8xf32>
    %168 = arith.mulf %158, %167 : vector<8x8xf32>
    %169 = arith.addf %166, %168 : vector<8x8xf32>
    %170 = vector.extract_strided_slice %142 {offsets = [0, 0], sizes = [8, 8], strides = [1, 1]} : vector<8x24xf32> to vector<8x8xf32>
    %171 = vector.extract_strided_slice %140 {offsets = [0, 24], sizes = [8, 8], strides = [1, 1]} : vector<8x48xf32> to vector<8x8xf32>
    %172 = arith.addf %170, %171 : vector<8x8xf32>
    %173 = arith.negf %172 : vector<8x8xf32>
    %174 = math.exp %173 : vector<8x8xf32>
    %cst_29 = arith.constant 1.000000e+00 : f32
    %175 = vector.broadcast %cst_29 : f32 to vector<8x8xf32>
    %176 = arith.addf %175, %174 : vector<8x8xf32>
    %177 = arith.divf %175, %176 : vector<8x8xf32>
    %178 = vector.extract_strided_slice %142 {offsets = [0, 8], sizes = [8, 8], strides = [1, 1]} : vector<8x24xf32> to vector<8x8xf32>
    %179 = vector.extract_strided_slice %140 {offsets = [0, 32], sizes = [8, 8], strides = [1, 1]} : vector<8x48xf32> to vector<8x8xf32>
    %180 = arith.addf %178, %179 : vector<8x8xf32>
    %181 = arith.negf %180 : vector<8x8xf32>
    %182 = math.exp %181 : vector<8x8xf32>
    %cst_30 = arith.constant 1.000000e+00 : f32
    %183 = vector.broadcast %cst_30 : f32 to vector<8x8xf32>
    %184 = arith.addf %183, %182 : vector<8x8xf32>
    %185 = arith.divf %183, %184 : vector<8x8xf32>
    %186 = vector.extract_strided_slice %142 {offsets = [0, 16], sizes = [8, 8], strides = [1, 1]} : vector<8x24xf32> to vector<8x8xf32>
    %187 = vector.extract_strided_slice %140 {offsets = [0, 40], sizes = [8, 8], strides = [1, 1]} : vector<8x48xf32> to vector<8x8xf32>
    %188 = arith.mulf %177, %187 : vector<8x8xf32>
    %189 = arith.addf %186, %188 : vector<8x8xf32>
    %190 = math.tanh %189 : vector<8x8xf32>
    %cst_31 = arith.constant 1.000000e+00 : f32
    %191 = vector.broadcast %cst_31 : f32 to vector<8x8xf32>
    %192 = arith.subf %191, %185 : vector<8x8xf32>
    %193 = arith.mulf %192, %190 : vector<8x8xf32>
    %194 = vector.extract_strided_slice %137 {offsets = [0, 8], sizes = [8, 8], strides = [1, 1]} : vector<8x16xf32> to vector<8x8xf32>
    %195 = arith.mulf %185, %194 : vector<8x8xf32>
    %196 = arith.addf %193, %195 : vector<8x8xf32>
    %197 = tpu.concatenate %169, %196 in 1 : vector<8x8xf32>, vector<8x8xf32> -> vector<8x16xf32>
    %cst_32 = arith.constant dense<0.000000e+00> : vector<8x48xf32>
    %198 = tpu.matmul %197, %2, %cst_32 {dimension_numbers = #tpu.dot_dimension_numbers<[1], [0], [0], [1], [0, 0, 1, 1], [], []>} : vector<8x16xf32>, vector<16x48xf32>, vector<8x48xf32> -> vector<8x48xf32>
    %199 = vector.broadcast %5 : vector<1x48xf32> to vector<8x48xf32>
    %200 = arith.addf %198, %199 : vector<8x48xf32>
    %201 = vector.extract_strided_slice %16 {offsets = [24, 0], sizes = [8, 24], strides = [1, 1]} : vector<48x48xf32> to vector<8x24xf32>
    %202 = vector.extract_strided_slice %16 {offsets = [16, 24], sizes = [8, 24], strides = [1, 1]} : vector<48x48xf32> to vector<8x24xf32>
    %203 = vector.extract_strided_slice %201 {offsets = [0, 0], sizes = [8, 8], strides = [1, 1]} : vector<8x24xf32> to vector<8x8xf32>
    %204 = vector.extract_strided_slice %200 {offsets = [0, 0], sizes = [8, 8], strides = [1, 1]} : vector<8x48xf32> to vector<8x8xf32>
    %205 = arith.addf %203, %204 : vector<8x8xf32>
    %206 = arith.negf %205 : vector<8x8xf32>
    %207 = math.exp %206 : vector<8x8xf32>
    %cst_33 = arith.constant 1.000000e+00 : f32
    %208 = vector.broadcast %cst_33 : f32 to vector<8x8xf32>
    %209 = arith.addf %208, %207 : vector<8x8xf32>
    %210 = arith.divf %208, %209 : vector<8x8xf32>
    %211 = vector.extract_strided_slice %201 {offsets = [0, 8], sizes = [8, 8], strides = [1, 1]} : vector<8x24xf32> to vector<8x8xf32>
    %212 = vector.extract_strided_slice %200 {offsets = [0, 8], sizes = [8, 8], strides = [1, 1]} : vector<8x48xf32> to vector<8x8xf32>
    %213 = arith.addf %211, %212 : vector<8x8xf32>
    %214 = arith.negf %213 : vector<8x8xf32>
    %215 = math.exp %214 : vector<8x8xf32>
    %cst_34 = arith.constant 1.000000e+00 : f32
    %216 = vector.broadcast %cst_34 : f32 to vector<8x8xf32>
    %217 = arith.addf %216, %215 : vector<8x8xf32>
    %218 = arith.divf %216, %217 : vector<8x8xf32>
    %219 = vector.extract_strided_slice %201 {offsets = [0, 16], sizes = [8, 8], strides = [1, 1]} : vector<8x24xf32> to vector<8x8xf32>
    %220 = vector.extract_strided_slice %200 {offsets = [0, 16], sizes = [8, 8], strides = [1, 1]} : vector<8x48xf32> to vector<8x8xf32>
    %221 = arith.mulf %210, %220 : vector<8x8xf32>
    %222 = arith.addf %219, %221 : vector<8x8xf32>
    %223 = math.tanh %222 : vector<8x8xf32>
    %cst_35 = arith.constant 1.000000e+00 : f32
    %224 = vector.broadcast %cst_35 : f32 to vector<8x8xf32>
    %225 = arith.subf %224, %218 : vector<8x8xf32>
    %226 = arith.mulf %225, %223 : vector<8x8xf32>
    %227 = vector.extract_strided_slice %197 {offsets = [0, 0], sizes = [8, 8], strides = [1, 1]} : vector<8x16xf32> to vector<8x8xf32>
    %228 = arith.mulf %218, %227 : vector<8x8xf32>
    %229 = arith.addf %226, %228 : vector<8x8xf32>
    %230 = vector.extract_strided_slice %202 {offsets = [0, 0], sizes = [8, 8], strides = [1, 1]} : vector<8x24xf32> to vector<8x8xf32>
    %231 = vector.extract_strided_slice %200 {offsets = [0, 24], sizes = [8, 8], strides = [1, 1]} : vector<8x48xf32> to vector<8x8xf32>
    %232 = arith.addf %230, %231 : vector<8x8xf32>
    %233 = arith.negf %232 : vector<8x8xf32>
    %234 = math.exp %233 : vector<8x8xf32>
    %cst_36 = arith.constant 1.000000e+00 : f32
    %235 = vector.broadcast %cst_36 : f32 to vector<8x8xf32>
    %236 = arith.addf %235, %234 : vector<8x8xf32>
    %237 = arith.divf %235, %236 : vector<8x8xf32>
    %238 = vector.extract_strided_slice %202 {offsets = [0, 8], sizes = [8, 8], strides = [1, 1]} : vector<8x24xf32> to vector<8x8xf32>
    %239 = vector.extract_strided_slice %200 {offsets = [0, 32], sizes = [8, 8], strides = [1, 1]} : vector<8x48xf32> to vector<8x8xf32>
    %240 = arith.addf %238, %239 : vector<8x8xf32>
    %241 = arith.negf %240 : vector<8x8xf32>
    %242 = math.exp %241 : vector<8x8xf32>
    %cst_37 = arith.constant 1.000000e+00 : f32
    %243 = vector.broadcast %cst_37 : f32 to vector<8x8xf32>
    %244 = arith.addf %243, %242 : vector<8x8xf32>
    %245 = arith.divf %243, %244 : vector<8x8xf32>
    %246 = vector.extract_strided_slice %202 {offsets = [0, 16], sizes = [8, 8], strides = [1, 1]} : vector<8x24xf32> to vector<8x8xf32>
    %247 = vector.extract_strided_slice %200 {offsets = [0, 40], sizes = [8, 8], strides = [1, 1]} : vector<8x48xf32> to vector<8x8xf32>
    %248 = arith.mulf %237, %247 : vector<8x8xf32>
    %249 = arith.addf %246, %248 : vector<8x8xf32>
    %250 = math.tanh %249 : vector<8x8xf32>
    %cst_38 = arith.constant 1.000000e+00 : f32
    %251 = vector.broadcast %cst_38 : f32 to vector<8x8xf32>
    %252 = arith.subf %251, %245 : vector<8x8xf32>
    %253 = arith.mulf %252, %250 : vector<8x8xf32>
    %254 = vector.extract_strided_slice %197 {offsets = [0, 8], sizes = [8, 8], strides = [1, 1]} : vector<8x16xf32> to vector<8x8xf32>
    %255 = arith.mulf %245, %254 : vector<8x8xf32>
    %256 = arith.addf %253, %255 : vector<8x8xf32>
    %257 = tpu.concatenate %229, %256 in 1 : vector<8x8xf32>, vector<8x8xf32> -> vector<8x16xf32>
    %cst_39 = arith.constant dense<0.000000e+00> : vector<8x48xf32>
    %258 = tpu.matmul %257, %2, %cst_39 {dimension_numbers = #tpu.dot_dimension_numbers<[1], [0], [0], [1], [0, 0, 1, 1], [], []>} : vector<8x16xf32>, vector<16x48xf32>, vector<8x48xf32> -> vector<8x48xf32>
    %259 = vector.broadcast %5 : vector<1x48xf32> to vector<8x48xf32>
    %260 = arith.addf %258, %259 : vector<8x48xf32>
    %261 = vector.extract_strided_slice %16 {offsets = [32, 0], sizes = [8, 24], strides = [1, 1]} : vector<48x48xf32> to vector<8x24xf32>
    %262 = vector.extract_strided_slice %16 {offsets = [8, 24], sizes = [8, 24], strides = [1, 1]} : vector<48x48xf32> to vector<8x24xf32>
    %263 = vector.extract_strided_slice %261 {offsets = [0, 0], sizes = [8, 8], strides = [1, 1]} : vector<8x24xf32> to vector<8x8xf32>
    %264 = vector.extract_strided_slice %260 {offsets = [0, 0], sizes = [8, 8], strides = [1, 1]} : vector<8x48xf32> to vector<8x8xf32>
    %265 = arith.addf %263, %264 : vector<8x8xf32>
    %266 = arith.negf %265 : vector<8x8xf32>
    %267 = math.exp %266 : vector<8x8xf32>
    %cst_40 = arith.constant 1.000000e+00 : f32
    %268 = vector.broadcast %cst_40 : f32 to vector<8x8xf32>
    %269 = arith.addf %268, %267 : vector<8x8xf32>
    %270 = arith.divf %268, %269 : vector<8x8xf32>
    %271 = vector.extract_strided_slice %261 {offsets = [0, 8], sizes = [8, 8], strides = [1, 1]} : vector<8x24xf32> to vector<8x8xf32>
    %272 = vector.extract_strided_slice %260 {offsets = [0, 8], sizes = [8, 8], strides = [1, 1]} : vector<8x48xf32> to vector<8x8xf32>
    %273 = arith.addf %271, %272 : vector<8x8xf32>
    %274 = arith.negf %273 : vector<8x8xf32>
    %275 = math.exp %274 : vector<8x8xf32>
    %cst_41 = arith.constant 1.000000e+00 : f32
    %276 = vector.broadcast %cst_41 : f32 to vector<8x8xf32>
    %277 = arith.addf %276, %275 : vector<8x8xf32>
    %278 = arith.divf %276, %277 : vector<8x8xf32>
    %279 = vector.extract_strided_slice %261 {offsets = [0, 16], sizes = [8, 8], strides = [1, 1]} : vector<8x24xf32> to vector<8x8xf32>
    %280 = vector.extract_strided_slice %260 {offsets = [0, 16], sizes = [8, 8], strides = [1, 1]} : vector<8x48xf32> to vector<8x8xf32>
    %281 = arith.mulf %270, %280 : vector<8x8xf32>
    %282 = arith.addf %279, %281 : vector<8x8xf32>
    %283 = math.tanh %282 : vector<8x8xf32>
    %cst_42 = arith.constant 1.000000e+00 : f32
    %284 = vector.broadcast %cst_42 : f32 to vector<8x8xf32>
    %285 = arith.subf %284, %278 : vector<8x8xf32>
    %286 = arith.mulf %285, %283 : vector<8x8xf32>
    %287 = vector.extract_strided_slice %257 {offsets = [0, 0], sizes = [8, 8], strides = [1, 1]} : vector<8x16xf32> to vector<8x8xf32>
    %288 = arith.mulf %278, %287 : vector<8x8xf32>
    %289 = arith.addf %286, %288 : vector<8x8xf32>
    %290 = vector.extract_strided_slice %262 {offsets = [0, 0], sizes = [8, 8], strides = [1, 1]} : vector<8x24xf32> to vector<8x8xf32>
    %291 = vector.extract_strided_slice %260 {offsets = [0, 24], sizes = [8, 8], strides = [1, 1]} : vector<8x48xf32> to vector<8x8xf32>
    %292 = arith.addf %290, %291 : vector<8x8xf32>
    %293 = arith.negf %292 : vector<8x8xf32>
    %294 = math.exp %293 : vector<8x8xf32>
    %cst_43 = arith.constant 1.000000e+00 : f32
    %295 = vector.broadcast %cst_43 : f32 to vector<8x8xf32>
    %296 = arith.addf %295, %294 : vector<8x8xf32>
    %297 = arith.divf %295, %296 : vector<8x8xf32>
    %298 = vector.extract_strided_slice %262 {offsets = [0, 8], sizes = [8, 8], strides = [1, 1]} : vector<8x24xf32> to vector<8x8xf32>
    %299 = vector.extract_strided_slice %260 {offsets = [0, 32], sizes = [8, 8], strides = [1, 1]} : vector<8x48xf32> to vector<8x8xf32>
    %300 = arith.addf %298, %299 : vector<8x8xf32>
    %301 = arith.negf %300 : vector<8x8xf32>
    %302 = math.exp %301 : vector<8x8xf32>
    %cst_44 = arith.constant 1.000000e+00 : f32
    %303 = vector.broadcast %cst_44 : f32 to vector<8x8xf32>
    %304 = arith.addf %303, %302 : vector<8x8xf32>
    %305 = arith.divf %303, %304 : vector<8x8xf32>
    %306 = vector.extract_strided_slice %262 {offsets = [0, 16], sizes = [8, 8], strides = [1, 1]} : vector<8x24xf32> to vector<8x8xf32>
    %307 = vector.extract_strided_slice %260 {offsets = [0, 40], sizes = [8, 8], strides = [1, 1]} : vector<8x48xf32> to vector<8x8xf32>
    %308 = arith.mulf %297, %307 : vector<8x8xf32>
    %309 = arith.addf %306, %308 : vector<8x8xf32>
    %310 = math.tanh %309 : vector<8x8xf32>
    %cst_45 = arith.constant 1.000000e+00 : f32
    %311 = vector.broadcast %cst_45 : f32 to vector<8x8xf32>
    %312 = arith.subf %311, %305 : vector<8x8xf32>
    %313 = arith.mulf %312, %310 : vector<8x8xf32>
    %314 = vector.extract_strided_slice %257 {offsets = [0, 8], sizes = [8, 8], strides = [1, 1]} : vector<8x16xf32> to vector<8x8xf32>
    %315 = arith.mulf %305, %314 : vector<8x8xf32>
    %316 = arith.addf %313, %315 : vector<8x8xf32>
    %317 = tpu.concatenate %289, %316 in 1 : vector<8x8xf32>, vector<8x8xf32> -> vector<8x16xf32>
    %cst_46 = arith.constant dense<0.000000e+00> : vector<8x48xf32>
    %318 = tpu.matmul %317, %2, %cst_46 {dimension_numbers = #tpu.dot_dimension_numbers<[1], [0], [0], [1], [0, 0, 1, 1], [], []>} : vector<8x16xf32>, vector<16x48xf32>, vector<8x48xf32> -> vector<8x48xf32>
    %319 = vector.broadcast %5 : vector<1x48xf32> to vector<8x48xf32>
    %320 = arith.addf %318, %319 : vector<8x48xf32>
    %321 = vector.extract_strided_slice %16 {offsets = [40, 0], sizes = [8, 24], strides = [1, 1]} : vector<48x48xf32> to vector<8x24xf32>
    %322 = vector.extract_strided_slice %16 {offsets = [0, 24], sizes = [8, 24], strides = [1, 1]} : vector<48x48xf32> to vector<8x24xf32>
    %323 = vector.extract_strided_slice %321 {offsets = [0, 0], sizes = [8, 8], strides = [1, 1]} : vector<8x24xf32> to vector<8x8xf32>
    %324 = vector.extract_strided_slice %320 {offsets = [0, 0], sizes = [8, 8], strides = [1, 1]} : vector<8x48xf32> to vector<8x8xf32>
    %325 = arith.addf %323, %324 : vector<8x8xf32>
    %326 = arith.negf %325 : vector<8x8xf32>
    %327 = math.exp %326 : vector<8x8xf32>
    %cst_47 = arith.constant 1.000000e+00 : f32
    %328 = vector.broadcast %cst_47 : f32 to vector<8x8xf32>
    %329 = arith.addf %328, %327 : vector<8x8xf32>
    %330 = arith.divf %328, %329 : vector<8x8xf32>
    %331 = vector.extract_strided_slice %321 {offsets = [0, 8], sizes = [8, 8], strides = [1, 1]} : vector<8x24xf32> to vector<8x8xf32>
    %332 = vector.extract_strided_slice %320 {offsets = [0, 8], sizes = [8, 8], strides = [1, 1]} : vector<8x48xf32> to vector<8x8xf32>
    %333 = arith.addf %331, %332 : vector<8x8xf32>
    %334 = arith.negf %333 : vector<8x8xf32>
    %335 = math.exp %334 : vector<8x8xf32>
    %cst_48 = arith.constant 1.000000e+00 : f32
    %336 = vector.broadcast %cst_48 : f32 to vector<8x8xf32>
    %337 = arith.addf %336, %335 : vector<8x8xf32>
    %338 = arith.divf %336, %337 : vector<8x8xf32>
    %339 = vector.extract_strided_slice %321 {offsets = [0, 16], sizes = [8, 8], strides = [1, 1]} : vector<8x24xf32> to vector<8x8xf32>
    %340 = vector.extract_strided_slice %320 {offsets = [0, 16], sizes = [8, 8], strides = [1, 1]} : vector<8x48xf32> to vector<8x8xf32>
    %341 = arith.mulf %330, %340 : vector<8x8xf32>
    %342 = arith.addf %339, %341 : vector<8x8xf32>
    %343 = math.tanh %342 : vector<8x8xf32>
    %cst_49 = arith.constant 1.000000e+00 : f32
    %344 = vector.broadcast %cst_49 : f32 to vector<8x8xf32>
    %345 = arith.subf %344, %338 : vector<8x8xf32>
    %346 = arith.mulf %345, %343 : vector<8x8xf32>
    %347 = vector.extract_strided_slice %317 {offsets = [0, 0], sizes = [8, 8], strides = [1, 1]} : vector<8x16xf32> to vector<8x8xf32>
    %348 = arith.mulf %338, %347 : vector<8x8xf32>
    %349 = arith.addf %346, %348 : vector<8x8xf32>
    %350 = vector.extract_strided_slice %322 {offsets = [0, 0], sizes = [8, 8], strides = [1, 1]} : vector<8x24xf32> to vector<8x8xf32>
    %351 = vector.extract_strided_slice %320 {offsets = [0, 24], sizes = [8, 8], strides = [1, 1]} : vector<8x48xf32> to vector<8x8xf32>
    %352 = arith.addf %350, %351 : vector<8x8xf32>
    %353 = arith.negf %352 : vector<8x8xf32>
    %354 = math.exp %353 : vector<8x8xf32>
    %cst_50 = arith.constant 1.000000e+00 : f32
    %355 = vector.broadcast %cst_50 : f32 to vector<8x8xf32>
    %356 = arith.addf %355, %354 : vector<8x8xf32>
    %357 = arith.divf %355, %356 : vector<8x8xf32>
    %358 = vector.extract_strided_slice %322 {offsets = [0, 8], sizes = [8, 8], strides = [1, 1]} : vector<8x24xf32> to vector<8x8xf32>
    %359 = vector.extract_strided_slice %320 {offsets = [0, 32], sizes = [8, 8], strides = [1, 1]} : vector<8x48xf32> to vector<8x8xf32>
    %360 = arith.addf %358, %359 : vector<8x8xf32>
    %361 = arith.negf %360 : vector<8x8xf32>
    %362 = math.exp %361 : vector<8x8xf32>
    %cst_51 = arith.constant 1.000000e+00 : f32
    %363 = vector.broadcast %cst_51 : f32 to vector<8x8xf32>
    %364 = arith.addf %363, %362 : vector<8x8xf32>
    %365 = arith.divf %363, %364 : vector<8x8xf32>
    %366 = vector.extract_strided_slice %322 {offsets = [0, 16], sizes = [8, 8], strides = [1, 1]} : vector<8x24xf32> to vector<8x8xf32>
    %367 = vector.extract_strided_slice %320 {offsets = [0, 40], sizes = [8, 8], strides = [1, 1]} : vector<8x48xf32> to vector<8x8xf32>
    %368 = arith.mulf %357, %367 : vector<8x8xf32>
    %369 = arith.addf %366, %368 : vector<8x8xf32>
    %370 = math.tanh %369 : vector<8x8xf32>
    %cst_52 = arith.constant 1.000000e+00 : f32
    %371 = vector.broadcast %cst_52 : f32 to vector<8x8xf32>
    %372 = arith.subf %371, %365 : vector<8x8xf32>
    %373 = arith.mulf %372, %370 : vector<8x8xf32>
    %374 = vector.extract_strided_slice %317 {offsets = [0, 8], sizes = [8, 8], strides = [1, 1]} : vector<8x16xf32> to vector<8x8xf32>
    %375 = arith.mulf %365, %374 : vector<8x8xf32>
    %376 = arith.addf %373, %375 : vector<8x8xf32>
    %377 = tpu.concatenate %349, %376 in 1 : vector<8x8xf32>, vector<8x8xf32> -> vector<8x16xf32>
    %378 = tpu.concatenate %49, %109, %169, %229, %289, %349 in 0 : vector<8x8xf32>, vector<8x8xf32>, vector<8x8xf32>, vector<8x8xf32>, vector<8x8xf32>, vector<8x8xf32> -> vector<48x8xf32>
    %379 = tpu.concatenate %376, %316, %256, %196, %136, %76 in 0 : vector<8x8xf32>, vector<8x8xf32>, vector<8x8xf32>, vector<8x8xf32>, vector<8x8xf32>, vector<8x8xf32> -> vector<48x8xf32>
    %380 = tpu.concatenate %378, %379 in 1 : vector<48x8xf32>, vector<48x8xf32> -> vector<48x16xf32>
    %381 = vector.shape_cast %380 : vector<48x16xf32> to vector<6x8x16xf32>
    %c0_53 = arith.constant 0 : index
    %c0_54 = arith.constant 0 : index
    %c0_55 = arith.constant 0 : index
    %382 = vector.load %arg6[%c0_53, %c0_54, %c0_55] : memref<6x8x16xf32, #tpu.memory_space<vmem>>, vector<6x8x16xf32>
    tpu.vector_store %arg6[%c0_53, %c0_54, %c0_55], %381 {strides = array<i32>} : memref<6x8x16xf32, #tpu.memory_space<vmem>>, vector<6x8x16xf32>,
    %cst_56 = arith.constant dense<0.000000e+00> : vector<8x8xf32>
    %383 = tpu.matmul %377, %3, %cst_56 {dimension_numbers = #tpu.dot_dimension_numbers<[1], [0], [0], [1], [0, 0, 1, 1], [], []>} : vector<8x16xf32>, vector<16x8xf32>, vector<8x8xf32> -> vector<8x8xf32>
    %384 = vector.broadcast %6 : vector<1x8xf32> to vector<8x8xf32>
    %385 = arith.addf %383, %384 : vector<8x8xf32>
    %386 = math.tanh %385 : vector<8x8xf32>
    %c0_57 = arith.constant 0 : index
    %c0_58 = arith.constant 0 : index
    %387 = vector.load %arg7[%c0_57, %c0_58] : memref<8x8xf32, #tpu.memory_space<vmem>>, vector<8x8xf32>
    tpu.vector_store %arg7[%c0_57, %c0_58], %386 {strides = array<i32>} : memref<8x8xf32, #tpu.memory_space<vmem>>, vector<8x8xf32>,
    %c0_59 = arith.constant 0 : index
    %c0_60 = arith.constant 0 : index
    %388 = vector.load %arg4[%c0_59, %c0_60] : memref<128x24xf32, #tpu.memory_space<vmem>>, vector<24x8xf32>
    %c24_61 = arith.constant 24 : index
    %c0_62 = arith.constant 0 : index
    %389 = vector.load %arg4[%c24_61, %c0_62] : memref<128x24xf32, #tpu.memory_space<vmem>>, vector<8x8xf32>
    %c32_63 = arith.constant 32 : index
    %c0_64 = arith.constant 0 : index
    %390 = vector.load %arg4[%c32_63, %c0_64] : memref<128x24xf32, #tpu.memory_space<vmem>>, vector<16x8xf32>
    %c48_65 = arith.constant 48 : index
    %c0_66 = arith.constant 0 : index
    %391 = vector.load %arg4[%c48_65, %c0_66] : memref<128x24xf32, #tpu.memory_space<vmem>>, vector<8x24xf32>
    %c56 = arith.constant 56 : index
    %c0_67 = arith.constant 0 : index
    %392 = vector.load %arg4[%c56, %c0_67] : memref<128x24xf32, #tpu.memory_space<vmem>>, vector<16x24xf32>
    %c72 = arith.constant 72 : index
    %c0_68 = arith.constant 0 : index
    %393 = vector.load %arg4[%c72, %c0_68] : memref<128x24xf32, #tpu.memory_space<vmem>>, vector<8x24xf32>
    %c80 = arith.constant 80 : index
    %c0_69 = arith.constant 0 : index
    %394 = vector.load %arg4[%c80, %c0_69] : memref<128x24xf32, #tpu.memory_space<vmem>>, vector<8x24xf32>
    %c88 = arith.constant 88 : index
    %c0_70 = arith.constant 0 : index
    %395 = vector.load %arg4[%c88, %c0_70] : memref<128x24xf32, #tpu.memory_space<vmem>>, vector<16x24xf32>
    %c104 = arith.constant 104 : index
    %c0_71 = arith.constant 0 : index
    %396 = vector.load %arg4[%c104, %c0_71] : memref<128x24xf32, #tpu.memory_space<vmem>>, vector<8x24xf32>
    %c112 = arith.constant 112 : index
    %c0_72 = arith.constant 0 : index
    %397 = vector.load %arg4[%c112, %c0_72] : memref<128x24xf32, #tpu.memory_space<vmem>>, vector<1x8xf32>
    %c113 = arith.constant 113 : index
    %c0_73 = arith.constant 0 : index
    %398 = vector.load %arg4[%c113, %c0_73] : memref<128x24xf32, #tpu.memory_space<vmem>>, vector<1x24xf32>
    %c114 = arith.constant 114 : index
    %c0_74 = arith.constant 0 : index
    %399 = vector.load %arg4[%c114, %c0_74] : memref<128x24xf32, #tpu.memory_space<vmem>>, vector<1x24xf32>
    %c115 = arith.constant 115 : index
    %c0_75 = arith.constant 0 : index
    %400 = vector.load %arg4[%c115, %c0_75] : memref<128x24xf32, #tpu.memory_space<vmem>>, vector<1x24xf32>
    %c120 = arith.constant 120 : index
    %c0_76 = arith.constant 0 : index
    %401 = vector.load %arg4[%c120, %c0_76] : memref<128x24xf32, #tpu.memory_space<vmem>>, vector<8x1xf32>
    %cst_77 = arith.constant dense<0.000000e+00> : vector<48x8xf32>
    %402 = tpu.matmul %380, %390, %cst_77 {dimension_numbers = #tpu.dot_dimension_numbers<[1], [0], [0], [1], [0, 0, 1, 1], [], []>} : vector<48x16xf32>, vector<16x8xf32>, vector<48x8xf32> -> vector<48x8xf32>
    %403 = vector.broadcast %397 : vector<1x8xf32> to vector<48x8xf32>
    %404 = arith.addf %402, %403 : vector<48x8xf32>
    %405 = tpu.iota {dimensions = array<i32: 0>} : vector<8x48xi32>
    %406 = tpu.iota {dimensions = array<i32: 1>} : vector<8x48xi32>
    %c7_i32 = arith.constant 7 : i32
    %407 = vector.broadcast %c7_i32 : i32 to vector<8x48xi32>
    %408 = arith.andi %406, %407 : vector<8x48xi32>
    %409 = arith.cmpi eq, %408, %405 : vector<8x48xi32>
    %410 = arith.extui %409 : vector<8x48xi1> to vector<8x48xi32>
    %411 = arith.sitofp %410 : vector<8x48xi32> to vector<8x48xf32>
    %412 = math.absf %401 : vector<8x1xf32>
    %cst_78 = arith.constant dense<0.000000e+00> : vector<1xf32>
    %413 = vector.multi_reduction <add>, %412, %cst_78 [0] : vector<8x1xf32> to vector<1xf32>
    %414 = vector.shape_cast %413 : vector<1xf32> to vector<1x1xf32>
    %c0_79 = arith.constant 0 : index
    %c0_80 = arith.constant 0 : index
    %415 = vector.load %arg2[%c0_79, %c0_80] : memref<40x1xi32, #tpu.memory_space<vmem>>, vector<40x1xi32>
    %416 = tpu.iota {dimensions = array<i32: 1>} : vector<40x24xi32>
    %417 = vector.broadcast %415 : vector<40x1xi32> to vector<40x24xi32>
    %418 = arith.cmpi eq, %416, %417 : vector<40x24xi32>
    %419 = arith.extui %418 : vector<40x24xi1> to vector<40x24xi32>
    %420 = arith.sitofp %419 : vector<40x24xi32> to vector<40x24xf32>
    %cst_81 = arith.constant dense<0.000000e+00> : vector<40x8xf32>
    %421 = tpu.matmul %420, %388, %cst_81 {dimension_numbers = #tpu.dot_dimension_numbers<[1], [0], [0], [1], [0, 0, 1, 1], [], []>} : vector<40x24xf32>, vector<24x8xf32>, vector<40x8xf32> -> vector<40x8xf32>
    %422 = tpu.iota {dimensions = array<i32: 1>} : vector<8x24xi32>
    %cst_82 = arith.constant 0.000000e+00 : f32
    %423 = vector.broadcast %cst_82 : f32 to vector<8x24xf32>
    %c0_83 = arith.constant 0 : index
    %c0_84 = arith.constant 0 : index
    %c0_85 = arith.constant 0 : index
    %424 = vector.load %arg5[%c0_83, %c0_84, %c0_85] : memref<5x8x24xf32, #tpu.memory_space<vmem>>, vector<1x8x24xf32>
    %425 = vector.shape_cast %424 : vector<1x8x24xf32> to vector<8x24xf32>
    %426 = vector.shape_cast %423 : vector<8x24xf32> to vector<1x8x24xf32>
    tpu.vector_store %arg5[%c0_83, %c0_84, %c0_85], %426 {strides = array<i32>} : memref<5x8x24xf32, #tpu.memory_space<vmem>>, vector<1x8x24xf32>,
    %427 = vector.extract_strided_slice %421 {offsets = [0, 0], sizes = [8, 8], strides = [1, 1]} : vector<40x8xf32> to vector<8x8xf32>
    %c0_86 = arith.constant 0 : index
    %c0_87 = arith.constant 0 : index
    %428 = vector.load %arg8[%c0_86, %c0_87] : memref<8x8xf32, #tpu.memory_space<vmem>>, vector<8x8xf32>
    tpu.vector_store %arg8[%c0_86, %c0_87], %427 {strides = array<i32>} : memref<8x8xf32, #tpu.memory_space<vmem>>, vector<8x8xf32>,
    %c0_88 = arith.constant 0 : index
    %c0_89 = arith.constant 0 : index
    %429 = vector.load %arg8[%c0_88, %c0_89] : memref<8x8xf32, #tpu.memory_space<vmem>>, vector<8x8xf32>
    %cst_90 = arith.constant dense<0.000000e+00> : vector<8x8xf32>
    %430 = tpu.matmul %386, %389, %cst_90 {dimension_numbers = #tpu.dot_dimension_numbers<[1], [0], [0], [1], [0, 0, 1, 1], [], []>} : vector<8x8xf32>, vector<8x8xf32>, vector<8x8xf32> -> vector<8x8xf32>
    %431 = tpu.concatenate %430, %430, %430, %430, %430, %430 in 0 : vector<8x8xf32>, vector<8x8xf32>, vector<8x8xf32>, vector<8x8xf32>, vector<8x8xf32>, vector<8x8xf32> -> vector<48x8xf32>
    %432 = arith.addf %404, %431 : vector<48x8xf32>
    %433 = math.tanh %432 : vector<48x8xf32>
    %cst_91 = arith.constant dense<0.000000e+00> : vector<48x1xf32>
    %434 = tpu.matmul %433, %401, %cst_91 {dimension_numbers = #tpu.dot_dimension_numbers<[1], [0], [0], [1], [0, 0, 1, 1], [], []>} : vector<48x8xf32>, vector<8x1xf32>, vector<48x1xf32> -> vector<48x1xf32>
    %435 = vector.broadcast %414 : vector<1x1xf32> to vector<48x1xf32>
    %436 = arith.subf %434, %435 : vector<48x1xf32>
    %437 = math.exp %436 : vector<48x1xf32>
    %438 = vector.broadcast %437 : vector<48x1xf32> to vector<48x16xf32>
    %439 = arith.mulf %438, %380 : vector<48x16xf32>
    %440 = tpu.concatenate %437, %439 in 1 : vector<48x1xf32>, vector<48x16xf32> -> vector<48x17xf32>
    %cst_92 = arith.constant dense<0.000000e+00> : vector<8x17xf32>
    %441 = tpu.matmul %411, %440, %cst_92 {dimension_numbers = #tpu.dot_dimension_numbers<[1], [0], [0], [1], [0, 0, 1, 1], [], []>} : vector<8x48xf32>, vector<48x17xf32>, vector<8x17xf32> -> vector<8x17xf32>
    %442 = vector.extract_strided_slice %441 {offsets = [0, 1], sizes = [8, 16], strides = [1, 1]} : vector<8x17xf32> to vector<8x16xf32>
    %443 = vector.extract_strided_slice %441 {offsets = [0, 0], sizes = [8, 1], strides = [1, 1]} : vector<8x17xf32> to vector<8x1xf32>
    %444 = vector.broadcast %443 : vector<8x1xf32> to vector<8x16xf32>
    %445 = arith.divf %442, %444 : vector<8x16xf32>
    %cst_93 = arith.constant dense<0.000000e+00> : vector<8x24xf32>
    %446 = tpu.matmul %429, %391, %cst_93 {dimension_numbers = #tpu.dot_dimension_numbers<[1], [0], [0], [1], [0, 0, 1, 1], [], []>} : vector<8x8xf32>, vector<8x24xf32>, vector<8x24xf32> -> vector<8x24xf32>
    %cst_94 = arith.constant dense<0.000000e+00> : vector<8x24xf32>
    %447 = tpu.matmul %445, %392, %cst_94 {dimension_numbers = #tpu.dot_dimension_numbers<[1], [0], [0], [1], [0, 0, 1, 1], [], []>} : vector<8x16xf32>, vector<16x24xf32>, vector<8x24xf32> -> vector<8x24xf32>
    %448 = arith.addf %446, %447 : vector<8x24xf32>
    %449 = vector.broadcast %398 : vector<1x24xf32> to vector<8x24xf32>
    %450 = arith.addf %448, %449 : vector<8x24xf32>
    %cst_95 = arith.constant dense<0.000000e+00> : vector<8x24xf32>
    %451 = tpu.matmul %386, %393, %cst_95 {dimension_numbers = #tpu.dot_dimension_numbers<[1], [0], [0], [1], [0, 0, 1, 1], [], []>} : vector<8x8xf32>, vector<8x24xf32>, vector<8x24xf32> -> vector<8x24xf32>
    %452 = vector.broadcast %399 : vector<1x24xf32> to vector<8x24xf32>
    %453 = arith.addf %451, %452 : vector<8x24xf32>
    %454 = vector.extract_strided_slice %450 {offsets = [0, 0], sizes = [8, 8], strides = [1, 1]} : vector<8x24xf32> to vector<8x8xf32>
    %455 = vector.extract_strided_slice %453 {offsets = [0, 0], sizes = [8, 8], strides = [1, 1]} : vector<8x24xf32> to vector<8x8xf32>
    %456 = arith.addf %454, %455 : vector<8x8xf32>
    %457 = arith.negf %456 : vector<8x8xf32>
    %458 = math.exp %457 : vector<8x8xf32>
    %cst_96 = arith.constant 1.000000e+00 : f32
    %459 = vector.broadcast %cst_96 : f32 to vector<8x8xf32>
    %460 = arith.addf %459, %458 : vector<8x8xf32>
    %461 = arith.divf %459, %460 : vector<8x8xf32>
    %462 = vector.extract_strided_slice %450 {offsets = [0, 8], sizes = [8, 8], strides = [1, 1]} : vector<8x24xf32> to vector<8x8xf32>
    %463 = vector.extract_strided_slice %453 {offsets = [0, 8], sizes = [8, 8], strides = [1, 1]} : vector<8x24xf32> to vector<8x8xf32>
    %464 = arith.addf %462, %463 : vector<8x8xf32>
    %465 = arith.negf %464 : vector<8x8xf32>
    %466 = math.exp %465 : vector<8x8xf32>
    %cst_97 = arith.constant 1.000000e+00 : f32
    %467 = vector.broadcast %cst_97 : f32 to vector<8x8xf32>
    %468 = arith.addf %467, %466 : vector<8x8xf32>
    %469 = arith.divf %467, %468 : vector<8x8xf32>
    %470 = vector.extract_strided_slice %450 {offsets = [0, 16], sizes = [8, 8], strides = [1, 1]} : vector<8x24xf32> to vector<8x8xf32>
    %471 = vector.extract_strided_slice %453 {offsets = [0, 16], sizes = [8, 8], strides = [1, 1]} : vector<8x24xf32> to vector<8x8xf32>
    %472 = arith.mulf %461, %471 : vector<8x8xf32>
    %473 = arith.addf %470, %472 : vector<8x8xf32>
    %474 = math.tanh %473 : vector<8x8xf32>
    %cst_98 = arith.constant 1.000000e+00 : f32
    %475 = vector.broadcast %cst_98 : f32 to vector<8x8xf32>
    %476 = arith.subf %475, %469 : vector<8x8xf32>
    %477 = arith.mulf %476, %474 : vector<8x8xf32>
    %478 = arith.mulf %469, %386 : vector<8x8xf32>
    %479 = arith.addf %477, %478 : vector<8x8xf32>
    %cst_99 = arith.constant dense<0.000000e+00> : vector<8x24xf32>
    %480 = tpu.matmul %479, %394, %cst_99 {dimension_numbers = #tpu.dot_dimension_numbers<[1], [0], [0], [1], [0, 0, 1, 1], [], []>} : vector<8x8xf32>, vector<8x24xf32>, vector<8x24xf32> -> vector<8x24xf32>
    %cst_100 = arith.constant dense<0.000000e+00> : vector<8x24xf32>
    %481 = tpu.matmul %445, %395, %cst_100 {dimension_numbers = #tpu.dot_dimension_numbers<[1], [0], [0], [1], [0, 0, 1, 1], [], []>} : vector<8x16xf32>, vector<16x24xf32>, vector<8x24xf32> -> vector<8x24xf32>
    %482 = arith.addf %480, %481 : vector<8x24xf32>
    %cst_101 = arith.constant dense<0.000000e+00> : vector<8x24xf32>
    %483 = tpu.matmul %429, %396, %cst_101 {dimension_numbers = #tpu.dot_dimension_numbers<[1], [0], [0], [1], [0, 0, 1, 1], [], []>} : vector<8x8xf32>, vector<8x24xf32>, vector<8x24xf32> -> vector<8x24xf32>
    %484 = arith.addf %482, %483 : vector<8x24xf32>
    %485 = vector.broadcast %400 : vector<1x24xf32> to vector<8x24xf32>
    %486 = arith.addf %484, %485 : vector<8x24xf32>
    %c1 = arith.constant 1 : index
    %c0_102 = arith.constant 0 : index
    %c0_103 = arith.constant 0 : index
    %487 = vector.load %arg5[%c1, %c0_102, %c0_103] : memref<5x8x24xf32, #tpu.memory_space<vmem>>, vector<1x8x24xf32>
    %488 = vector.shape_cast %487 : vector<1x8x24xf32> to vector<8x24xf32>
    %489 = vector.shape_cast %486 : vector<8x24xf32> to vector<1x8x24xf32>
    tpu.vector_store %arg5[%c1, %c0_102, %c0_103], %489 {strides = array<i32>} : memref<5x8x24xf32, #tpu.memory_space<vmem>>, vector<1x8x24xf32>,
    %490 = vector.extract_strided_slice %421 {offsets = [8, 0], sizes = [8, 8], strides = [1, 1]} : vector<40x8xf32> to vector<8x8xf32>
    %c1_104 = arith.constant 1 : index
    %491 = memref.load %arg0[%c1_104] : memref<5xi32, #tpu.memory_space<smem>>
    %c1_i32 = arith.constant 1 : i32
    %492 = arith.cmpi eq, %491, %c1_i32 : i32
    %493 = arith.extui %492 : i1 to i32
    %c0_i32 = arith.constant 0 : i32
    %494 = arith.cmpi ne, %493, %c0_i32 : i32
    scf.if %494 {
      %c0_168 = arith.constant 0 : index
      %c0_169 = arith.constant 0 : index
      %700 = vector.load %arg8[%c0_168, %c0_169] : memref<8x8xf32, #tpu.memory_space<vmem>>, vector<8x8xf32>
      tpu.vector_store %arg8[%c0_168, %c0_169], %490 {strides = array<i32>} : memref<8x8xf32, #tpu.memory_space<vmem>>, vector<8x8xf32>,
    } else {
    }
    %c1_105 = arith.constant 1 : index
    %495 = memref.load %arg0[%c1_105] : memref<5xi32, #tpu.memory_space<smem>>
    %c0_i32_106 = arith.constant 0 : i32
    %496 = arith.cmpi eq, %495, %c0_i32_106 : i32
    %497 = arith.extui %496 : i1 to i32
    %c0_i32_107 = arith.constant 0 : i32
    %498 = arith.cmpi ne, %497, %c0_i32_107 : i32
    scf.if %498 {
      %cst_168 = arith.constant dense<0xFF800000> : vector<8xf32>
      %700 = vector.multi_reduction <maximumf>, %486, %cst_168 [1] : vector<8x24xf32> to vector<8xf32>
      %701 = vector.shape_cast %700 : vector<8xf32> to vector<8x1xf32>
      %702 = vector.broadcast %701 : vector<8x1xf32> to vector<8x24xf32>
      %703 = arith.cmpf oeq, %486, %702 : vector<8x24xf32>
      %c24_i32 = arith.constant 24 : i32
      %704 = vector.broadcast %c24_i32 : i32 to vector<8x24xi32>
      %705 = arith.select %703, %422, %704 : vector<8x24xi1>, vector<8x24xi32>
      %cst_169 = arith.constant dense<2147483647> : vector<8xi32>
      %706 = vector.multi_reduction <minsi>, %705, %cst_169 [1] : vector<8x24xi32> to vector<8xi32>
      %707 = vector.shape_cast %706 : vector<8xi32> to vector<8x1xi32>
      %708 = vector.broadcast %707 : vector<8x1xi32> to vector<8x24xi32>
      %709 = arith.cmpi eq, %422, %708 : vector<8x24xi32>
      %710 = arith.extui %709 : vector<8x24xi1> to vector<8x24xi32>
      %711 = arith.sitofp %710 : vector<8x24xi32> to vector<8x24xf32>
      %cst_170 = arith.constant dense<0.000000e+00> : vector<8x8xf32>
      %712 = tpu.matmul %711, %388, %cst_170 {dimension_numbers = #tpu.dot_dimension_numbers<[1], [0], [0], [1], [0, 0, 1, 1], [], []>} : vector<8x24xf32>, vector<24x8xf32>, vector<8x8xf32> -> vector<8x8xf32>
      %c0_171 = arith.constant 0 : index
      %c0_172 = arith.constant 0 : index
      %713 = vector.load %arg8[%c0_171, %c0_172] : memref<8x8xf32, #tpu.memory_space<vmem>>, vector<8x8xf32>
      tpu.vector_store %arg8[%c0_171, %c0_172], %712 {strides = array<i32>} : memref<8x8xf32, #tpu.memory_space<vmem>>, vector<8x8xf32>,
    } else {
    }
    %c0_108 = arith.constant 0 : index
    %c0_109 = arith.constant 0 : index
    %499 = vector.load %arg8[%c0_108, %c0_109] : memref<8x8xf32, #tpu.memory_space<vmem>>, vector<8x8xf32>
    %cst_110 = arith.constant dense<0.000000e+00> : vector<8x8xf32>
    %500 = tpu.matmul %479, %389, %cst_110 {dimension_numbers = #tpu.dot_dimension_numbers<[1], [0], [0], [1], [0, 0, 1, 1], [], []>} : vector<8x8xf32>, vector<8x8xf32>, vector<8x8xf32> -> vector<8x8xf32>
    %501 = tpu.concatenate %500, %500, %500, %500, %500, %500 in 0 : vector<8x8xf32>, vector<8x8xf32>, vector<8x8xf32>, vector<8x8xf32>, vector<8x8xf32>, vector<8x8xf32> -> vector<48x8xf32>
    %502 = arith.addf %404, %501 : vector<48x8xf32>
    %503 = math.tanh %502 : vector<48x8xf32>
    %cst_111 = arith.constant dense<0.000000e+00> : vector<48x1xf32>
    %504 = tpu.matmul %503, %401, %cst_111 {dimension_numbers = #tpu.dot_dimension_numbers<[1], [0], [0], [1], [0, 0, 1, 1], [], []>} : vector<48x8xf32>, vector<8x1xf32>, vector<48x1xf32> -> vector<48x1xf32>
    %505 = vector.broadcast %414 : vector<1x1xf32> to vector<48x1xf32>
    %506 = arith.subf %504, %505 : vector<48x1xf32>
    %507 = math.exp %506 : vector<48x1xf32>
    %508 = vector.broadcast %507 : vector<48x1xf32> to vector<48x16xf32>
    %509 = arith.mulf %508, %380 : vector<48x16xf32>
    %510 = tpu.concatenate %507, %509 in 1 : vector<48x1xf32>, vector<48x16xf32> -> vector<48x17xf32>
    %cst_112 = arith.constant dense<0.000000e+00> : vector<8x17xf32>
    %511 = tpu.matmul %411, %510, %cst_112 {dimension_numbers = #tpu.dot_dimension_numbers<[1], [0], [0], [1], [0, 0, 1, 1], [], []>} : vector<8x48xf32>, vector<48x17xf32>, vector<8x17xf32> -> vector<8x17xf32>
    %512 = vector.extract_strided_slice %511 {offsets = [0, 1], sizes = [8, 16], strides = [1, 1]} : vector<8x17xf32> to vector<8x16xf32>
    %513 = vector.extract_strided_slice %511 {offsets = [0, 0], sizes = [8, 1], strides = [1, 1]} : vector<8x17xf32> to vector<8x1xf32>
    %514 = vector.broadcast %513 : vector<8x1xf32> to vector<8x16xf32>
    %515 = arith.divf %512, %514 : vector<8x16xf32>
    %cst_113 = arith.constant dense<0.000000e+00> : vector<8x24xf32>
    %516 = tpu.matmul %499, %391, %cst_113 {dimension_numbers = #tpu.dot_dimension_numbers<[1], [0], [0], [1], [0, 0, 1, 1], [], []>} : vector<8x8xf32>, vector<8x24xf32>, vector<8x24xf32> -> vector<8x24xf32>
    %cst_114 = arith.constant dense<0.000000e+00> : vector<8x24xf32>
    %517 = tpu.matmul %515, %392, %cst_114 {dimension_numbers = #tpu.dot_dimension_numbers<[1], [0], [0], [1], [0, 0, 1, 1], [], []>} : vector<8x16xf32>, vector<16x24xf32>, vector<8x24xf32> -> vector<8x24xf32>
    %518 = arith.addf %516, %517 : vector<8x24xf32>
    %519 = vector.broadcast %398 : vector<1x24xf32> to vector<8x24xf32>
    %520 = arith.addf %518, %519 : vector<8x24xf32>
    %cst_115 = arith.constant dense<0.000000e+00> : vector<8x24xf32>
    %521 = tpu.matmul %479, %393, %cst_115 {dimension_numbers = #tpu.dot_dimension_numbers<[1], [0], [0], [1], [0, 0, 1, 1], [], []>} : vector<8x8xf32>, vector<8x24xf32>, vector<8x24xf32> -> vector<8x24xf32>
    %522 = vector.broadcast %399 : vector<1x24xf32> to vector<8x24xf32>
    %523 = arith.addf %521, %522 : vector<8x24xf32>
    %524 = vector.extract_strided_slice %520 {offsets = [0, 0], sizes = [8, 8], strides = [1, 1]} : vector<8x24xf32> to vector<8x8xf32>
    %525 = vector.extract_strided_slice %523 {offsets = [0, 0], sizes = [8, 8], strides = [1, 1]} : vector<8x24xf32> to vector<8x8xf32>
    %526 = arith.addf %524, %525 : vector<8x8xf32>
    %527 = arith.negf %526 : vector<8x8xf32>
    %528 = math.exp %527 : vector<8x8xf32>
    %cst_116 = arith.constant 1.000000e+00 : f32
    %529 = vector.broadcast %cst_116 : f32 to vector<8x8xf32>
    %530 = arith.addf %529, %528 : vector<8x8xf32>
    %531 = arith.divf %529, %530 : vector<8x8xf32>
    %532 = vector.extract_strided_slice %520 {offsets = [0, 8], sizes = [8, 8], strides = [1, 1]} : vector<8x24xf32> to vector<8x8xf32>
    %533 = vector.extract_strided_slice %523 {offsets = [0, 8], sizes = [8, 8], strides = [1, 1]} : vector<8x24xf32> to vector<8x8xf32>
    %534 = arith.addf %532, %533 : vector<8x8xf32>
    %535 = arith.negf %534 : vector<8x8xf32>
    %536 = math.exp %535 : vector<8x8xf32>
    %cst_117 = arith.constant 1.000000e+00 : f32
    %537 = vector.broadcast %cst_117 : f32 to vector<8x8xf32>
    %538 = arith.addf %537, %536 : vector<8x8xf32>
    %539 = arith.divf %537, %538 : vector<8x8xf32>
    %540 = vector.extract_strided_slice %520 {offsets = [0, 16], sizes = [8, 8], strides = [1, 1]} : vector<8x24xf32> to vector<8x8xf32>
    %541 = vector.extract_strided_slice %523 {offsets = [0, 16], sizes = [8, 8], strides = [1, 1]} : vector<8x24xf32> to vector<8x8xf32>
    %542 = arith.mulf %531, %541 : vector<8x8xf32>
    %543 = arith.addf %540, %542 : vector<8x8xf32>
    %544 = math.tanh %543 : vector<8x8xf32>
    %cst_118 = arith.constant 1.000000e+00 : f32
    %545 = vector.broadcast %cst_118 : f32 to vector<8x8xf32>
    %546 = arith.subf %545, %539 : vector<8x8xf32>
    %547 = arith.mulf %546, %544 : vector<8x8xf32>
    %548 = arith.mulf %539, %479 : vector<8x8xf32>
    %549 = arith.addf %547, %548 : vector<8x8xf32>
    %cst_119 = arith.constant dense<0.000000e+00> : vector<8x24xf32>
    %550 = tpu.matmul %549, %394, %cst_119 {dimension_numbers = #tpu.dot_dimension_numbers<[1], [0], [0], [1], [0, 0, 1, 1], [], []>} : vector<8x8xf32>, vector<8x24xf32>, vector<8x24xf32> -> vector<8x24xf32>
    %cst_120 = arith.constant dense<0.000000e+00> : vector<8x24xf32>
    %551 = tpu.matmul %515, %395, %cst_120 {dimension_numbers = #tpu.dot_dimension_numbers<[1], [0], [0], [1], [0, 0, 1, 1], [], []>} : vector<8x16xf32>, vector<16x24xf32>, vector<8x24xf32> -> vector<8x24xf32>
    %552 = arith.addf %550, %551 : vector<8x24xf32>
    %cst_121 = arith.constant dense<0.000000e+00> : vector<8x24xf32>
    %553 = tpu.matmul %499, %396, %cst_121 {dimension_numbers = #tpu.dot_dimension_numbers<[1], [0], [0], [1], [0, 0, 1, 1], [], []>} : vector<8x8xf32>, vector<8x24xf32>, vector<8x24xf32> -> vector<8x24xf32>
    %554 = arith.addf %552, %553 : vector<8x24xf32>
    %555 = vector.broadcast %400 : vector<1x24xf32> to vector<8x24xf32>
    %556 = arith.addf %554, %555 : vector<8x24xf32>
    %c2 = arith.constant 2 : index
    %c0_122 = arith.constant 0 : index
    %c0_123 = arith.constant 0 : index
    %557 = vector.load %arg5[%c2, %c0_122, %c0_123] : memref<5x8x24xf32, #tpu.memory_space<vmem>>, vector<1x8x24xf32>
    %558 = vector.shape_cast %557 : vector<1x8x24xf32> to vector<8x24xf32>
    %559 = vector.shape_cast %556 : vector<8x24xf32> to vector<1x8x24xf32>
    tpu.vector_store %arg5[%c2, %c0_122, %c0_123], %559 {strides = array<i32>} : memref<5x8x24xf32, #tpu.memory_space<vmem>>, vector<1x8x24xf32>,
    %560 = vector.extract_strided_slice %421 {offsets = [16, 0], sizes = [8, 8], strides = [1, 1]} : vector<40x8xf32> to vector<8x8xf32>
    %c2_124 = arith.constant 2 : index
    %561 = memref.load %arg0[%c2_124] : memref<5xi32, #tpu.memory_space<smem>>
    %c1_i32_125 = arith.constant 1 : i32
    %562 = arith.cmpi eq, %561, %c1_i32_125 : i32
    %563 = arith.extui %562 : i1 to i32
    %c0_i32_126 = arith.constant 0 : i32
    %564 = arith.cmpi ne, %563, %c0_i32_126 : i32
    scf.if %564 {
      %c0_168 = arith.constant 0 : index
      %c0_169 = arith.constant 0 : index
      %700 = vector.load %arg8[%c0_168, %c0_169] : memref<8x8xf32, #tpu.memory_space<vmem>>, vector<8x8xf32>
      tpu.vector_store %arg8[%c0_168, %c0_169], %560 {strides = array<i32>} : memref<8x8xf32, #tpu.memory_space<vmem>>, vector<8x8xf32>,
    } else {
    }
    %c2_127 = arith.constant 2 : index
    %565 = memref.load %arg0[%c2_127] : memref<5xi32, #tpu.memory_space<smem>>
    %c0_i32_128 = arith.constant 0 : i32
    %566 = arith.cmpi eq, %565, %c0_i32_128 : i32
    %567 = arith.extui %566 : i1 to i32
    %c0_i32_129 = arith.constant 0 : i32
    %568 = arith.cmpi ne, %567, %c0_i32_129 : i32
    scf.if %568 {
      %cst_168 = arith.constant dense<0xFF800000> : vector<8xf32>
      %700 = vector.multi_reduction <maximumf>, %556, %cst_168 [1] : vector<8x24xf32> to vector<8xf32>
      %701 = vector.shape_cast %700 : vector<8xf32> to vector<8x1xf32>
      %702 = vector.broadcast %701 : vector<8x1xf32> to vector<8x24xf32>
      %703 = arith.cmpf oeq, %556, %702 : vector<8x24xf32>
      %c24_i32 = arith.constant 24 : i32
      %704 = vector.broadcast %c24_i32 : i32 to vector<8x24xi32>
      %705 = arith.select %703, %422, %704 : vector<8x24xi1>, vector<8x24xi32>
      %cst_169 = arith.constant dense<2147483647> : vector<8xi32>
      %706 = vector.multi_reduction <minsi>, %705, %cst_169 [1] : vector<8x24xi32> to vector<8xi32>
      %707 = vector.shape_cast %706 : vector<8xi32> to vector<8x1xi32>
      %708 = vector.broadcast %707 : vector<8x1xi32> to vector<8x24xi32>
      %709 = arith.cmpi eq, %422, %708 : vector<8x24xi32>
      %710 = arith.extui %709 : vector<8x24xi1> to vector<8x24xi32>
      %711 = arith.sitofp %710 : vector<8x24xi32> to vector<8x24xf32>
      %cst_170 = arith.constant dense<0.000000e+00> : vector<8x8xf32>
      %712 = tpu.matmul %711, %388, %cst_170 {dimension_numbers = #tpu.dot_dimension_numbers<[1], [0], [0], [1], [0, 0, 1, 1], [], []>} : vector<8x24xf32>, vector<24x8xf32>, vector<8x8xf32> -> vector<8x8xf32>
      %c0_171 = arith.constant 0 : index
      %c0_172 = arith.constant 0 : index
      %713 = vector.load %arg8[%c0_171, %c0_172] : memref<8x8xf32, #tpu.memory_space<vmem>>, vector<8x8xf32>
      tpu.vector_store %arg8[%c0_171, %c0_172], %712 {strides = array<i32>} : memref<8x8xf32, #tpu.memory_space<vmem>>, vector<8x8xf32>,
    } else {
    }
    %c0_130 = arith.constant 0 : index
    %c0_131 = arith.constant 0 : index
    %569 = vector.load %arg8[%c0_130, %c0_131] : memref<8x8xf32, #tpu.memory_space<vmem>>, vector<8x8xf32>
    %cst_132 = arith.constant dense<0.000000e+00> : vector<8x8xf32>
    %570 = tpu.matmul %549, %389, %cst_132 {dimension_numbers = #tpu.dot_dimension_numbers<[1], [0], [0], [1], [0, 0, 1, 1], [], []>} : vector<8x8xf32>, vector<8x8xf32>, vector<8x8xf32> -> vector<8x8xf32>
    %571 = tpu.concatenate %570, %570, %570, %570, %570, %570 in 0 : vector<8x8xf32>, vector<8x8xf32>, vector<8x8xf32>, vector<8x8xf32>, vector<8x8xf32>, vector<8x8xf32> -> vector<48x8xf32>
    %572 = arith.addf %404, %571 : vector<48x8xf32>
    %573 = math.tanh %572 : vector<48x8xf32>
    %cst_133 = arith.constant dense<0.000000e+00> : vector<48x1xf32>
    %574 = tpu.matmul %573, %401, %cst_133 {dimension_numbers = #tpu.dot_dimension_numbers<[1], [0], [0], [1], [0, 0, 1, 1], [], []>} : vector<48x8xf32>, vector<8x1xf32>, vector<48x1xf32> -> vector<48x1xf32>
    %575 = vector.broadcast %414 : vector<1x1xf32> to vector<48x1xf32>
    %576 = arith.subf %574, %575 : vector<48x1xf32>
    %577 = math.exp %576 : vector<48x1xf32>
    %578 = vector.broadcast %577 : vector<48x1xf32> to vector<48x16xf32>
    %579 = arith.mulf %578, %380 : vector<48x16xf32>
    %580 = tpu.concatenate %577, %579 in 1 : vector<48x1xf32>, vector<48x16xf32> -> vector<48x17xf32>
    %cst_134 = arith.constant dense<0.000000e+00> : vector<8x17xf32>
    %581 = tpu.matmul %411, %580, %cst_134 {dimension_numbers = #tpu.dot_dimension_numbers<[1], [0], [0], [1], [0, 0, 1, 1], [], []>} : vector<8x48xf32>, vector<48x17xf32>, vector<8x17xf32> -> vector<8x17xf32>
    %582 = vector.extract_strided_slice %581 {offsets = [0, 1], sizes = [8, 16], strides = [1, 1]} : vector<8x17xf32> to vector<8x16xf32>
    %583 = vector.extract_strided_slice %581 {offsets = [0, 0], sizes = [8, 1], strides = [1, 1]} : vector<8x17xf32> to vector<8x1xf32>
    %584 = vector.broadcast %583 : vector<8x1xf32> to vector<8x16xf32>
    %585 = arith.divf %582, %584 : vector<8x16xf32>
    %cst_135 = arith.constant dense<0.000000e+00> : vector<8x24xf32>
    %586 = tpu.matmul %569, %391, %cst_135 {dimension_numbers = #tpu.dot_dimension_numbers<[1], [0], [0], [1], [0, 0, 1, 1], [], []>} : vector<8x8xf32>, vector<8x24xf32>, vector<8x24xf32> -> vector<8x24xf32>
    %cst_136 = arith.constant dense<0.000000e+00> : vector<8x24xf32>
    %587 = tpu.matmul %585, %392, %cst_136 {dimension_numbers = #tpu.dot_dimension_numbers<[1], [0], [0], [1], [0, 0, 1, 1], [], []>} : vector<8x16xf32>, vector<16x24xf32>, vector<8x24xf32> -> vector<8x24xf32>
    %588 = arith.addf %586, %587 : vector<8x24xf32>
    %589 = vector.broadcast %398 : vector<1x24xf32> to vector<8x24xf32>
    %590 = arith.addf %588, %589 : vector<8x24xf32>
    %cst_137 = arith.constant dense<0.000000e+00> : vector<8x24xf32>
    %591 = tpu.matmul %549, %393, %cst_137 {dimension_numbers = #tpu.dot_dimension_numbers<[1], [0], [0], [1], [0, 0, 1, 1], [], []>} : vector<8x8xf32>, vector<8x24xf32>, vector<8x24xf32> -> vector<8x24xf32>
    %592 = vector.broadcast %399 : vector<1x24xf32> to vector<8x24xf32>
    %593 = arith.addf %591, %592 : vector<8x24xf32>
    %594 = vector.extract_strided_slice %590 {offsets = [0, 0], sizes = [8, 8], strides = [1, 1]} : vector<8x24xf32> to vector<8x8xf32>
    %595 = vector.extract_strided_slice %593 {offsets = [0, 0], sizes = [8, 8], strides = [1, 1]} : vector<8x24xf32> to vector<8x8xf32>
    %596 = arith.addf %594, %595 : vector<8x8xf32>
    %597 = arith.negf %596 : vector<8x8xf32>
    %598 = math.exp %597 : vector<8x8xf32>
    %cst_138 = arith.constant 1.000000e+00 : f32
    %599 = vector.broadcast %cst_138 : f32 to vector<8x8xf32>
    %600 = arith.addf %599, %598 : vector<8x8xf32>
    %601 = arith.divf %599, %600 : vector<8x8xf32>
    %602 = vector.extract_strided_slice %590 {offsets = [0, 8], sizes = [8, 8], strides = [1, 1]} : vector<8x24xf32> to vector<8x8xf32>
    %603 = vector.extract_strided_slice %593 {offsets = [0, 8], sizes = [8, 8], strides = [1, 1]} : vector<8x24xf32> to vector<8x8xf32>
    %604 = arith.addf %602, %603 : vector<8x8xf32>
    %605 = arith.negf %604 : vector<8x8xf32>
    %606 = math.exp %605 : vector<8x8xf32>
    %cst_139 = arith.constant 1.000000e+00 : f32
    %607 = vector.broadcast %cst_139 : f32 to vector<8x8xf32>
    %608 = arith.addf %607, %606 : vector<8x8xf32>
    %609 = arith.divf %607, %608 : vector<8x8xf32>
    %610 = vector.extract_strided_slice %590 {offsets = [0, 16], sizes = [8, 8], strides = [1, 1]} : vector<8x24xf32> to vector<8x8xf32>
    %611 = vector.extract_strided_slice %593 {offsets = [0, 16], sizes = [8, 8], strides = [1, 1]} : vector<8x24xf32> to vector<8x8xf32>
    %612 = arith.mulf %601, %611 : vector<8x8xf32>
    %613 = arith.addf %610, %612 : vector<8x8xf32>
    %614 = math.tanh %613 : vector<8x8xf32>
    %cst_140 = arith.constant 1.000000e+00 : f32
    %615 = vector.broadcast %cst_140 : f32 to vector<8x8xf32>
    %616 = arith.subf %615, %609 : vector<8x8xf32>
    %617 = arith.mulf %616, %614 : vector<8x8xf32>
    %618 = arith.mulf %609, %549 : vector<8x8xf32>
    %619 = arith.addf %617, %618 : vector<8x8xf32>
    %cst_141 = arith.constant dense<0.000000e+00> : vector<8x24xf32>
    %620 = tpu.matmul %619, %394, %cst_141 {dimension_numbers = #tpu.dot_dimension_numbers<[1], [0], [0], [1], [0, 0, 1, 1], [], []>} : vector<8x8xf32>, vector<8x24xf32>, vector<8x24xf32> -> vector<8x24xf32>
    %cst_142 = arith.constant dense<0.000000e+00> : vector<8x24xf32>
    %621 = tpu.matmul %585, %395, %cst_142 {dimension_numbers = #tpu.dot_dimension_numbers<[1], [0], [0], [1], [0, 0, 1, 1], [], []>} : vector<8x16xf32>, vector<16x24xf32>, vector<8x24xf32> -> vector<8x24xf32>
    %622 = arith.addf %620, %621 : vector<8x24xf32>
    %cst_143 = arith.constant dense<0.000000e+00> : vector<8x24xf32>
    %623 = tpu.matmul %569, %396, %cst_143 {dimension_numbers = #tpu.dot_dimension_numbers<[1], [0], [0], [1], [0, 0, 1, 1], [], []>} : vector<8x8xf32>, vector<8x24xf32>, vector<8x24xf32> -> vector<8x24xf32>
    %624 = arith.addf %622, %623 : vector<8x24xf32>
    %625 = vector.broadcast %400 : vector<1x24xf32> to vector<8x24xf32>
    %626 = arith.addf %624, %625 : vector<8x24xf32>
    %c3 = arith.constant 3 : index
    %c0_144 = arith.constant 0 : index
    %c0_145 = arith.constant 0 : index
    %627 = vector.load %arg5[%c3, %c0_144, %c0_145] : memref<5x8x24xf32, #tpu.memory_space<vmem>>, vector<1x8x24xf32>
    %628 = vector.shape_cast %627 : vector<1x8x24xf32> to vector<8x24xf32>
    %629 = vector.shape_cast %626 : vector<8x24xf32> to vector<1x8x24xf32>
    tpu.vector_store %arg5[%c3, %c0_144, %c0_145], %629 {strides = array<i32>} : memref<5x8x24xf32, #tpu.memory_space<vmem>>, vector<1x8x24xf32>,
    %630 = vector.extract_strided_slice %421 {offsets = [24, 0], sizes = [8, 8], strides = [1, 1]} : vector<40x8xf32> to vector<8x8xf32>
    %c3_146 = arith.constant 3 : index
    %631 = memref.load %arg0[%c3_146] : memref<5xi32, #tpu.memory_space<smem>>
    %c1_i32_147 = arith.constant 1 : i32
    %632 = arith.cmpi eq, %631, %c1_i32_147 : i32
    %633 = arith.extui %632 : i1 to i32
    %c0_i32_148 = arith.constant 0 : i32
    %634 = arith.cmpi ne, %633, %c0_i32_148 : i32
    scf.if %634 {
      %c0_168 = arith.constant 0 : index
      %c0_169 = arith.constant 0 : index
      %700 = vector.load %arg8[%c0_168, %c0_169] : memref<8x8xf32, #tpu.memory_space<vmem>>, vector<8x8xf32>
      tpu.vector_store %arg8[%c0_168, %c0_169], %630 {strides = array<i32>} : memref<8x8xf32, #tpu.memory_space<vmem>>, vector<8x8xf32>,
    } else {
    }
    %c3_149 = arith.constant 3 : index
    %635 = memref.load %arg0[%c3_149] : memref<5xi32, #tpu.memory_space<smem>>
    %c0_i32_150 = arith.constant 0 : i32
    %636 = arith.cmpi eq, %635, %c0_i32_150 : i32
    %637 = arith.extui %636 : i1 to i32
    %c0_i32_151 = arith.constant 0 : i32
    %638 = arith.cmpi ne, %637, %c0_i32_151 : i32
    scf.if %638 {
      %cst_168 = arith.constant dense<0xFF800000> : vector<8xf32>
      %700 = vector.multi_reduction <maximumf>, %626, %cst_168 [1] : vector<8x24xf32> to vector<8xf32>
      %701 = vector.shape_cast %700 : vector<8xf32> to vector<8x1xf32>
      %702 = vector.broadcast %701 : vector<8x1xf32> to vector<8x24xf32>
      %703 = arith.cmpf oeq, %626, %702 : vector<8x24xf32>
      %c24_i32 = arith.constant 24 : i32
      %704 = vector.broadcast %c24_i32 : i32 to vector<8x24xi32>
      %705 = arith.select %703, %422, %704 : vector<8x24xi1>, vector<8x24xi32>
      %cst_169 = arith.constant dense<2147483647> : vector<8xi32>
      %706 = vector.multi_reduction <minsi>, %705, %cst_169 [1] : vector<8x24xi32> to vector<8xi32>
      %707 = vector.shape_cast %706 : vector<8xi32> to vector<8x1xi32>
      %708 = vector.broadcast %707 : vector<8x1xi32> to vector<8x24xi32>
      %709 = arith.cmpi eq, %422, %708 : vector<8x24xi32>
      %710 = arith.extui %709 : vector<8x24xi1> to vector<8x24xi32>
      %711 = arith.sitofp %710 : vector<8x24xi32> to vector<8x24xf32>
      %cst_170 = arith.constant dense<0.000000e+00> : vector<8x8xf32>
      %712 = tpu.matmul %711, %388, %cst_170 {dimension_numbers = #tpu.dot_dimension_numbers<[1], [0], [0], [1], [0, 0, 1, 1], [], []>} : vector<8x24xf32>, vector<24x8xf32>, vector<8x8xf32> -> vector<8x8xf32>
      %c0_171 = arith.constant 0 : index
      %c0_172 = arith.constant 0 : index
      %713 = vector.load %arg8[%c0_171, %c0_172] : memref<8x8xf32, #tpu.memory_space<vmem>>, vector<8x8xf32>
      tpu.vector_store %arg8[%c0_171, %c0_172], %712 {strides = array<i32>} : memref<8x8xf32, #tpu.memory_space<vmem>>, vector<8x8xf32>,
    } else {
    }
    %c0_152 = arith.constant 0 : index
    %c0_153 = arith.constant 0 : index
    %639 = vector.load %arg8[%c0_152, %c0_153] : memref<8x8xf32, #tpu.memory_space<vmem>>, vector<8x8xf32>
    %cst_154 = arith.constant dense<0.000000e+00> : vector<8x8xf32>
    %640 = tpu.matmul %619, %389, %cst_154 {dimension_numbers = #tpu.dot_dimension_numbers<[1], [0], [0], [1], [0, 0, 1, 1], [], []>} : vector<8x8xf32>, vector<8x8xf32>, vector<8x8xf32> -> vector<8x8xf32>
    %641 = tpu.concatenate %640, %640, %640, %640, %640, %640 in 0 : vector<8x8xf32>, vector<8x8xf32>, vector<8x8xf32>, vector<8x8xf32>, vector<8x8xf32>, vector<8x8xf32> -> vector<48x8xf32>
    %642 = arith.addf %404, %641 : vector<48x8xf32>
    %643 = math.tanh %642 : vector<48x8xf32>
    %cst_155 = arith.constant dense<0.000000e+00> : vector<48x1xf32>
    %644 = tpu.matmul %643, %401, %cst_155 {dimension_numbers = #tpu.dot_dimension_numbers<[1], [0], [0], [1], [0, 0, 1, 1], [], []>} : vector<48x8xf32>, vector<8x1xf32>, vector<48x1xf32> -> vector<48x1xf32>
    %645 = vector.broadcast %414 : vector<1x1xf32> to vector<48x1xf32>
    %646 = arith.subf %644, %645 : vector<48x1xf32>
    %647 = math.exp %646 : vector<48x1xf32>
    %648 = vector.broadcast %647 : vector<48x1xf32> to vector<48x16xf32>
    %649 = arith.mulf %648, %380 : vector<48x16xf32>
    %650 = tpu.concatenate %647, %649 in 1 : vector<48x1xf32>, vector<48x16xf32> -> vector<48x17xf32>
    %cst_156 = arith.constant dense<0.000000e+00> : vector<8x17xf32>
    %651 = tpu.matmul %411, %650, %cst_156 {dimension_numbers = #tpu.dot_dimension_numbers<[1], [0], [0], [1], [0, 0, 1, 1], [], []>} : vector<8x48xf32>, vector<48x17xf32>, vector<8x17xf32> -> vector<8x17xf32>
    %652 = vector.extract_strided_slice %651 {offsets = [0, 1], sizes = [8, 16], strides = [1, 1]} : vector<8x17xf32> to vector<8x16xf32>
    %653 = vector.extract_strided_slice %651 {offsets = [0, 0], sizes = [8, 1], strides = [1, 1]} : vector<8x17xf32> to vector<8x1xf32>
    %654 = vector.broadcast %653 : vector<8x1xf32> to vector<8x16xf32>
    %655 = arith.divf %652, %654 : vector<8x16xf32>
    %cst_157 = arith.constant dense<0.000000e+00> : vector<8x24xf32>
    %656 = tpu.matmul %639, %391, %cst_157 {dimension_numbers = #tpu.dot_dimension_numbers<[1], [0], [0], [1], [0, 0, 1, 1], [], []>} : vector<8x8xf32>, vector<8x24xf32>, vector<8x24xf32> -> vector<8x24xf32>
    %cst_158 = arith.constant dense<0.000000e+00> : vector<8x24xf32>
    %657 = tpu.matmul %655, %392, %cst_158 {dimension_numbers = #tpu.dot_dimension_numbers<[1], [0], [0], [1], [0, 0, 1, 1], [], []>} : vector<8x16xf32>, vector<16x24xf32>, vector<8x24xf32> -> vector<8x24xf32>
    %658 = arith.addf %656, %657 : vector<8x24xf32>
    %659 = vector.broadcast %398 : vector<1x24xf32> to vector<8x24xf32>
    %660 = arith.addf %658, %659 : vector<8x24xf32>
    %cst_159 = arith.constant dense<0.000000e+00> : vector<8x24xf32>
    %661 = tpu.matmul %619, %393, %cst_159 {dimension_numbers = #tpu.dot_dimension_numbers<[1], [0], [0], [1], [0, 0, 1, 1], [], []>} : vector<8x8xf32>, vector<8x24xf32>, vector<8x24xf32> -> vector<8x24xf32>
    %662 = vector.broadcast %399 : vector<1x24xf32> to vector<8x24xf32>
    %663 = arith.addf %661, %662 : vector<8x24xf32>
    %664 = vector.extract_strided_slice %660 {offsets = [0, 0], sizes = [8, 8], strides = [1, 1]} : vector<8x24xf32> to vector<8x8xf32>
    %665 = vector.extract_strided_slice %663 {offsets = [0, 0], sizes = [8, 8], strides = [1, 1]} : vector<8x24xf32> to vector<8x8xf32>
    %666 = arith.addf %664, %665 : vector<8x8xf32>
    %667 = arith.negf %666 : vector<8x8xf32>
    %668 = math.exp %667 : vector<8x8xf32>
    %cst_160 = arith.constant 1.000000e+00 : f32
    %669 = vector.broadcast %cst_160 : f32 to vector<8x8xf32>
    %670 = arith.addf %669, %668 : vector<8x8xf32>
    %671 = arith.divf %669, %670 : vector<8x8xf32>
    %672 = vector.extract_strided_slice %660 {offsets = [0, 8], sizes = [8, 8], strides = [1, 1]} : vector<8x24xf32> to vector<8x8xf32>
    %673 = vector.extract_strided_slice %663 {offsets = [0, 8], sizes = [8, 8], strides = [1, 1]} : vector<8x24xf32> to vector<8x8xf32>
    %674 = arith.addf %672, %673 : vector<8x8xf32>
    %675 = arith.negf %674 : vector<8x8xf32>
    %676 = math.exp %675 : vector<8x8xf32>
    %cst_161 = arith.constant 1.000000e+00 : f32
    %677 = vector.broadcast %cst_161 : f32 to vector<8x8xf32>
    %678 = arith.addf %677, %676 : vector<8x8xf32>
    %679 = arith.divf %677, %678 : vector<8x8xf32>
    %680 = vector.extract_strided_slice %660 {offsets = [0, 16], sizes = [8, 8], strides = [1, 1]} : vector<8x24xf32> to vector<8x8xf32>
    %681 = vector.extract_strided_slice %663 {offsets = [0, 16], sizes = [8, 8], strides = [1, 1]} : vector<8x24xf32> to vector<8x8xf32>
    %682 = arith.mulf %671, %681 : vector<8x8xf32>
    %683 = arith.addf %680, %682 : vector<8x8xf32>
    %684 = math.tanh %683 : vector<8x8xf32>
    %cst_162 = arith.constant 1.000000e+00 : f32
    %685 = vector.broadcast %cst_162 : f32 to vector<8x8xf32>
    %686 = arith.subf %685, %679 : vector<8x8xf32>
    %687 = arith.mulf %686, %684 : vector<8x8xf32>
    %688 = arith.mulf %679, %619 : vector<8x8xf32>
    %689 = arith.addf %687, %688 : vector<8x8xf32>
    %cst_163 = arith.constant dense<0.000000e+00> : vector<8x24xf32>
    %690 = tpu.matmul %689, %394, %cst_163 {dimension_numbers = #tpu.dot_dimension_numbers<[1], [0], [0], [1], [0, 0, 1, 1], [], []>} : vector<8x8xf32>, vector<8x24xf32>, vector<8x24xf32> -> vector<8x24xf32>
    %cst_164 = arith.constant dense<0.000000e+00> : vector<8x24xf32>
    %691 = tpu.matmul %655, %395, %cst_164 {dimension_numbers = #tpu.dot_dimension_numbers<[1], [0], [0], [1], [0, 0, 1, 1], [], []>} : vector<8x16xf32>, vector<16x24xf32>, vector<8x24xf32> -> vector<8x24xf32>
    %692 = arith.addf %690, %691 : vector<8x24xf32>
    %cst_165 = arith.constant dense<0.000000e+00> : vector<8x24xf32>
    %693 = tpu.matmul %639, %396, %cst_165 {dimension_numbers = #tpu.dot_dimension_numbers<[1], [0], [0], [1], [0, 0, 1, 1], [], []>} : vector<8x8xf32>, vector<8x24xf32>, vector<8x24xf32> -> vector<8x24xf32>
    %694 = arith.addf %692, %693 : vector<8x24xf32>
    %695 = vector.broadcast %400 : vector<1x24xf32> to vector<8x24xf32>
    %696 = arith.addf %694, %695 : vector<8x24xf32>
    %c4 = arith.constant 4 : index
    %c0_166 = arith.constant 0 : index
    %c0_167 = arith.constant 0 : index
    %697 = vector.load %arg5[%c4, %c0_166, %c0_167] : memref<5x8x24xf32, #tpu.memory_space<vmem>>, vector<1x8x24xf32>
    %698 = vector.shape_cast %697 : vector<1x8x24xf32> to vector<8x24xf32>
    %699 = vector.shape_cast %696 : vector<8x24xf32> to vector<1x8x24xf32>
    tpu.vector_store %arg5[%c4, %c0_166, %c0_167], %699 {strides = array<i32>} : memref<5x8x24xf32, #tpu.memory_space<vmem>>, vector<1x8x24xf32>,
    return
  }
}

</mosaic_0001>

<bundles_post_ra>
// kernel: seq2seq_forward.1
= control target key start
LH: loop header
LB: loop body
LE: loop exit
PB: predicated region body
PF: predicated region fallthrough
CT: control target
= control target key end

     0   :  { %13 = vsyncpa [#allocation5], 0  ;;  %s4230_s0 = inlined_call_operand.vmem [shape: s32[5], index: 0, kind: input, shape index: {}]   ;;  %s4231_s1 = inlined_call_operand.vmem [shape: s32[48,1], index: 1, kind: input, shape index: {}]   ;;  %s4232_s2 = inlined_call_operand.vmem [shape: s32[40,1], index: 2, kind: input, shape index: {}]   ;;  %s4233_s3 = inlined_call_operand.vmem [shape: f32[72,48], index: 3, kind: input, shape index: {}]   ;;  %s4234_s4 = inlined_call_operand.vmem [shape: f32[128,24], index: 4, kind: input, shape index: {}]   ;;  %s4235_s5 = inlined_call_operand.hbm [shape: f32[5,8,24], index: 5, kind: output, shape index: {0}]   ;;  %s4236_s6 = inlined_call_operand.hbm [shape: f32[6,8,16], index: 6, kind: output, shape index: {1}]   ;;  %s4237_s7 = inlined_call_operand.hbm [shape: f32[8,8], index: 7, kind: output, shape index: {2}]  }
   0x1   :  { %14 = vsyncpa [#allocation4], 0 }
   0x2   :  { %15 = vsyncpa [#allocation8], 0  ;;  %s21_s26 = sshll.u32 %s4230_s0, 4  ;;  %s3398_s27 = smov [#allocation3]   ;;  %s22_s26 = int_to_ptr.vmem [resolvable:$true] %s21_s26 }
   0x3   :  { %24 = dma.vmem_to_smem %s22_s26, 16, %s3398_s27, [#allocation5]  }
   0x4   :  { %3392 = dma.done.wait [#allocation5], 16  }
   0x5   :  { %3393 = vsyncadd [#allocation5], 4294967280 }
   0x6   :  { %37 = sfence }
   0x7   :  { %v49_v0 = vld [vmem:[%s4231_s1] sm:$0xff]  ;;  %v51_v1 = vld [vmem:[%s4231_s1 + $0x10] sm:$0xff]  ;;  %vm112_vm0 = vcmask 1043456   ;;  %v3399_v2 = vmov 0   ;;  %v50_v5 = vld [vmem:[%s4231_s1 + $0x8] sm:$0xff]  ;;  %v55_v11 = vlaneseq  ;;  %vm93_vm2 = vcmask 162816  }
   0x8   :  { %3027 = vset.pattern.permute.xlu0 %v3399_v2  ;;  %3028 = vset.pattern.permute.xlu1 %v3399_v2  ;;  %v53_v3 = vld [vmem:[%s4231_s1 + $0x20] sm:$0xff]  ;;  %v40_v4 = vld [vmem:[%s4233_s3 + $0x10] sm:$0xf]  ;;  %v52_v6 = vld [vmem:[%s4231_s1 + $0x18] sm:$0xff]  ;;  %v3400_v14 = vmov 0.0   ;;  %vm152_vm8 = vcmask 64512  }
   0x9   :  { %58 = vperm.xlu0 %3027, %v49_v0   ;;  %64 = vperm.xlu1 %3028, %v51_v1   ;;  %v54_v7 = vld [vmem:[%s4231_s1 + $0x28] sm:$0xff]  ;;  %v38_v9 = vld [vmem:[%s4233_s3] sm:$0xff]  ;;  %v3490_v12 = vand.u32 127, %v55_v11  ;;  %v41_v20 = vld [vmem:[%s4233_s3 + $0x18] sm:$0xff]  ;;  %s3401_s29 = smov 112   ;;  %s3402_s0 = smov 16  }
   0xa   :  { %3029 = vset.pattern.permute.xlu2 %v3399_v2  ;;  %2877 = vmatpush.msk.msra.mxu0 %vm112_vm0, %v40_v4  ;;  %v39_v8 = vld [vmem:[%s4233_s3 + $0x8] sm:$0xff]  ;;  %v3507_v19 = vld [vmem:[%s4233_s3 + $0x20] sm:$0xff]  ;;  %s3403_s9 = smov 120   ;;  %s3404_s10 = smov 104  }
   0xb   :  { %70 = vperm.xlu2 %3029, %v53_v3   ;;  %3003 = vmatpush.msk.msra.mxu1 %vm112_vm0, %v40_v4  ;;  %v3500_v18 = vld [vmem:[%s4233_s3 + $0x28] sm:$0xff]  ;;  %v3538_v30 = vld [vmem:[%s4233_s3 + $0x41] ss:$0 sm:$0xff]  ;;  %v3046_v37 = vld [vmem:[%s4233_s3 + $0x40] ss:$0 sm:$0xff]  ;;  %s3405_s11 = smov 8  }
   0xc   :  { %130 = vmatpush.msra.mxu0 %v39_v8  ;;  %225 = vmatpush.msra.mxu2 %v3500_v18  ;;  %s3406_s12 = smov 24   ;;  %s3407_s30 = smov 1  }
   0xd   :  { %3004 = vmatpush.msra.mxu1 %v39_v8  ;;  %331 = vmatpush.msra.mxu3 %v3500_v18  ;;  %s3408_s14 = smov 127   ;;  %s2940_s22 = sld [smem:[#allocation3 + $0x1]] }
   0xe   :  { %131 = vmatpush.msra.mxu0 %v38_v9  ;;  %226 = vmatpush.msra.mxu2 %v3507_v19 }
   0xf   :  { %3005 = vmatpush.msra.mxu1 %v38_v9  ;;  %227 = vmatmul.f32.vlgmr.msra.gmra.mxu2 %v3400_v14 }
  0x10   :  { %332 = vmatpush.msra.mxu3 %v3507_v19  ;;  %443 = vmatpush.msrb.mxu2 %v3500_v18 }
  0x11   :  { %61 = vperm.xlu0 %3027, %v50_v5   ;;  %67 = vperm.xlu1 %3028, %v52_v6  }
  0x12   :  { %186 = vmatpush.msrb.mxu1 %v41_v20  ;;  %555 = vmatpush.msrb.mxu3 %v3500_v18 }
  0x13   :  { %73 = vperm.xlu2 %3029, %v54_v7   ;;  %444 = vmatpush.msrb.mxu2 %v3507_v19  ;;  %p2941_p0 = scmp.ne.s32.totalorder %s2940_s22, 1 }
  0x14   :  { %556 = vmatpush.msrb.mxu3 %v3507_v19 }
  0x15   :  { %667 = vmatpush.msra.mxu2 %v3500_v18 }
  0x17   :  { %668 = vmatpush.msra.mxu2 %v3507_v19 }
  0x65   :  { %v71_v10 = vpop.permute.xlu2 %70 }
  0x66   :  { %vm79_vm7 = vcmp.eq.s32.totalorder %v3490_v12, %v71_v10 }
  0x67   :  { %v2875_v27 = vsel %vm79_vm7, 1.0, %v3400_v14 }
  0x6d   :  { %v74_v13 = vpop.permute.xlu2 %73 }
  0x6e   :  { %vm80_vm1 = vcmp.eq.s32.totalorder %v3490_v12, %v74_v13 }
  0x6f   :  { %v2876_v15 = vsel %vm80_vm1, 1.0, %v3400_v14  ;;  %vm207_vm1 = vcmask 130048  }
  0x70   :  { %2883 = vmatmul.msk.f32.vlgmr.msra.gmra.mxu1 %vm93_vm2, %v2876_v15 }
  0x7b   :  { %v59_v16 = vpop.permute.xlu0 %58  ;;  %v65_v22 = vpop.permute.xlu1 %64 }
  0x7c   :  { %vm75_vm3 = vcmp.eq.s32.totalorder %v3490_v12, %v59_v16  ;;  %vm77_vm5 = vcmp.eq.s32.totalorder %v3490_v12, %v65_v22 }
  0x7d   :  { %v2871_v17 = vsel %vm75_vm3, 1.0, %v3400_v14  ;;  %v2873_v24 = vsel %vm77_vm5, 1.0, %v3400_v14 }
  0x7e   :  { %2878 = vmatmul.msk.f32.vlgmr.msra.gmra.mxu0 %vm93_vm2, %v2871_v17 }
  0x83   :  { %v62_v21 = vpop.permute.xlu0 %61  ;;  %v68_v25 = vpop.permute.xlu1 %67 }
  0x84   :  { %vm76_vm4 = vcmp.eq.s32.totalorder %v3490_v12, %v62_v21  ;;  %vm78_vm6 = vcmp.eq.s32.totalorder %v3490_v12, %v68_v25 }
  0x85   :  { %v2872_v23 = vsel %vm76_vm4, 1.0, %v3400_v14  ;;  %v2874_v26 = vsel %vm78_vm6, 1.0, %v3400_v14 }
  0x86   :  { %2879 = vmatmul.msk.f32.gmra.mxu0 %vm93_vm2, %v2872_v23 }
  0x8e   :  { %2880 = vmatmul.msk.f32.gmra.mxu0 %vm93_vm2, %v2873_v24 }
  0x92   :  { %v228_v31 = vpop.f32.mrf.mxu2 }
  0x93   :  { %v229_v32 = vadd.f32 %v3538_v30, %v228_v31 }
  0x95   :  { %252 = vrot.lane.b32.xlu0 %v229_v32, %s3401_s29 }
  0x96   :  { %2881 = vmatmul.msk.f32.gmra.mxu0 %vm93_vm2, %v2874_v26 }
  0x9e   :  { %2882 = vmatmul.msk.f32.gmra.mxu0 %vm93_vm2, %v2875_v27 }
  0xed   :  { %v148_v36 = vpop.f32.mrf.mxu1 }
  0xfb   :  { %v133_v28 = vpop.f32.mrf.mxu0 }
  0xfc   :  { %2884 = vmatmul.msk.f32.vlgmr.msrb.gmra.mxu1 %vm152_vm8, %v133_v28 }
 0x103   :  { %v136_v29 = vpop.f32.mrf.mxu0 }
 0x104   :  { %2885 = vmatmul.msk.f32.gmra.mxu1 %vm152_vm8, %v136_v29 }
 0x107   :  { %v253_v57 = vpop.permute.xlu0 %252 }
 0x10b   :  { %v139_v33 = vpop.f32.mrf.mxu0 }
 0x10c   :  { %2886 = vmatmul.msk.f32.gmra.mxu1 %vm152_vm8, %v139_v33 }
 0x113   :  { %v142_v34 = vpop.f32.mrf.mxu0 }
 0x114   :  { %2887 = vmatmul.msk.f32.gmra.mxu1 %vm152_vm8, %v142_v34 }
 0x11b   :  { %v145_v35 = vpop.f32.mrf.mxu0 }
 0x11c   :  { %2888 = vmatmul.msk.f32.gmra.mxu1 %vm152_vm8, %v145_v35 }
 0x124   :  { %2889 = vmatmul.msk.f32.gmra.mxu1 %vm152_vm8, %v148_v36 }
 0x179   :  { %v188_v38 = vpop.f32.mrf.mxu1 }
 0x17a   :  { %v3550_v39 = vadd.f32 %v3046_v37, %v188_v38 }
 0x17c   :  { %v231_v40 = vadd.f32 %v229_v32, %v3550_v39 }
 0x17e   :  { %v2890_v41 = vmul.f32 -1.442695, %v231_v40 }
 0x180   :  { %3052 = vpow2.f32 %v2890_v41 }
 0x181   :  { %v191_v42 = vpop.f32.mrf.mxu1 }
 0x182   :  { %v3553_v43 = vadd.f32 %v3046_v37, %v191_v42 }
 0x186   :  { %v3053_v44 = vpop.eup %3052 }
 0x187   :  { %v235_v45 = vadd.f32 1.0, %v3053_v44 }
 0x189   :  { %3054 = vrcp.f32 %v235_v45  ;;  %v194_v46 = vpop.f32.mrf.mxu1  ;;  %v247_v53 = vand.u32 2147483648, %v235_v45  ;;  %v245_v55 = vand.u32 2147483647, %v235_v45  ;;  %vm241_vm10 = vweird.f32 %v235_v45 }
 0x18a   :  { %v3555_v47 = vadd.f32 %v3046_v37, %v194_v46 }
 0x18b   :  { %v248_v58 = vor.u32 1.1754944e-38, %v247_v53  ;;  %vm246_vm12 = vcmp.eq.f32.partialorder %v245_v55, 8.507059e+37 }
 0x18f   :  { %v3055_v48 = vpop.eup %3054 }
 0x190   :  { %v237_v49 = vmul.f32 %v3055_v48, %v235_v45  ;;  %vm242_vm9 = vweird.f32 %v3055_v48 }
 0x191   :  { %v197_v50 = vpop.f32.mrf.mxu1  ;;  %vm243_vm11 = vmor %vm241_vm10, %vm242_vm9 }
 0x192   :  { %v3557_v51 = vadd.f32 %v3046_v37, %v197_v50  ;;  %v238_v52 = vsub.f32 1.0, %v237_v49 }
 0x194   :  { %v239_v54 = vmul.f32 %v3055_v48, %v238_v52 }
 0x196   :  { %v240_v56 = vadd.f32 %v3055_v48, %v239_v54 }
 0x198   :  { %v244_v59 = vsel %vm243_vm11, %v3055_v48, %v240_v56 }
 0x199   :  { %v249_v60 = vsel %vm246_vm12, %v248_v58, %v244_v59  ;;  %v200_v61 = vpop.f32.mrf.mxu1 }
 0x19a   :  { %v255_v62 = vmul.f32 %v253_v57, %v249_v60  ;;  %v3559_v63 = vadd.f32 %v3046_v37, %v200_v61  ;;  %v262_v29 = vsub.f32 1.0, %v249_v60 }
 0x19c   :  { %257 = vrot.lane.b32.xlu1 %v255_v62, %s3402_s0 }
 0x1a1   :  { %v203_v0 = vpop.f32.mrf.mxu1 }
 0x1a2   :  { %v3562_v1 = vadd.f32 %v3046_v37, %v203_v0 }
 0x1a4   :  { %v270_v3 = vadd.f32 %v229_v32, %v3562_v1  ;;  %v268_v32 = vmul.f32 0.0, %v249_v60 }
 0x1a6   :  { %v2891_v4 = vmul.f32 -1.442695, %v270_v3 }
 0x1a8   :  { %3056 = vpow2.f32 %v2891_v4 }
 0x1ae   :  { %v3057_v5 = vpop.eup %3056 }
 0x1af   :  { %v274_v6 = vadd.f32 1.0, %v3057_v5 }
 0x1b1   :  { %3058 = vrcp.f32 %v274_v6  ;;  %v286_v10 = vand.u32 2147483648, %v274_v6  ;;  %v284_v15 = vand.u32 2147483647, %v274_v6  ;;  %vm280_vm14 = vweird.f32 %v274_v6 }
 0x1b3   :  { %v287_v17 = vor.u32 1.1754944e-38, %v286_v10  ;;  %vm285_vm0 = vcmp.eq.f32.partialorder %v284_v15, 8.507059e+37 }
 0x1b7   :  { %v3059_v7 = vpop.eup %3058 }
 0x1b8   :  { %v276_v8 = vmul.f32 %v3059_v7, %v274_v6  ;;  %vm281_vm13 = vweird.f32 %v3059_v7 }
 0x1b9   :  { %vm282_vm15 = vmor %vm280_vm14, %vm281_vm13 }
 0x1ba   :  { %v277_v9 = vsub.f32 1.0, %v276_v8 }
 0x1bc   :  { %v278_v13 = vmul.f32 %v3059_v7, %v277_v9 }
 0x1be   :  { %v279_v16 = vadd.f32 %v3059_v7, %v278_v13 }
 0x1c0   :  { %v283_v20 = vsel %vm282_vm15, %v3059_v7, %v279_v16 }
 0x1c1   :  { %v288_v21 = vsel %vm285_vm0, %v287_v17, %v283_v20 }
 0x1c2   :  { %v290_v22 = vmul.f32 %v288_v21, %v253_v57  ;;  %v297_v35 = vsub.f32 1.0, %v288_v21  ;;  %v303_v37 = vmul.f32 0.0, %v288_v21 }
 0x1c4   :  { %292 = vrot.lane.b32.xlu2 %v290_v22, %s3402_s0 }
 0x20e   :  { %v258_v23 = vpop.permute.xlu1 %257 }
 0x20f   :  { %v260_v24 = vadd.f32 %v258_v23, %v3550_v39 }
 0x211   :  { %3060 = vtanh.f32 %v260_v24 }
 0x217   :  { %v3061_v25 = vpop.eup %3060 }
 0x218   :  { %264 = vrot.lane.b32.xlu0 %v3061_v25, %s3403_s9 }
 0x21e   :  { %v293_v26 = vpop.permute.xlu2 %292 }
 0x21f   :  { %v295_v27 = vadd.f32 %v293_v26, %v3562_v1 }
 0x221   :  { %3062 = vtanh.f32 %v295_v27 }
 0x227   :  { %v3063_v28 = vpop.eup %3062 }
 0x228   :  { %299 = vrot.lane.b32.xlu1 %v3063_v28, %s3403_s9 }
 0x28a   :  { %v265_v31 = vpop.permute.xlu0 %264 }
 0x28b   :  { %v267_v33 = vmul.f32 %v265_v31, %v262_v29 }
 0x28d   :  { %v269_v34 = vadd.f32 %v268_v32, %v267_v33 }
 0x28f   :  { %306 = vrot.lane.b32.xlu2 %v269_v34, %s3403_s9 }
 0x29a   :  { %v300_v36 = vpop.permute.xlu1 %299 }
 0x29b   :  { %v302_v38 = vmul.f32 %v300_v36, %v297_v35 }
 0x29d   :  { %v304_v40 = vadd.f32 %v303_v37, %v302_v38 }
 0x29f   :  { %310 = vrot.lane.b32.xlu0 %v304_v40, %s3404_s10 }
 0x2e9   :  { %v3572_v41 = vpop.permute.xlu2 %306 }
 0x311   :  { %v3574_v42 = vpop.permute.xlu0 %310 }
 0x312   :  { %v313_v44 = vsel %vm152_vm8, %v3572_v41, %v3574_v42 }
 0x313   :  { %2892 = vmatmul.msk.f32.vlgmr.msra.gmra.mxu3 %vm207_vm1, %v313_v44 }
 0x314   :  { %779 = vmatpush.msra.mxu3 %v3500_v18 }
 0x316   :  { %780 = vmatpush.msra.mxu3 %v3507_v19 }
 0x396   :  { %v334_v45 = vpop.f32.mrf.mxu3 }
 0x397   :  { %v335_v46 = vadd.f32 %v3538_v30, %v334_v45 }
 0x399   :  { %358 = vrot.lane.b32.xlu1 %v335_v46, %s3401_s29  ;;  %v337_v48 = vadd.f32 %v335_v46, %v3553_v43  ;;  %v379_v49 = vadd.f32 %v335_v46, %v3559_v63 }
 0x39b   :  { %v2893_v50 = vmul.f32 -1.442695, %v337_v48  ;;  %v2894_v52 = vmul.f32 -1.442695, %v379_v49 }
 0x39d   :  { %3064 = vpow2.f32 %v2893_v50 }
 0x39e   :  { %3066 = vpow2.f32 %v2894_v52 }
 0x3a3   :  { %v3065_v53 = vpop.eup %3064 }
 0x3a4   :  { %v3067_v54 = vpop.eup %3066  ;;  %v341_v55 = vadd.f32 1.0, %v3065_v53 }
 0x3a5   :  { %v383_v56 = vadd.f32 1.0, %v3067_v54 }
 0x3a6   :  { %3068 = vrcp.f32 %v341_v55  ;;  %vm347_vm4 = vweird.f32 %v341_v55  ;;  %v353_v4 = vand.u32 2147483648, %v341_v55  ;;  %v351_v6 = vand.u32 2147483647, %v341_v55 }
 0x3a7   :  { %3070 = vrcp.f32 %v383_v56  ;;  %v395_v5 = vand.u32 2147483648, %v383_v56  ;;  %vm389_vm6 = vweird.f32 %v383_v56  ;;  %v393_v7 = vand.u32 2147483647, %v383_v56 }
 0x3a8   :  { %v354_v10 = vor.u32 1.1754944e-38, %v353_v4  ;;  %vm352_vm9 = vcmp.eq.f32.partialorder %v351_v6, 8.507059e+37 }
 0x3a9   :  { %v396_v13 = vor.u32 1.1754944e-38, %v395_v5  ;;  %vm394_vm10 = vcmp.eq.f32.partialorder %v393_v7, 8.507059e+37 }
 0x3ac   :  { %v3069_v18 = vpop.eup %3068 }
 0x3ad   :  { %v3071_v19 = vpop.eup %3070  ;;  %v343_v57 = vmul.f32 %v3069_v18, %v341_v55  ;;  %vm348_vm2 = vweird.f32 %v3069_v18 }
 0x3ae   :  { %v385_v58 = vmul.f32 %v3071_v19, %v383_v56  ;;  %vm390_vm3 = vweird.f32 %v3071_v19  ;;  %vm349_vm5 = vmor %vm347_vm4, %vm348_vm2 }
 0x3af   :  { %v344_v59 = vsub.f32 1.0, %v343_v57  ;;  %vm391_vm7 = vmor %vm389_vm6, %vm390_vm3 }
 0x3b0   :  { %v386_v60 = vsub.f32 1.0, %v385_v58 }
 0x3b1   :  { %v345_v61 = vmul.f32 %v3069_v18, %v344_v59 }
 0x3b2   :  { %v387_v62 = vmul.f32 %v3071_v19, %v386_v60 }
 0x3b3   :  { %v346_v0 = vadd.f32 %v3069_v18, %v345_v61 }
 0x3b4   :  { %v388_v3 = vadd.f32 %v3071_v19, %v387_v62 }
 0x3b5   :  { %v350_v8 = vsel %vm349_vm5, %v3069_v18, %v346_v0 }
 0x3b6   :  { %v392_v9 = vsel %vm391_vm7, %v3071_v19, %v388_v3  ;;  %v355_v16 = vsel %vm352_vm9, %v354_v10, %v350_v8 }
 0x3b7   :  { %v397_v17 = vsel %vm394_vm10, %v396_v13, %v392_v9  ;;  %v368_v29 = vsub.f32 1.0, %v355_v16 }
 0x3b8   :  { %v406_v36 = vsub.f32 1.0, %v397_v17 }
 0x40b   :  { %v359_v15 = vpop.permute.xlu1 %358 }
 0x40c   :  { %v361_v20 = vmul.f32 %v359_v15, %v355_v16  ;;  %v399_v21 = vmul.f32 %v397_v17, %v359_v15 }
 0x40e   :  { %363 = vrot.lane.b32.xlu2 %v361_v20, %s3402_s0  ;;  %401 = vrot.lane.b32.xlu0 %v399_v21, %s3402_s0 }
 0x416   :  { %374 = vrot.lane.b32.xlu2 %v313_v44, %s3405_s11 }
 0x468   :  { %v364_v22 = vpop.permute.xlu2 %363 }
 0x469   :  { %v366_v23 = vadd.f32 %v364_v22, %v3553_v43 }
 0x46b   :  { %3072 = vtanh.f32 %v366_v23 }
 0x470   :  { %v375_v28 = vpop.permute.xlu2 %374 }
 0x471   :  { %v3073_v24 = vpop.eup %3072  ;;  %v377_v32 = vmul.f32 %v375_v28, %v355_v16 }
 0x472   :  { %370 = vrot.lane.b32.xlu1 %v3073_v24, %s3403_s9 }
 0x47a   :  { %412 = vrot.lane.b32.xlu1 %v313_v44, %s3406_s12 }
 0x480   :  { %v402_v25 = vpop.permute.xlu0 %401 }
 0x481   :  { %v404_v26 = vadd.f32 %v402_v25, %v3559_v63 }
 0x483   :  { %3074 = vtanh.f32 %v404_v26 }
 0x489   :  { %v3075_v27 = vpop.eup %3074 }
 0x48a   :  { %408 = vrot.lane.b32.xlu0 %v3075_v27, %s3403_s9 }
 0x4e4   :  { %v371_v31 = vpop.permute.xlu1 %370 }
 0x4e5   :  { %v373_v33 = vmul.f32 %v371_v31, %v368_v29 }
 0x4e7   :  { %v378_v34 = vadd.f32 %v377_v32, %v373_v33 }
 0x4e9   :  { %418 = vrot.lane.b32.xlu2 %v378_v34, %s3403_s9 }
 0x4ec   :  { %v413_v35 = vpop.permute.xlu1 %412 }
 0x4ed   :  { %v415_v38 = vmul.f32 %v413_v35, %v397_v17 }
 0x4fc   :  { %v409_v37 = vpop.permute.xlu0 %408 }
 0x4fd   :  { %v411_v40 = vmul.f32 %v409_v37, %v406_v36 }
 0x4ff   :  { %v416_v44 = vadd.f32 %v415_v38, %v411_v40 }
 0x501   :  { %422 = vrot.lane.b32.xlu0 %v416_v44, %s3404_s10 }
 0x543   :  { %v3596_v45 = vpop.permute.xlu2 %418 }
 0x573   :  { %v3598_v46 = vpop.permute.xlu0 %422 }
 0x574   :  { %v425_v48 = vsel %vm152_vm8, %v3596_v45, %v3598_v46 }
 0x575   :  { %2895 = vmatmul.msk.f32.vlgmr.msrb.gmra.mxu2 %vm207_vm1, %v425_v48 }
 0x5f8   :  { %v446_v49 = vpop.f32.mrf.mxu2 }
 0x5f9   :  { %v447_v50 = vadd.f32 %v3538_v30, %v446_v49 }
 0x5fb   :  { %470 = vrot.lane.b32.xlu1 %v447_v50, %s3401_s29  ;;  %v449_v52 = vadd.f32 %v447_v50, %v3555_v47  ;;  %v491_v53 = vadd.f32 %v447_v50, %v3557_v51 }
 0x5fd   :  { %v2896_v54 = vmul.f32 -1.442695, %v449_v52  ;;  %v2897_v55 = vmul.f32 -1.442695, %v491_v53 }
 0x5ff   :  { %3076 = vpow2.f32 %v2896_v54 }
 0x600   :  { %3078 = vpow2.f32 %v2897_v55 }
 0x605   :  { %v3077_v56 = vpop.eup %3076 }
 0x606   :  { %v3079_v18 = vpop.eup %3078  ;;  %v453_v19 = vadd.f32 1.0, %v3077_v56 }
 0x607   :  { %v495_v57 = vadd.f32 1.0, %v3079_v18 }
 0x608   :  { %3080 = vrcp.f32 %v453_v19  ;;  %vm459_vm13 = vweird.f32 %v453_v19  ;;  %v465_v7 = vand.u32 2147483648, %v453_v19  ;;  %v463_v9 = vand.u32 2147483647, %v453_v19 }
 0x609   :  { %3082 = vrcp.f32 %v495_v57  ;;  %v507_v8 = vand.u32 2147483648, %v495_v57  ;;  %vm501_vm15 = vweird.f32 %v495_v57  ;;  %v505_v10 = vand.u32 2147483647, %v495_v57 }
 0x60a   :  { %v466_v16 = vor.u32 1.1754944e-38, %v465_v7  ;;  %vm464_vm2 = vcmp.eq.f32.partialorder %v463_v9, 8.507059e+37 }
 0x60b   :  { %v508_v17 = vor.u32 1.1754944e-38, %v507_v8  ;;  %vm506_vm3 = vcmp.eq.f32.partialorder %v505_v10, 8.507059e+37 }
 0x60e   :  { %v3081_v58 = vpop.eup %3080 }
 0x60f   :  { %v3083_v59 = vpop.eup %3082  ;;  %v455_v60 = vmul.f32 %v3081_v58, %v453_v19  ;;  %vm460_vm11 = vweird.f32 %v3081_v58 }
 0x610   :  { %v497_v61 = vmul.f32 %v3083_v59, %v495_v57  ;;  %vm502_vm12 = vweird.f32 %v3083_v59  ;;  %vm461_vm14 = vmor %vm459_vm13, %vm460_vm11 }
 0x611   :  { %v456_v62 = vsub.f32 1.0, %v455_v60  ;;  %vm503_vm0 = vmor %vm501_vm15, %vm502_vm12 }
 0x612   :  { %v498_v0 = vsub.f32 1.0, %v497_v61 }
 0x613   :  { %v457_v3 = vmul.f32 %v3081_v58, %v456_v62 }
 0x614   :  { %v499_v4 = vmul.f32 %v3083_v59, %v498_v0 }
 0x615   :  { %v458_v5 = vadd.f32 %v3081_v58, %v457_v3 }
 0x616   :  { %v500_v6 = vadd.f32 %v3083_v59, %v499_v4 }
 0x617   :  { %v462_v13 = vsel %vm461_vm14, %v3081_v58, %v458_v5 }
 0x618   :  { %v504_v15 = vsel %vm503_vm0, %v3083_v59, %v500_v6  ;;  %v467_v21 = vsel %vm464_vm2, %v466_v16, %v462_v13 }
 0x619   :  { %v509_v22 = vsel %vm506_vm3, %v508_v17, %v504_v15  ;;  %v480_v33 = vsub.f32 1.0, %v467_v21 }
 0x61a   :  { %v518_v40 = vsub.f32 1.0, %v509_v22 }
 0x66d   :  { %v471_v20 = vpop.permute.xlu1 %470 }
 0x66e   :  { %v473_v23 = vmul.f32 %v471_v20, %v467_v21  ;;  %v511_v24 = vmul.f32 %v509_v22, %v471_v20 }
 0x670   :  { %513 = vrot.lane.b32.xlu0 %v511_v24, %s3402_s0  ;;  %475 = vrot.lane.b32.xlu2 %v473_v23, %s3402_s0 }
 0x678   :  { %486 = vrot.lane.b32.xlu2 %v425_v48, %s3405_s11 }
 0x6ca   :  { %v476_v25 = vpop.permute.xlu2 %475 }
 0x6cb   :  { %v478_v26 = vadd.f32 %v476_v25, %v3555_v47 }
 0x6cd   :  { %3084 = vtanh.f32 %v478_v26 }
 0x6d2   :  { %v487_v32 = vpop.permute.xlu2 %486 }
 0x6d3   :  { %v3085_v27 = vpop.eup %3084  ;;  %v489_v35 = vmul.f32 %v487_v32, %v467_v21 }
 0x6d4   :  { %482 = vrot.lane.b32.xlu1 %v3085_v27, %s3403_s9 }
 0x6dc   :  { %524 = vrot.lane.b32.xlu1 %v425_v48, %s3406_s12 }
 0x6e2   :  { %v514_v28 = vpop.permute.xlu0 %513 }
 0x6e3   :  { %v516_v29 = vadd.f32 %v514_v28, %v3557_v51 }
 0x6e5   :  { %3086 = vtanh.f32 %v516_v29 }
 0x6eb   :  { %v3087_v31 = vpop.eup %3086 }
 0x6ec   :  { %520 = vrot.lane.b32.xlu0 %v3087_v31, %s3403_s9 }
 0x746   :  { %v483_v34 = vpop.permute.xlu1 %482 }
 0x747   :  { %v485_v36 = vmul.f32 %v483_v34, %v480_v33 }
 0x749   :  { %v490_v37 = vadd.f32 %v489_v35, %v485_v36 }
 0x74b   :  { %530 = vrot.lane.b32.xlu2 %v490_v37, %s3403_s9 }
 0x74e   :  { %v525_v38 = vpop.permute.xlu1 %524 }
 0x74f   :  { %v527_v49 = vmul.f32 %v525_v38, %v509_v22 }
 0x75e   :  { %v521_v44 = vpop.permute.xlu0 %520 }
 0x75f   :  { %v523_v48 = vmul.f32 %v521_v44, %v518_v40 }
 0x761   :  { %v528_v50 = vadd.f32 %v527_v49, %v523_v48 }
 0x763   :  { %534 = vrot.lane.b32.xlu0 %v528_v50, %s3404_s10 }
 0x7a5   :  { %v3618_v52 = vpop.permute.xlu2 %530 }
 0x7d5   :  { %v3620_v53 = vpop.permute.xlu0 %534 }
 0x7d6   :  { %v537_v54 = vsel %vm152_vm8, %v3618_v52, %v3620_v53 }
 0x7d7   :  { %2898 = vmatmul.msk.f32.vlgmr.msrb.gmra.mxu3 %vm207_vm1, %v537_v54 }
 0x85a   :  { %v558_v55 = vpop.f32.mrf.mxu3 }
 0x85b   :  { %v559_v56 = vadd.f32 %v3538_v30, %v558_v55 }
 0x85d   :  { %582 = vrot.lane.b32.xlu1 %v559_v56, %s3401_s29  ;;  %v561_v18 = vadd.f32 %v559_v56, %v3557_v51  ;;  %v603_v19 = vadd.f32 %v559_v56, %v3555_v47 }
 0x85f   :  { %v2899_v57 = vmul.f32 -1.442695, %v561_v18  ;;  %v2900_v58 = vmul.f32 -1.442695, %v603_v19 }
 0x861   :  { %3088 = vpow2.f32 %v2899_v57 }
 0x862   :  { %3090 = vpow2.f32 %v2900_v58 }
 0x867   :  { %v3089_v59 = vpop.eup %3088 }
 0x868   :  { %v3091_v60 = vpop.eup %3090  ;;  %v565_v61 = vadd.f32 1.0, %v3089_v59 }
 0x869   :  { %v607_v62 = vadd.f32 1.0, %v3091_v60 }
 0x86a   :  { %3092 = vrcp.f32 %v565_v61  ;;  %vm571_vm6 = vweird.f32 %v565_v61  ;;  %v577_v15 = vand.u32 2147483648, %v565_v61  ;;  %v575_v17 = vand.u32 2147483647, %v565_v61 }
 0x86b   :  { %3094 = vrcp.f32 %v607_v62  ;;  %v619_v16 = vand.u32 2147483648, %v607_v62  ;;  %vm613_vm9 = vweird.f32 %v607_v62  ;;  %v617_v20 = vand.u32 2147483647, %v607_v62 }
 0x86c   :  { %v578_v23 = vor.u32 1.1754944e-38, %v577_v15  ;;  %vm576_vm11 = vcmp.eq.f32.partialorder %v575_v17, 8.507059e+37 }
 0x86d   :  { %v620_v24 = vor.u32 1.1754944e-38, %v619_v16  ;;  %vm618_vm12 = vcmp.eq.f32.partialorder %v617_v20, 8.507059e+37 }
 0x870   :  { %v3093_v0 = vpop.eup %3092 }
 0x871   :  { %v3095_v3 = vpop.eup %3094  ;;  %v567_v4 = vmul.f32 %v3093_v0, %v565_v61  ;;  %vm572_vm4 = vweird.f32 %v3093_v0 }
 0x872   :  { %v609_v5 = vmul.f32 %v3095_v3, %v607_v62  ;;  %vm614_vm5 = vweird.f32 %v3095_v3  ;;  %vm573_vm7 = vmor %vm571_vm6, %vm572_vm4 }
 0x873   :  { %v568_v6 = vsub.f32 1.0, %v567_v4  ;;  %vm615_vm10 = vmor %vm613_vm9, %vm614_vm5 }
 0x874   :  { %v610_v7 = vsub.f32 1.0, %v609_v5 }
 0x875   :  { %v569_v8 = vmul.f32 %v3093_v0, %v568_v6 }
 0x876   :  { %v611_v9 = vmul.f32 %v3095_v3, %v610_v7 }
 0x877   :  { %v570_v10 = vadd.f32 %v3093_v0, %v569_v8 }
 0x878   :  { %v612_v13 = vadd.f32 %v3095_v3, %v611_v9 }
 0x879   :  { %v574_v21 = vsel %vm573_vm7, %v3093_v0, %v570_v10 }
 0x87a   :  { %v616_v22 = vsel %vm615_vm10, %v3095_v3, %v612_v13  ;;  %v579_v26 = vsel %vm576_vm11, %v578_v23, %v574_v21 }
 0x87b   :  { %v621_v27 = vsel %vm618_vm12, %v620_v24, %v616_v22  ;;  %v592_v38 = vsub.f32 1.0, %v579_v26 }
 0x87c   :  { %v630_v50 = vsub.f32 1.0, %v621_v27 }
 0x8cf   :  { %v583_v25 = vpop.permute.xlu1 %582 }
 0x8d0   :  { %v585_v28 = vmul.f32 %v583_v25, %v579_v26  ;;  %v623_v29 = vmul.f32 %v621_v27, %v583_v25 }
 0x8d2   :  { %625 = vrot.lane.b32.xlu0 %v623_v29, %s3402_s0  ;;  %587 = vrot.lane.b32.xlu2 %v585_v28, %s3402_s0 }
 0x8da   :  { %598 = vrot.lane.b32.xlu2 %v537_v54, %s3405_s11 }
 0x92c   :  { %v588_v31 = vpop.permute.xlu2 %587 }
 0x92d   :  { %v590_v32 = vadd.f32 %v588_v31, %v3557_v51 }
 0x92f   :  { %3096 = vtanh.f32 %v590_v32 }
 0x934   :  { %v599_v37 = vpop.permute.xlu2 %598 }
 0x935   :  { %v3097_v33 = vpop.eup %3096  ;;  %v601_v44 = vmul.f32 %v599_v37, %v579_v26 }
 0x936   :  { %594 = vrot.lane.b32.xlu1 %v3097_v33, %s3403_s9 }
 0x93e   :  { %636 = vrot.lane.b32.xlu1 %v537_v54, %s3406_s12 }
 0x944   :  { %v626_v34 = vpop.permute.xlu0 %625 }
 0x945   :  { %v628_v35 = vadd.f32 %v626_v34, %v3555_v47 }
 0x947   :  { %3098 = vtanh.f32 %v628_v35 }
 0x94d   :  { %v3099_v36 = vpop.eup %3098 }
 0x94e   :  { %632 = vrot.lane.b32.xlu0 %v3099_v36, %s3403_s9 }
 0x9a8   :  { %v595_v40 = vpop.permute.xlu1 %594 }
 0x9a9   :  { %v597_v49 = vmul.f32 %v595_v40, %v592_v38 }
 0x9ab   :  { %v602_v48 = vadd.f32 %v601_v44, %v597_v49 }
 0x9ad   :  { %642 = vrot.lane.b32.xlu2 %v602_v48, %s3403_s9 }
 0x9b0   :  { %v637_v51 = vpop.permute.xlu1 %636 }
 0x9b1   :  { %v639_v56 = vmul.f32 %v637_v51, %v621_v27 }
 0x9c0   :  { %v633_v55 = vpop.permute.xlu0 %632 }
 0x9c1   :  { %v635_v54 = vmul.f32 %v633_v55, %v630_v50 }
 0x9c3   :  { %v640_v18 = vadd.f32 %v639_v56, %v635_v54 }
 0x9c5   :  { %646 = vrot.lane.b32.xlu0 %v640_v18, %s3404_s10 }
 0xa07   :  { %v643_v47 = vpop.permute.xlu2 %642 }
 0xa08   :  { %v3642_v19 = vsel %vm152_vm8, %v643_v47, %v3620_v53 }
 0xa09   :  { %883 = vst.msk [vmem:[#allocation7 + $0x18] sm:$0xff] %vm207_vm1, %v3642_v19 }
 0xa37   :  { %v647_v57 = vpop.permute.xlu0 %646 }
 0xa38   :  { %v649_v58 = vsel %vm152_vm8, %v643_v47, %v647_v57  ;;  %v3649_v59 = vsel %vm152_vm8, %v3618_v52, %v647_v57 }
 0xa39   :  { %2901 = vmatmul.msk.f32.vlgmr.msra.gmra.mxu2 %vm207_vm1, %v649_v58  ;;  %882 = vst.msk [vmem:[#allocation7 + $0x10] sm:$0xff] %vm207_vm1, %v3649_v59 }
 0xabc   :  { %v670_v60 = vpop.f32.mrf.mxu2 }
 0xabd   :  { %v671_v61 = vadd.f32 %v3538_v30, %v670_v60 }
 0xabf   :  { %694 = vrot.lane.b32.xlu1 %v671_v61, %s3401_s29  ;;  %v673_v53 = vadd.f32 %v671_v61, %v3559_v63  ;;  %v715_v62 = vadd.f32 %v671_v61, %v3553_v43 }
 0xac1   :  { %v2902_v0 = vmul.f32 -1.442695, %v673_v53  ;;  %v2903_v3 = vmul.f32 -1.442695, %v715_v62 }
 0xac3   :  { %3100 = vpow2.f32 %v2902_v0 }
 0xac4   :  { %3102 = vpow2.f32 %v2903_v3 }
 0xac9   :  { %v3101_v52 = vpop.eup %3100 }
 0xaca   :  { %v3103_v4 = vpop.eup %3102  ;;  %v677_v5 = vadd.f32 1.0, %v3101_v52 }
 0xacb   :  { %v719_v6 = vadd.f32 1.0, %v3103_v4 }
 0xacc   :  { %3104 = vrcp.f32 %v677_v5  ;;  %vm683_vm15 = vweird.f32 %v677_v5  ;;  %v689_v22 = vand.u32 2147483648, %v677_v5  ;;  %v687_v24 = vand.u32 2147483647, %v677_v5 }
 0xacd   :  { %3106 = vrcp.f32 %v719_v6  ;;  %v731_v23 = vand.u32 2147483648, %v719_v6  ;;  %vm725_vm2 = vweird.f32 %v719_v6  ;;  %v729_v25 = vand.u32 2147483647, %v719_v6 }
 0xace   :  { %v690_v28 = vor.u32 1.1754944e-38, %v689_v22  ;;  %vm688_vm4 = vcmp.eq.f32.partialorder %v687_v24, 8.507059e+37 }
 0xacf   :  { %v732_v29 = vor.u32 1.1754944e-38, %v731_v23  ;;  %vm730_vm5 = vcmp.eq.f32.partialorder %v729_v25, 8.507059e+37 }
 0xad2   :  { %v3105_v7 = vpop.eup %3104 }
 0xad3   :  { %v3107_v8 = vpop.eup %3106  ;;  %v679_v9 = vmul.f32 %v3105_v7, %v677_v5  ;;  %vm684_vm13 = vweird.f32 %v3105_v7 }
 0xad4   :  { %v721_v10 = vmul.f32 %v3107_v8, %v719_v6  ;;  %vm726_vm14 = vweird.f32 %v3107_v8  ;;  %vm685_vm0 = vmor %vm683_vm15, %vm684_vm13  ;;  %vm992_vm15 = vcmask 7168  }
 0xad5   :  { %v680_v13 = vsub.f32 1.0, %v679_v9  ;;  %vm727_vm3 = vmor %vm725_vm2, %vm726_vm14 }
 0xad6   :  { %v722_v15 = vsub.f32 1.0, %v721_v10 }
 0xad7   :  { %v681_v16 = vmul.f32 %v3105_v7, %v680_v13 }
 0xad8   :  { %v723_v17 = vmul.f32 %v3107_v8, %v722_v15 }
 0xad9   :  { %v682_v20 = vadd.f32 %v3105_v7, %v681_v16 }
 0xada   :  { %v724_v21 = vadd.f32 %v3107_v8, %v723_v17 }
 0xadb   :  { %v686_v26 = vsel %vm685_vm0, %v3105_v7, %v682_v20  ;;  %vm1035_vm0 = vcmask 195584  }
 0xadc   :  { %v728_v27 = vsel %vm727_vm3, %v3107_v8, %v724_v21  ;;  %v691_v32 = vsel %vm688_vm4, %v690_v28, %v686_v26  ;;  %1082 = vst.msk [vmem:[#allocation6] sm:$0xff] %vm1035_vm0, %v3400_v14  ;;  %vm1257_vm4 = vcmask 392192  }
 0xadd   :  { %v733_v33 = vsel %vm730_vm5, %v732_v29, %v728_v27  ;;  %v704_v51 = vsub.f32 1.0, %v691_v32 }
 0xade   :  { %v742_v18 = vsub.f32 1.0, %v733_v33 }
 0xb31   :  { %v695_v31 = vpop.permute.xlu1 %694 }
 0xb32   :  { %v697_v34 = vmul.f32 %v695_v31, %v691_v32  ;;  %v735_v35 = vmul.f32 %v733_v33, %v695_v31 }
 0xb34   :  { %737 = vrot.lane.b32.xlu0 %v735_v35, %s3402_s0  ;;  %699 = vrot.lane.b32.xlu2 %v697_v34, %s3402_s0 }
 0xb3c   :  { %710 = vrot.lane.b32.xlu2 %v649_v58, %s3405_s11 }
 0xb8e   :  { %v700_v36 = vpop.permute.xlu2 %699 }
 0xb8f   :  { %v702_v37 = vadd.f32 %v700_v36, %v3559_v63 }
 0xb91   :  { %3108 = vtanh.f32 %v702_v37 }
 0xb96   :  { %v711_v48 = vpop.permute.xlu2 %710 }
 0xb97   :  { %v3109_v38 = vpop.eup %3108  ;;  %v713_v55 = vmul.f32 %v711_v48, %v691_v32 }
 0xb98   :  { %706 = vrot.lane.b32.xlu1 %v3109_v38, %s3403_s9 }
 0xba0   :  { %748 = vrot.lane.b32.xlu1 %v649_v58, %s3406_s12 }
 0xba6   :  { %v738_v40 = vpop.permute.xlu0 %737 }
 0xba7   :  { %v740_v44 = vadd.f32 %v738_v40, %v3553_v43 }
 0xba9   :  { %3110 = vtanh.f32 %v740_v44 }
 0xbaf   :  { %v3111_v49 = vpop.eup %3110 }
 0xbb0   :  { %744 = vrot.lane.b32.xlu0 %v3111_v49, %s3403_s9 }
 0xc0a   :  { %v707_v50 = vpop.permute.xlu1 %706 }
 0xc0b   :  { %v709_v56 = vmul.f32 %v707_v50, %v704_v51 }
 0xc0d   :  { %v714_v54 = vadd.f32 %v713_v55, %v709_v56 }
 0xc0f   :  { %754 = vrot.lane.b32.xlu2 %v714_v54, %s3403_s9 }
 0xc12   :  { %v749_v63 = vpop.permute.xlu1 %748 }
 0xc13   :  { %v751_v57 = vmul.f32 %v749_v63, %v733_v33 }
 0xc22   :  { %v745_v47 = vpop.permute.xlu0 %744 }
 0xc23   :  { %v747_v58 = vmul.f32 %v745_v47, %v742_v18 }
 0xc25   :  { %v752_v60 = vadd.f32 %v751_v57, %v747_v58 }
 0xc27   :  { %758 = vrot.lane.b32.xlu0 %v752_v60, %s3404_s10 }
 0xc69   :  { %v755_v43 = vpop.permute.xlu2 %754 }
 0xc6a   :  { %v3670_v61 = vsel %vm152_vm8, %v755_v43, %v3598_v46 }
 0xc6b   :  { %884 = vst.msk [vmem:[#allocation7 + $0x20] sm:$0xff] %vm207_vm1, %v3670_v61 }
 0xc99   :  { %v759_v53 = vpop.permute.xlu0 %758 }
 0xc9a   :  { %v761_v62 = vsel %vm152_vm8, %v755_v43, %v759_v53  ;;  %v3677_v0 = vsel %vm152_vm8, %v3596_v45, %v759_v53  ;;  %v44_v53 = vld [vmem:[%s4233_s3 + $0x30] sm:$0xff] }
 0xc9b   :  { %2904 = vmatmul.msk.f32.vlgmr.msra.gmra.mxu3 %vm207_vm1, %v761_v62  ;;  %881 = vst.msk [vmem:[#allocation7 + $0x8] sm:$0xff] %vm207_vm1, %v3677_v0 }
 0xd1e   :  { %v782_v3 = vpop.f32.mrf.mxu3 }
 0xd1f   :  { %v783_v52 = vadd.f32 %v3538_v30, %v782_v3 }
 0xd21   :  { %806 = vrot.lane.b32.xlu1 %v783_v52, %s3401_s29  ;;  %v785_v46 = vadd.f32 %v783_v52, %v3562_v1  ;;  %v827_v4 = vadd.f32 %v783_v52, %v3550_v39 }
 0xd23   :  { %v2905_v5 = vmul.f32 -1.442695, %v785_v46  ;;  %v2906_v6 = vmul.f32 -1.442695, %v827_v4  ;;  %v916_v46 = vld [vmem:[%s4234_s4 + $0x20] sm:$0xff] }
 0xd25   :  { %3112 = vpow2.f32 %v2905_v5 }
 0xd26   :  { %3114 = vpow2.f32 %v2906_v6 }
 0xd2b   :  { %v3113_v45 = vpop.eup %3112 }
 0xd2c   :  { %v3115_v7 = vpop.eup %3114  ;;  %v789_v8 = vadd.f32 1.0, %v3113_v45  ;;  %v3047_v45 = vld [vmem:[%s4233_s3 + $0x42] ss:$0 sm:$0xff] }
 0xd2d   :  { %v831_v9 = vadd.f32 1.0, %v3115_v7 }
 0xd2e   :  { %3116 = vrcp.f32 %v789_v8  ;;  %vm795_vm9 = vweird.f32 %v789_v8  ;;  %v801_v24 = vand.u32 2147483648, %v789_v8  ;;  %v799_v26 = vand.u32 2147483647, %v789_v8 }
 0xd2f   :  { %3118 = vrcp.f32 %v831_v9  ;;  %v843_v25 = vand.u32 2147483648, %v831_v9  ;;  %vm837_vm11 = vweird.f32 %v831_v9  ;;  %v841_v27 = vand.u32 2147483647, %v831_v9 }
 0xd30   :  { %v802_v31 = vor.u32 1.1754944e-38, %v801_v24  ;;  %vm800_vm13 = vcmp.eq.f32.partialorder %v799_v26, 8.507059e+37 }
 0xd31   :  { %v844_v32 = vor.u32 1.1754944e-38, %v843_v25  ;;  %vm842_vm14 = vcmp.eq.f32.partialorder %v841_v27, 8.507059e+37 }
 0xd34   :  { %v3117_v10 = vpop.eup %3116 }
 0xd35   :  { %v3119_v13 = vpop.eup %3118  ;;  %v791_v15 = vmul.f32 %v3117_v10, %v789_v8  ;;  %vm796_vm6 = vweird.f32 %v3117_v10 }
 0xd36   :  { %v833_v30 = vmul.f32 %v3119_v13, %v831_v9  ;;  %vm838_vm7 = vweird.f32 %v3119_v13  ;;  %vm797_vm10 = vmor %vm795_vm9, %vm796_vm6 }
 0xd37   :  { %v792_v16 = vsub.f32 1.0, %v791_v15  ;;  %vm839_vm12 = vmor %vm837_vm11, %vm838_vm7 }
 0xd38   :  { %v834_v17 = vsub.f32 1.0, %v833_v30  ;;  %v3048_v30 = vld [vmem:[%s4234_s4 + $0x70] ss:$0 sm:$0xff] }
 0xd39   :  { %v793_v20 = vmul.f32 %v3117_v10, %v792_v16 }
 0xd3a   :  { %v835_v21 = vmul.f32 %v3119_v13, %v834_v17 }
 0xd3b   :  { %v794_v22 = vadd.f32 %v3117_v10, %v793_v20 }
 0xd3c   :  { %v836_v23 = vadd.f32 %v3119_v13, %v835_v21 }
 0xd3d   :  { %v798_v28 = vsel %vm797_vm10, %v3117_v10, %v794_v22  ;;  %v3754_v10 = vld [vmem:[%s4234_s4 + $0x78] sm:$0xff] }
 0xd3e   :  { %v840_v29 = vsel %vm839_vm12, %v3119_v13, %v836_v23  ;;  %v803_v34 = vsel %vm800_vm13, %v802_v31, %v798_v28  ;;  %1153 = vmatpush.msrb.mxu0 %v3754_v10 }
 0xd3f   :  { %v845_v35 = vsel %vm842_vm14, %v844_v32, %v840_v29  ;;  %v816_v55 = vsub.f32 1.0, %v803_v34 }
 0xd40   :  { %v854_v47 = vsub.f32 1.0, %v845_v35 }
 0xd93   :  { %v807_v33 = vpop.permute.xlu1 %806 }
 0xd94   :  { %v809_v36 = vmul.f32 %v807_v33, %v803_v34  ;;  %v847_v37 = vmul.f32 %v845_v35, %v807_v33 }
 0xd96   :  { %849 = vrot.lane.b32.xlu0 %v847_v37, %s3402_s0  ;;  %811 = vrot.lane.b32.xlu2 %v809_v36, %s3402_s0 }
 0xd9e   :  { %822 = vrot.lane.b32.xlu2 %v761_v62, %s3405_s11 }
 0xdf0   :  { %v812_v38 = vpop.permute.xlu2 %811 }
 0xdf1   :  { %v814_v40 = vadd.f32 %v812_v38, %v3562_v1 }
 0xdf3   :  { %3120 = vtanh.f32 %v814_v40 }
 0xdf8   :  { %v823_v50 = vpop.permute.xlu2 %822 }
 0xdf9   :  { %v3121_v44 = vpop.eup %3120  ;;  %v825_v54 = vmul.f32 %v823_v50, %v803_v34 }
 0xdfa   :  { %818 = vrot.lane.b32.xlu1 %v3121_v44, %s3403_s9 }
 0xe02   :  { %860 = vrot.lane.b32.xlu1 %v761_v62, %s3406_s12  ;;  %v917_v62 = vld [vmem:[%s4234_s4 + $0x28] sm:$0xff] }
 0xe03   :  { %964 = vmatpush.msrb.mxu3 %v917_v62 }
 0xe05   :  { %965 = vmatpush.msrb.mxu3 %v916_v46 }
 0xe08   :  { %v850_v49 = vpop.permute.xlu0 %849 }
 0xe09   :  { %v852_v48 = vadd.f32 %v850_v49, %v3550_v39  ;;  %v45_v39 = vld [vmem:[%s4233_s3 + $0x38] sm:$0xff] }
 0xe0a   :  { %904 = vmatpush.msrb.mxu2 %v45_v39 }
 0xe0b   :  { %3122 = vtanh.f32 %v852_v48  ;;  %v991_v48 = vand.u32 2147483647, %v3754_v10 }
 0xe0c   :  { %905 = vmatpush.msrb.mxu2 %v44_v53 }
 0xe11   :  { %v3123_v51 = vpop.eup %3122 }
 0xe12   :  { %856 = vrot.lane.b32.xlu0 %v3123_v51, %s3403_s9  ;;  %v993_v51 = vsel %vm992_vm15, %v991_v48, 0.0 }
 0xe6c   :  { %v819_v56 = vpop.permute.xlu1 %818 }
 0xe6d   :  { %v821_v63 = vmul.f32 %v819_v56, %v816_v55  ;;  %v994_v55 = vrot.slane %v993_v51, 4 }
 0xe6f   :  { %v826_v18 = vadd.f32 %v825_v54, %v821_v63  ;;  %v995_v56 = vadd.f32 %v994_v55, %v993_v51  ;;  %v1004_v55 = vld [vmem:[%s4232_s2 + $0x20] sm:$0xff] }
 0xe71   :  { %866 = vrot.lane.b32.xlu2 %v826_v18, %s3403_s9  ;;  %v996_v63 = vrot.slane %v995_v56, 2 }
 0xe73   :  { %v997_v18 = vadd.f32 %v996_v63, %v995_v56  ;;  %v1000_v56 = vld [vmem:[%s4232_s2] sm:$0xff]  ;;  %v1002_v63 = vld [vmem:[%s4232_s2 + $0x10] sm:$0xff] }
 0xe74   :  { %v861_v1 = vpop.permute.xlu1 %860 }
 0xe75   :  { %v863_v58 = vmul.f32 %v861_v1, %v845_v35 }
 0xe84   :  { %v857_v57 = vpop.permute.xlu0 %856 }
 0xe85   :  { %v859_v60 = vmul.f32 %v857_v57, %v854_v47  ;;  %v998_v47 = vrot.slane %v997_v18, 1 }
 0xe87   :  { %v864_v43 = vadd.f32 %v863_v58, %v859_v60  ;;  %v3792_v57 = vadd.f32 %v998_v47, %v997_v18  ;;  %v3833_v18 = vld [vmem:[%s4234_s4 + $0x10] sm:$0xff]  ;;  %v3845_v47 = vld [vmem:[%s4234_s4] sm:$0xff] }
 0xe88   :  { %1064 = vmatpush.msra.mxu2 %v3833_v18 }
 0xe89   :  { %870 = vrot.lane.b32.xlu0 %v864_v43, %s3404_s10 }
 0xecb   :  { %v867_v3 = vpop.permute.xlu2 %866 }
 0xecc   :  { %v3707_v52 = vsel %vm152_vm8, %v867_v3, %v3574_v42  ;;  %v3729_v42 = vld [vmem:[%s4234_s4 + $0x18] sm:$0xff] }
 0xecd   :  { %885 = vst.msk [vmem:[#allocation7 + $0x28] sm:$0xff] %vm207_vm1, %v3707_v52  ;;  %1103 = vmatpush.msra.mxu1 %v3729_v42 }
 0xefb   :  { %v871_v4 = vpop.permute.xlu0 %870 }
 0xefc   :  { %v873_v5 = vsel %vm152_vm8, %v867_v3, %v871_v4  ;;  %v3717_v6 = vsel %vm152_vm8, %v3572_v41, %v871_v4  ;;  %v3743_v41 = vld [vmem:[%s4234_s4 + $0x48] sm:$0xff] }
 0xefd   :  { %880 = vst.msk [vmem:[#allocation7] sm:$0xff] %vm207_vm1, %v3717_v6  ;;  %2907 = vmatmul.msk.f32.vlgmr.msrb.gmra.mxu2 %vm207_vm1, %v873_v5  ;;  %2908 = vmatmul.msk.f32.vlgmr.msrb.gmra.mxu3 %vm207_vm1, %v3717_v6 }
 0xefe   :  { %1367 = vmatpush.msra.mxu3 %v3743_v41 }
 0xf05   :  { %2909 = vmatmul.msk.f32.gmra.mxu3 %vm207_vm1, %v3677_v0 }
 0xf0d   :  { %2910 = vmatmul.msk.f32.gmra.mxu3 %vm207_vm1, %v3649_v59 }
 0xf15   :  { %2911 = vmatmul.msk.f32.gmra.mxu3 %vm207_vm1, %v3642_v19 }
 0xf1d   :  { %2912 = vmatmul.msk.f32.gmra.mxu3 %vm207_vm1, %v3670_v61 }
 0xf25   :  { %2913 = vmatmul.msk.f32.gmra.mxu3 %vm207_vm1, %v3707_v52 }
 0xf80   :  { %v907_v7 = vpop.f32.mrf.mxu2  ;;  %v967_v13 = vpop.f32.mrf.mxu3 }
 0xf81   :  { %v908_v8 = vadd.f32 %v3047_v45, %v907_v7  ;;  %v3766_v16 = vadd.f32 %v3048_v30, %v967_v13 }
 0xf83   :  { %3124 = vtanh.f32 %v908_v8 }
 0xf88   :  { %v970_v15 = vpop.f32.mrf.mxu3 }
 0xf89   :  { %v3749_v9 = vpop.eup %3124  ;;  %v3769_v22 = vadd.f32 %v3048_v30, %v970_v15 }
 0xf8a   :  { %911 = vst.msk [vmem:[#allocation9] sm:$0xff] %vm152_vm8, %v3749_v9  ;;  %2925 = vmatmul.msk.f32.vlgmr.msra.gmra.mxu1 %vm152_vm8, %v3749_v9  ;;  %2935 = vmatmul.msk.f32.vlgmr.msra.gmra.mxu3 %vm152_vm8, %v3749_v9 }
 0xf90   :  { %v973_v21 = vpop.f32.mrf.mxu3 }
 0xf91   :  { %v3773_v25 = vadd.f32 %v3048_v30, %v973_v21 }
 0xf98   :  { %v976_v26 = vpop.f32.mrf.mxu3 }
 0xf99   :  { %v3777_v29 = vadd.f32 %v3048_v30, %v976_v26 }
 0xfa0   :  { %v979_v32 = vpop.f32.mrf.mxu3 }
 0xfa1   :  { %v3781_v34 = vadd.f32 %v3048_v30, %v979_v32 }
 0xfa8   :  { %v982_v37 = vpop.f32.mrf.mxu3 }
 0xfa9   :  { %v3785_v38 = vadd.f32 %v3048_v30, %v982_v37 }
0x1007   :  { %v1105_v17 = vpop.f32.mrf.mxu1 }
0x1008   :  { %v1108_v20 = vadd.f32 %v1105_v17, %v3766_v16  ;;  %v1109_v23 = vadd.f32 %v1105_v17, %v3769_v22  ;;  %v1110_v27 = vadd.f32 %v1105_v17, %v3773_v25  ;;  %v1111_v31 = vadd.f32 %v1105_v17, %v3777_v29 }
0x1009   :  { %v1112_v35 = vadd.f32 %v1105_v17, %v3781_v34  ;;  %v1113_v40 = vadd.f32 %v1105_v17, %v3785_v38 }
0x100a   :  { %3126 = vtanh.f32 %v1108_v20 }
0x100b   :  { %3128 = vtanh.f32 %v1109_v23 }
0x100c   :  { %3130 = vtanh.f32 %v1110_v27 }
0x100d   :  { %3132 = vtanh.f32 %v1111_v31 }
0x100e   :  { %3134 = vtanh.f32 %v1112_v35 }
0x100f   :  { %3136 = vtanh.f32 %v1113_v40 }
0x1010   :  { %v3127_v24 = vpop.eup %3126 }
0x1011   :  { %2926 = vmatmul.msk.f32.vlgmr.msrb.gmra.mxu0 %vm152_vm8, %v3127_v24  ;;  %v3129_v28 = vpop.eup %3128 }
0x1012   :  { %v3131_v33 = vpop.eup %3130 }
0x1013   :  { %v3133_v36 = vpop.eup %3132 }
0x1014   :  { %v3135_v44 = vpop.eup %3134 }
0x1015   :  { %v3137_v49 = vpop.eup %3136 }
0x1019   :  { %2927 = vmatmul.msk.f32.gmra.mxu0 %vm152_vm8, %v3129_v28 }
0x1021   :  { %2928 = vmatmul.msk.f32.gmra.mxu0 %vm152_vm8, %v3131_v33 }
0x1029   :  { %2929 = vmatmul.msk.f32.gmra.mxu0 %vm152_vm8, %v3133_v36 }
0x1031   :  { %2930 = vmatmul.msk.f32.gmra.mxu0 %vm152_vm8, %v3135_v44  ;;  %v1001_v44 = vld [vmem:[%s4232_s2 + $0x8] sm:$0xff] }
0x1039   :  { %2931 = vmatmul.msk.f32.gmra.mxu0 %vm152_vm8, %v3137_v49 }
0x108e   :  { %v1155_v50 = vpop.f32.mrf.mxu0 }
0x108f   :  { %v1173_v39 = vsub.f32 %v1155_v50, %v3792_v57 }
0x1091   :  { %v1179_v53 = vmul.f32 1.442695, %v1173_v39 }
0x1096   :  { %v1158_v54 = vpop.f32.mrf.mxu0 }
0x1097   :  { %v1174_v5 = vsub.f32 %v1158_v54, %v3792_v57 }
0x1099   :  { %v1181_v45 = vmul.f32 1.442695, %v1174_v5 }
0x109e   :  { %v1161_v1 = vpop.f32.mrf.mxu0 }
0x109f   :  { %v1175_v17 = vsub.f32 %v1161_v1, %v3792_v57  ;;  %v3839_v1 = vld [vmem:[%s4234_s4 + $0x8] sm:$0xff] }
0x10a0   :  { %1065 = vmatpush.msra.mxu2 %v3839_v1 }
0x10a1   :  { %v1183_v20 = vmul.f32 1.442695, %v1175_v17 }
0x10a2   :  { %1066 = vmatpush.msra.mxu2 %v3845_v47 }
0x10a6   :  { %v1164_v58 = vpop.f32.mrf.mxu0 }
0x10a7   :  { %v1176_v60 = vsub.f32 %v1164_v58, %v3792_v57 }
0x10a9   :  { %v1185_v43 = vmul.f32 1.442695, %v1176_v60 }
0x10ab   :  { %3138 = vpow2.f32 %v1185_v43 }
0x10ac   :  { %3140 = vpow2.f32 %v1179_v53 }
0x10ae   :  { %v1167_v62 = vpop.f32.mrf.mxu0 }
0x10af   :  { %v1177_v3 = vsub.f32 %v1167_v62, %v3792_v57 }
0x10b1   :  { %v3797_v46 = vpop.eup %3138  ;;  %v1187_v4 = vmul.f32 1.442695, %v1177_v3 }
0x10b2   :  { %1208 = vperm.xlu0 %3027, %v3797_v46   ;;  %v3802_v13 = vpop.eup %3140 }
0x10b3   :  { %3142 = vpow2.f32 %v1187_v4 }
0x10b4   :  { %3144 = vpow2.f32 %v1181_v45  ;;  %v986_v45 = vshrl.u32 %v55_v11, 7 }
0x10b6   :  { %v1170_v7 = vpop.f32.mrf.mxu0 }
0x10b7   :  { %v1178_v8 = vsub.f32 %v1170_v7, %v3792_v57  ;;  %v987_v7 = vand.u32 7, %v3490_v12 }
0x10b9   :  { %v3143_v15 = vpop.eup %3142  ;;  %v1189_v30 = vmul.f32 1.442695, %v1178_v8  ;;  %vm988_vm3 = vcmp.eq.s32.totalorder %v987_v7, %v986_v45  ;;  %v3914_v45 = vld [vmem:[%s4234_s4 + $0x40] sm:$0xff]  ;;  %v3919_v7 = vld [vmem:[%s4234_s4 + $0x38] sm:$0xff] }
0x10ba   :  { %1193 = vperm.xlu0 %3027, %v3802_v13   ;;  %1213 = vperm.xlu2 %3029, %v3143_v15   ;;  %v3806_v21 = vpop.eup %3144 }
0x10bb   :  { %3146 = vpow2.f32 %v1189_v30 }
0x10bc   :  { %3148 = vpow2.f32 %v1183_v20 }
0x10c1   :  { %v3147_v23 = vpop.eup %3146 }
0x10c2   :  { %1198 = vperm.xlu2 %3029, %v3806_v21   ;;  %1218 = vperm.xlu1 %3028, %v3147_v23   ;;  %v3149_v24 = vpop.eup %3148 }
0x10ca   :  { %1203 = vperm.xlu1 %3028, %v3149_v24  }
0x1114   :  { %v1214_v26 = vpop.permute.xlu2 %1213 }
0x1115   :  { %v1225_v37 = vmul.f32 %v1214_v26, %v3670_v61 }
0x111c   :  { %v1199_v28 = vpop.permute.xlu2 %1198 }
0x111d   :  { %v1222_v32 = vmul.f32 %v1199_v28, %v3677_v0 }
0x1124   :  { %v1209_v27 = vpop.permute.xlu0 %1208 }
0x1125   :  { %v1224_v51 = vmul.f32 %v1209_v27, %v3642_v19 }
0x112c   :  { %v1194_v31 = vpop.permute.xlu0 %1193 }
0x112d   :  { %v1221_v33 = vmul.f32 %v1194_v31, %v3717_v6 }
0x112f   :  { %v3040_v35 = vpack.i.bf16 %v1221_v33, %v1222_v32  ;;  %v1003_v33 = vld [vmem:[%s4232_s2 + $0x18] sm:$0xff] }
0x1131   :  { %3041 = vrot.lane.b32.xlu0 %v3040_v35, %s3407_s30 }
0x1134   :  { %v1219_v36 = vpop.permute.xlu1 %1218 }
0x1135   :  { %v1226_v40 = vmul.f32 %v1219_v36, %v3707_v52 }
0x1137   :  { %v3030_v49 = vpack.i.bf16 %v1225_v37, %v1226_v40  ;;  %v3890_v37 = vld [vmem:[%s4234_s4 + $0x72] ss:$0 sm:$0xff]  ;;  %v1369_v40 = vpop.f32.mrf.mxu3 }
0x1139   :  { %1009 = vperm.xlu0 %3027, %v1001_v44   ;;  %3031 = vrot.lane.b32.xlu1 %v3030_v49, %s3407_s30  ;;  %v1370_v44 = vadd.f32 %v3890_v37, %v1369_v40 }
0x113c   :  { %v1204_v48 = vpop.permute.xlu1 %1203 }
0x113d   :  { %v1223_v50 = vmul.f32 %v1204_v48, %v3649_v59  ;;  %v3902_v48 = vld [vmem:[%s4234_s4 + $0x30] sm:$0xff] }
0x113e   :  { %1344 = vmatpush.msrb.mxu2 %v3902_v48 }
0x113f   :  { %v3035_v54 = vpack.i.bf16 %v1223_v50, %v1224_v51 }
0x1141   :  { %1018 = vperm.xlu0 %3027, %v1004_v55   ;;  %1006 = vperm.xlu1 %3028, %v1000_v56  }
0x1142   :  { %3036 = vrot.lane.b32.xlu2 %v3035_v54, %s3407_s30 }
0x1149   :  { %1012 = vperm.xlu1 %3028, %v1002_v63  }
0x119c   :  { %v3037_v58 = vpop.permute.xlu2 %3036 }
0x119d   :  { %v3038_v62 = vunpack.i.l.bf16 %v3037_v58  ;;  %v3039_v4 = vunpack.i.h.bf16 %v3037_v58 }
0x119f   :  { %v1254_v30 = vsel %vm992_vm15, %v3797_v46, %v3038_v62  ;;  %v3863_v46 = vsel %vm988_vm3, 1.0, %v3400_v14 }
0x11a3   :  { %v3042_v53 = vpop.permute.xlu0 %3041 }
0x11a4   :  { %v3043_v8 = vunpack.i.l.bf16 %v3042_v53  ;;  %v3044_v20 = vunpack.i.h.bf16 %v3042_v53 }
0x11a6   :  { %v1252_v11 = vsel %vm992_vm15, %v3806_v21, %v3043_v8  ;;  %v1251_v27 = vsel %vm992_vm15, %v3802_v13, %v3044_v20  ;;  %v3878_v13 = vld [vmem:[%s4234_s4 + $0x68] sm:$0xff]  ;;  %v3934_v8 = vld [vmem:[%s4234_s4 + $0x58] sm:$0xff] }
0x11a7   :  { %1474 = vmatpush.msrb.mxu3 %v3878_v13 }
0x11ab   :  { %v3032_v60 = vpop.permute.xlu1 %3031 }
0x11ac   :  { %v3034_v43 = vunpack.i.h.bf16 %v3032_v60  ;;  %v3033_v39 = vunpack.i.l.bf16 %v3032_v60 }
0x11ae   :  { %v1256_v3 = vsel %vm992_vm15, %v3147_v23, %v3033_v39  ;;  %v1255_v5 = vsel %vm992_vm15, %v3143_v15, %v3034_v43  ;;  %v1253_v23 = vsel %vm992_vm15, %v3149_v24, %v3039_v4  ;;  %v1010_v15 = vpop.permute.xlu0 %1009 }
0x11af   :  { %1271 = vmatpush.msrb.mxu1 %v1256_v3  ;;  %vm1021_vm5 = vcmp.eq.s32.totalorder %v3490_v12, %v1010_v15 }
0x11b0   :  { %v2916_v24 = vsel %vm1021_vm5, 1.0, %v3400_v14 }
0x11b1   :  { %1272 = vmatpush.msrb.mxu1 %v1255_v5 }
0x11b3   :  { %v1007_v17 = vpop.permute.xlu1 %1006  ;;  %1273 = vmatpush.msrb.mxu1 %v1254_v30 }
0x11b4   :  { %vm1020_vm2 = vcmp.eq.s32.totalorder %v3490_v12, %v1007_v17 }
0x11b5   :  { %v2915_v26 = vsel %vm1020_vm2, 1.0, %v3400_v14  ;;  %1274 = vmatpush.msrb.mxu1 %v1253_v23  ;;  %v3944_v23 = vld [vmem:[%s4234_s4 + $0x71] ss:$0 sm:$0xff] }
0x11b6   :  { %2920 = vmatmul.msk.f32.vlgmr.msra.gmra.mxu2 %vm1035_vm0, %v2915_v26 }
0x11b7   :  { %1275 = vmatpush.msrb.mxu1 %v1252_v11 }
0x11b9   :  { %1276 = vmatpush.msrb.mxu1 %v1251_v27 }
0x11ba   :  { %2932 = vmatmul.msk.f32.vlgmr.msrb.gmra.mxu1 %vm1257_vm4, %v3863_v46 }
0x11bb   :  { %v1013_v21 = vpop.permute.xlu1 %1012  ;;  %1320 = vmatpush.msra.mxu1 %v3914_v45 }
0x11bc   :  { %vm1022_vm6 = vcmp.eq.s32.totalorder %v3490_v12, %v1013_v21 }
0x11bd   :  { %v2917_v28 = vsel %vm1022_vm6, 1.0, %v3400_v14  ;;  %1321 = vmatpush.msra.mxu1 %v3919_v7 }
0x11be   :  { %2921 = vmatmul.msk.f32.gmra.mxu2 %vm1035_vm0, %v2916_v24 }
0x11c6   :  { %2922 = vmatmul.msk.f32.gmra.mxu2 %vm1035_vm0, %v2917_v28 }
0x1237   :  { %v1278_v31 = vpop.f32.mrf.mxu1 }
0x1238   :  { %1283 = vperm.xlu2 %3029, %v1278_v31  }
0x1239   :  { %v1068_v32 = vpop.f32.mrf.mxu2 }
0x123a   :  { %1083 = vst.msk [vmem:[#allocation2] sm:$0xff] %vm152_vm8, %v1068_v32 }
0x1240   :  { %1015 = vperm.xlu2 %3029, %v1003_v33  }
0x1241   :  { %v3885_v35 = vpop.f32.mrf.mxu2  ;;  %v1084_v36 = vld [vmem:[#allocation2] sm:$0xff] }
0x1242   :  { %2939 = vmatmul.msk.f32.vlgmr.msrb.gmra.mxu3 %vm152_vm8, %v1084_v36 }
0x1248   :  { %1393 = vrot.lane.b32.xlu2 %v1370_v44, %s3401_s29 }
0x1249   :  { %v3895_v49 = vpop.f32.mrf.mxu2 }
0x1250   :  { %1409 = vrot.lane.b32.xlu2 %v3749_v9, %s3405_s11  ;;  %v1019_v9 = vpop.permute.xlu0 %1018 }
0x1251   :  { %vm1024_vm11 = vcmp.eq.s32.totalorder %v3490_v12, %v1019_v9 }
0x1252   :  { %v2919_v4 = vsel %vm1024_vm11, 1.0, %v3400_v14 }
0x1292   :  { %v1284_v51 = vpop.permute.xlu2 %1283 }
0x1293   :  { %3150 = vrcp.f32 %v1284_v51  ;;  %v1297_v58 = vand.u32 2147483648, %v1284_v51  ;;  %v1295_v43 = vand.u32 2147483647, %v1284_v51  ;;  %vm1291_vm10 = vweird.f32 %v1284_v51 }
0x1295   :  { %v1298_v53 = vor.u32 1.1754944e-38, %v1297_v58  ;;  %vm1296_vm13 = vcmp.eq.f32.partialorder %v1295_v43, 8.507059e+37 }
0x1299   :  { %v3151_v50 = vpop.eup %3150 }
0x129a   :  { %v1287_v55 = vmul.f32 %v3151_v50, %v1284_v51  ;;  %v1016_v56 = vpop.permute.xlu2 %1015  ;;  %vm1292_vm9 = vweird.f32 %v3151_v50 }
0x129b   :  { %vm1023_vm7 = vcmp.eq.s32.totalorder %v3490_v12, %v1016_v56  ;;  %vm1293_vm12 = vmor %vm1291_vm10, %vm1292_vm9 }
0x129c   :  { %v1288_v54 = vsub.f32 1.0, %v1287_v55  ;;  %v2918_v63 = vsel %vm1023_vm7, 1.0, %v3400_v14  ;;  %v3928_v14 = vld [vmem:[%s4234_s4 + $0x60] sm:$0xff] }
0x129d   :  { %2923 = vmatmul.msk.f32.gmra.mxu2 %vm1035_vm0, %v2918_v63  ;;  %1428 = vmatpush.msrb.mxu1 %v3928_v14 }
0x129e   :  { %v1289_v60 = vmul.f32 %v3151_v50, %v1288_v54 }
0x129f   :  { %1429 = vmatpush.msrb.mxu1 %v3934_v8 }
0x12a0   :  { %v1290_v39 = vadd.f32 %v3151_v50, %v1289_v60 }
0x12a2   :  { %v1294_v62 = vsel %vm1293_vm12, %v3151_v50, %v1290_v39  ;;  %v1394_v63 = vpop.permute.xlu2 %1393  ;;  %v3952_v39 = vld [vmem:[%s4234_s4 + $0x50] sm:$0xff] }
0x12a3   :  { %v1299_v3 = vsel %vm1296_vm13, %v1298_v53, %v1294_v62  ;;  %1454 = vmatpush.msra.mxu2 %v3952_v39 }
0x12a4   :  { %v1300_v5 = vmul.f32 %v1299_v3, %v1278_v31 }
0x12a5   :  { %2924 = vmatmul.msk.f32.gmra.mxu2 %vm1035_vm0, %v2919_v4 }
0x12a6   :  { %1302 = vrot.lane.b32.xlu1 %v1300_v5, %s3408_s14 }
0x12aa   :  { %v1410_v62 = vpop.permute.xlu2 %1409 }
0x12ad   :  { %2934 = vmatmul.msk.f32.vlgmr.msrb.gmra.mxu2 %vm152_vm8, %v1084_v36 }
0x1318   :  { %v1303_v30 = vpop.permute.xlu1 %1302 }
0x1319   :  { %2933 = vmatmul.msk.f32.vlgmr.msra.gmra.mxu1 %vm207_vm1, %v1303_v30 }
0x1320   :  { %v3938_v17 = vpop.f32.mrf.mxu2 }
0x1321   :  { %2937 = vmatmul.msk.f32.vlgmr.msrb.gmra.mxu1 %vm207_vm1, %v1303_v30 }
0x1328   :  { %v1080_v20 = vpop.f32.mrf.mxu2 }
0x1330   :  { %v1346_v26 = vpop.f32.mrf.mxu2 }
0x1396   :  { %v1323_v11 = vpop.f32.mrf.mxu1 }
0x1397   :  { %v1347_v15 = vadd.f32 %v1346_v26, %v1323_v11 }
0x1399   :  { %v1350_v27 = vadd.f32 %v3944_v23, %v1347_v15 }
0x139b   :  { %v1372_v24 = vadd.f32 %v1370_v44, %v1350_v27 }
0x139d   :  { %v2936_v21 = vmul.f32 -1.442695, %v1372_v24  ;;  %v1476_v24 = vpop.f32.mrf.mxu3 }
0x139e   :  { %v1431_v26 = vpop.f32.mrf.mxu1 }
0x139f   :  { %3152 = vpow2.f32 %v2936_v21 }
0x13a5   :  { %v3153_v28 = vpop.eup %3152 }
0x13a6   :  { %v1376_v31 = vadd.f32 1.0, %v3153_v28 }
0x13a8   :  { %3154 = vrcp.f32 %v1376_v31  ;;  %v1388_v40 = vand.u32 2147483648, %v1376_v31  ;;  %v1386_v50 = vand.u32 2147483647, %v1376_v31  ;;  %vm1382_vm2 = vweird.f32 %v1376_v31 }
0x13aa   :  { %v1389_v56 = vor.u32 1.1754944e-38, %v1388_v40  ;;  %vm1387_vm5 = vcmp.eq.f32.partialorder %v1386_v50, 8.507059e+37 }
0x13ae   :  { %v3155_v32 = vpop.eup %3154 }
0x13af   :  { %v1378_v33 = vmul.f32 %v3155_v32, %v1376_v31  ;;  %vm1383_vm14 = vweird.f32 %v3155_v32 }
0x13b0   :  { %vm1384_vm3 = vmor %vm1382_vm2, %vm1383_vm14 }
0x13b1   :  { %v1379_v36 = vsub.f32 1.0, %v1378_v33 }
0x13b3   :  { %v1380_v51 = vmul.f32 %v3155_v32, %v1379_v36 }
0x13b5   :  { %v1381_v55 = vadd.f32 %v3155_v32, %v1380_v51 }
0x13b7   :  { %v1385_v54 = vsel %vm1384_vm3, %v3155_v32, %v1381_v55 }
0x13b8   :  { %v1390_v44 = vsel %vm1387_vm5, %v1389_v56, %v1385_v54 }
0x13b9   :  { %v1396_v58 = vmul.f32 %v1394_v63, %v1390_v44  ;;  %v1403_v53 = vsub.f32 1.0, %v1390_v44  ;;  %v1412_v5 = vmul.f32 %v1410_v62, %v1390_v44 }
0x13bb   :  { %1398 = vrot.lane.b32.xlu0 %v1396_v58, %s3402_s0 }
0x142d   :  { %v1399_v9 = vpop.permute.xlu0 %1398 }
0x142e   :  { %v1401_v60 = vadd.f32 %v1399_v9, %v1350_v27  ;;  %v3966_v27 = vld [vmem:[%s4234_s4 + $0x73] ss:$0 sm:$0xff] }
0x1430   :  { %3156 = vtanh.f32 %v1401_v60 }
0x1436   :  { %v3157_v43 = vpop.eup %3156 }
0x1437   :  { %1405 = vrot.lane.b32.xlu1 %v3157_v43, %s3403_s9 }
0x14a9   :  { %v1406_v3 = vpop.permute.xlu1 %1405 }
0x14aa   :  { %v1408_v4 = vmul.f32 %v1406_v3, %v1403_v53 }
0x14ac   :  { %v3955_v30 = vadd.f32 %v1412_v5, %v1408_v4 }
0x14ae   :  { %1435 = vrot.lane.b32.xlu0 %v3955_v30, %s3403_s9 }
0x1520   :  { %v3959_v20 = vpop.permute.xlu0 %1435 }
0x1521   :  { %2938 = vmatmul.msk.f32.vlgmr.msra.gmra.mxu2 %vm152_vm8, %v3959_v20 }
0x15a4   :  { %v1456_v11 = vpop.f32.mrf.mxu2 }
0x15a5   :  { %v1457_v15 = vadd.f32 %v1456_v11, %v1431_v26 }
0x15a7   :  { %v1479_v21 = vadd.f32 %v1476_v24, %v1457_v15  ;;  %1488 = sbr.rel (%p2941_p0) target bundleno = 5549 (0x15ad), region = 29 }
0x15a9   :  { %v1481_v28 = vadd.f32 %v3966_v27, %v1479_v21 }
0x15ab   :  { %1483 = vst.msk [vmem:[#allocation6 + $0x8] sm:$0xff] %vm1035_vm0, %v1481_v28 }
0x15ac   :  { %1489 = vst.msk [vmem:[#allocation2] sm:$0xff] %vm152_vm8, %v3885_v35 }
0x15ad PF:  { %s2942_s25 = sld [smem:[#allocation3 + $0x1]] }
0x15b3   :  { %p2943_p1 = scmp.ne.s32.totalorder %s2942_s25, 0 }
0x15b5   :  { %1494 = sbr.rel (%p2943_p1) target bundleno = 6053 (0x17a5), region = 33 }
0x15ba   :  { %v1495_v31 = vsel %vm1035_vm0, %v1481_v28, -inf  ;;  %1534 = vmatpush.msra.mxu0 %v3833_v18  ;;  %v3409_v60 = vmov 0.0  }
0x15bb   :  { %1496 = vmax.xlane.f32.xlu0 %v1495_v31 }
0x15bc   :  { %1535 = vmatpush.msra.mxu0 %v3839_v1 }
0x15be   :  { %1536 = vmatpush.msra.mxu0 %v3845_v47 }
0x162e   :  { %v1497_v32 = vpop.xlane.xlu0 %1496 }
0x162f   :  { %vm1498_vm6 = vcmp.eq.f32.partialorder %v1481_v28, %v1497_v32 }
0x1630   :  { %v1499_v33 = vsel %vm1498_vm6, %v3490_v12, 24 }
0x1631   :  { %v1500_v36 = vsel %vm1035_vm0, %v1499_v33, 2147483647 }
0x1632   :  { %v1502_v35 = vshra.s32 %v1500_v36, 16  ;;  %v1501_v51 = vand.u32 65535, %v1500_v36 }
0x1634   :  { %v1504_v40 = vcvt.s32.f32 %v1502_v35  ;;  %v1503_v55 = vcvt.s32.f32 %v1501_v51 }
0x1636   :  { %1505 = vmin.xlane.f32.xlu0 %v1504_v40 }
0x16a9   :  { %v1506_v50 = vpop.xlane.xlu0 %1505 }
0x16aa   :  { %vm1507_vm7 = vcmp.eq.f32.partialorder %v1504_v40, %v1506_v50  ;;  %v1512_v54 = vcvt.f32.s32 %v1506_v50 }
0x16ab   :  { %v1508_v56 = vsel %vm1507_vm7, %v1503_v55, inf }
0x16ac   :  { %1509 = vmin.xlane.f32.xlu1 %v1508_v56  ;;  %v1513_v44 = vshll.u32 %v1512_v54, 16 }
0x171f   :  { %v1510_v63 = vpop.xlane.xlu1 %1509 }
0x1720   :  { %v1511_v58 = vcvt.f32.s32 %v1510_v63 }
0x1722   :  { %v1514_v9 = vadd.s32 %v1513_v44, %v1511_v58 }
0x1724   :  { %vm1515_vm9 = vcmp.eq.s32.totalorder %v3490_v12, %v1514_v9 }
0x1725   :  { %v2944_v43 = vsel %vm1515_vm9, 1.0, %v3409_v60 }
0x1726   :  { %2945 = vmatmul.msk.f32.vlgmr.msra.gmra.mxu0 %vm1035_vm0, %v2944_v43 }
0x17a3   :  { %v1538_v53 = vpop.f32.mrf.mxu0 }
0x17a4   :  { %1541 = vst.msk [vmem:[#allocation2] sm:$0xff] %vm152_vm8, %v1538_v53 }
0x17a5 PF:  { %1558 = vmatpush.msra.mxu2 %v3729_v42  ;;  %1608 = vmatpush.msra.mxu0 %v3754_v10  ;;  %s2961_s4 = sld [smem:[#allocation3 + $0x2]] }
0x17a6   :  { %2946 = vmatmul.msk.f32.vlgmr.msra.gmra.mxu2 %vm152_vm8, %v3959_v20  ;;  %3006 = vmatpush.msra.mxu1 %v3754_v10 }
0x17a7   :  { %3160 = vset.pattern.permute.xlu2 %v3399_v2  ;;  %3159 = vset.pattern.permute.xlu1 %v3399_v2 }
0x17a8   :  { %3158 = vset.pattern.permute.xlu0 %v3399_v2  ;;  %1795 = vmatpush.msrb.mxu0 %v3902_v48 }
0x17a9   :  { %1771 = vmatpush.msra.mxu3 %v3914_v45 }
0x17ab   :  { %1772 = vmatpush.msra.mxu3 %v3919_v7  ;;  %p2962_p2 = scmp.ne.s32.totalorder %s2961_s4, 1 }
0x17ad   :  { %1816 = vmatpush.msrb.mxu3 %v3743_v41 }
0x1829   :  { %v1560_v62 = vpop.f32.mrf.mxu2 }
0x182a   :  { %v1563_v3 = vadd.f32 %v1560_v62, %v3766_v16  ;;  %v1565_v4 = vadd.f32 %v1560_v62, %v3773_v25  ;;  %v1564_v5 = vadd.f32 %v1560_v62, %v3769_v22  ;;  %v1566_v26 = vadd.f32 %v1560_v62, %v3777_v29 }
0x182b   :  { %v1567_v24 = vadd.f32 %v1560_v62, %v3781_v34  ;;  %v1568_v31 = vadd.f32 %v1560_v62, %v3785_v38 }
0x182c   :  { %3176 = vtanh.f32 %v1563_v3 }
0x182d   :  { %3178 = vtanh.f32 %v1565_v4 }
0x182e   :  { %3180 = vtanh.f32 %v1564_v5 }
0x182f   :  { %3182 = vtanh.f32 %v1566_v26 }
0x1830   :  { %3184 = vtanh.f32 %v1567_v24 }
0x1831   :  { %3186 = vtanh.f32 %v1568_v31 }
0x1832   :  { %v3177_v11 = vpop.eup %3176 }
0x1833   :  { %v3179_v15 = vpop.eup %3178  ;;  %2947 = vmatmul.msk.f32.vlgmr.msra.gmra.mxu0 %vm152_vm8, %v3177_v11 }
0x1834   :  { %2949 = vmatmul.msk.f32.vlgmr.msra.gmra.mxu1 %vm152_vm8, %v3179_v15  ;;  %1874 = vmatpush.msra.mxu0 %v3928_v14  ;;  %v3181_v21 = vpop.eup %3180 }
0x1835   :  { %v3183_v28 = vpop.eup %3182 }
0x1836   :  { %1875 = vmatpush.msra.mxu0 %v3934_v8  ;;  %v3185_v32 = vpop.eup %3184 }
0x1837   :  { %v3187_v33 = vpop.eup %3186 }
0x183b   :  { %2948 = vmatmul.msk.f32.gmra.mxu0 %vm152_vm8, %v3181_v21 }
0x183c   :  { %2950 = vmatmul.msk.f32.gmra.mxu1 %vm152_vm8, %v3183_v28 }
0x1844   :  { %2951 = vmatmul.msk.f32.gmra.mxu1 %vm152_vm8, %v3185_v32 }
0x184c   :  { %2952 = vmatmul.msk.f32.gmra.mxu1 %vm152_vm8, %v3187_v33 }
0x18b0   :  { %v1610_v36 = vpop.f32.mrf.mxu0 }
0x18b1   :  { %v1616_v35 = vpop.f32.mrf.mxu1  ;;  %v1628_v63 = vsub.f32 %v1610_v36, %v3792_v57 }
0x18b2   :  { %v1630_v44 = vsub.f32 %v1616_v35, %v3792_v57 }
0x18b3   :  { %v1634_v58 = vmul.f32 1.442695, %v1628_v63 }
0x18b4   :  { %v1638_v60 = vmul.f32 1.442695, %v1630_v44 }
0x18b8   :  { %v1613_v40 = vpop.f32.mrf.mxu0 }
0x18b9   :  { %v1629_v51 = vsub.f32 %v1613_v40, %v3792_v57  ;;  %v1619_v50 = vpop.f32.mrf.mxu1 }
0x18ba   :  { %v1631_v55 = vsub.f32 %v1619_v50, %v3792_v57 }
0x18bb   :  { %v1636_v56 = vmul.f32 1.442695, %v1629_v51 }
0x18bc   :  { %v1640_v54 = vmul.f32 1.442695, %v1631_v55 }
0x18bd   :  { %3188 = vpow2.f32 %v1636_v56 }
0x18be   :  { %3190 = vpow2.f32 %v1640_v54 }
0x18bf   :  { %3192 = vpow2.f32 %v1634_v58 }
0x18c0   :  { %3194 = vpow2.f32 %v1638_v60 }
0x18c1   :  { %v1622_v9 = vpop.f32.mrf.mxu1 }
0x18c2   :  { %v1632_v11 = vsub.f32 %v1622_v9, %v3792_v57 }
0x18c3   :  { %v3189_v43 = vpop.eup %3188 }
0x18c4   :  { %v3191_v53 = vpop.eup %3190  ;;  %1653 = vperm.xlu2 %3160, %v3189_v43   ;;  %v1642_v15 = vmul.f32 1.442695, %v1632_v11 }
0x18c5   :  { %1663 = vperm.xlu1 %3159, %v3191_v53   ;;  %v3193_v4 = vpop.eup %3192 }
0x18c6   :  { %v3195_v5 = vpop.eup %3194 }
0x18c9   :  { %v1625_v62 = vpop.f32.mrf.mxu1 }
0x18ca   :  { %v1633_v3 = vsub.f32 %v1625_v62, %v3792_v57 }
0x18cc   :  { %v1644_v26 = vmul.f32 1.442695, %v1633_v3  ;;  %1648 = vperm.xlu2 %3160, %v3193_v4  }
0x18cd   :  { %1658 = vperm.xlu1 %3159, %v3195_v5  }
0x18ce   :  { %3196 = vpow2.f32 %v1644_v26 }
0x18cf   :  { %3198 = vpow2.f32 %v1642_v15 }
0x18d4   :  { %v3197_v24 = vpop.eup %3196 }
0x18d5   :  { %1673 = vperm.xlu0 %3158, %v3197_v24   ;;  %v3199_v21 = vpop.eup %3198 }
0x18dd   :  { %1668 = vperm.xlu0 %3158, %v3199_v21  }
0x191e   :  { %v1654_v28 = vpop.permute.xlu2 %1653 }
0x191f   :  { %v1677_v32 = vmul.f32 %v1654_v28, %v3677_v0 }
0x1926   :  { %v1649_v31 = vpop.permute.xlu2 %1648 }
0x1927   :  { %v1676_v33 = vmul.f32 %v1649_v31, %v3717_v6 }
0x1929   :  { %v3171_v36 = vpack.i.bf16 %v1676_v33, %v1677_v32 }
0x192b   :  { %3172 = vrot.lane.b32.xlu2 %v3171_v36, %s3407_s30 }
0x1937   :  { %v1664_v35 = vpop.permute.xlu1 %1663 }
0x1938   :  { %v1679_v51 = vmul.f32 %v1664_v35, %v3642_v19 }
0x193f   :  { %v1659_v40 = vpop.permute.xlu1 %1658 }
0x1940   :  { %v1678_v50 = vmul.f32 %v1659_v40, %v3649_v59 }
0x1942   :  { %v3166_v55 = vpack.i.bf16 %v1678_v50, %v1679_v51 }
0x1944   :  { %3167 = vrot.lane.b32.xlu1 %v3166_v55, %s3407_s30 }
0x1947   :  { %v1674_v56 = vpop.permute.xlu0 %1673 }
0x1948   :  { %v1681_v63 = vmul.f32 %v1674_v56, %v3707_v52 }
0x194f   :  { %v1669_v54 = vpop.permute.xlu0 %1668 }
0x1950   :  { %v1680_v44 = vmul.f32 %v1669_v54, %v3670_v61 }
0x1952   :  { %v3161_v58 = vpack.i.bf16 %v1680_v44, %v1681_v63 }
0x1954   :  { %3162 = vrot.lane.b32.xlu0 %v3161_v58, %s3407_s30 }
0x1985   :  { %v3173_v15 = vpop.permute.xlu2 %3172 }
0x1986   :  { %v3174_v32 = vunpack.i.l.bf16 %v3173_v15  ;;  %v3175_v36 = vunpack.i.h.bf16 %v3173_v15 }
0x1988   :  { %v1707_v40 = vsel %vm992_vm15, %v3189_v43, %v3174_v32  ;;  %v1706_v51 = vsel %vm992_vm15, %v3193_v4, %v3175_v36 }
0x19b6   :  { %v3168_v9 = vpop.permute.xlu1 %3167 }
0x19b7   :  { %v3169_v26 = vunpack.i.l.bf16 %v3168_v9  ;;  %v3170_v28 = vunpack.i.h.bf16 %v3168_v9 }
0x19b9   :  { %v1709_v33 = vsel %vm992_vm15, %v3191_v53, %v3169_v26  ;;  %v1708_v35 = vsel %vm992_vm15, %v3195_v5, %v3170_v28 }
0x19c6   :  { %v3163_v60 = vpop.permute.xlu0 %3162 }
0x19c7   :  { %v3165_v62 = vunpack.i.h.bf16 %v3163_v60  ;;  %v3164_v3 = vunpack.i.l.bf16 %v3163_v60 }
0x19c9   :  { %v1711_v11 = vsel %vm992_vm15, %v3197_v24, %v3164_v3  ;;  %v1710_v31 = vsel %vm992_vm15, %v3199_v21, %v3165_v62  ;;  %v1542_v21 = vld [vmem:[#allocation2] sm:$0xff] }
0x19ca   :  { %1722 = vmatpush.msrb.mxu2 %v1711_v11  ;;  %2955 = vmatmul.msk.f32.vlgmr.msrb.gmra.mxu0 %vm152_vm8, %v1542_v21 }
0x19cc   :  { %1723 = vmatpush.msrb.mxu2 %v1710_v31 }
0x19ce   :  { %1724 = vmatpush.msrb.mxu2 %v1709_v33 }
0x19d0   :  { %1725 = vmatpush.msrb.mxu2 %v1708_v35 }
0x19d2   :  { %1726 = vmatpush.msrb.mxu2 %v1707_v40 }
0x19d4   :  { %1727 = vmatpush.msrb.mxu2 %v1706_v51 }
0x19d5   :  { %2953 = vmatmul.msk.f32.vlgmr.msrb.gmra.mxu2 %vm1257_vm4, %v3863_v46 }
0x19d6   :  { %1900 = vmatpush.msra.mxu2 %v3952_v39 }
0x1a47   :  { %v1797_v11 = vpop.f32.mrf.mxu0 }
0x1a58   :  { %v1729_v24 = vpop.f32.mrf.mxu2 }
0x1a59   :  { %1734 = vperm.xlu0 %3158, %v1729_v24  }
0x1acb   :  { %v1735_v53 = vpop.permute.xlu0 %1734 }
0x1acc   :  { %3200 = vrcp.f32 %v1735_v53  ;;  %v1748_v43 = vand.u32 2147483648, %v1735_v53  ;;  %v1746_v4 = vand.u32 2147483647, %v1735_v53  ;;  %vm1742_vm11 = vweird.f32 %v1735_v53 }
0x1ace   :  { %v1749_v63 = vor.u32 1.1754944e-38, %v1748_v43  ;;  %vm1747_vm13 = vcmp.eq.f32.partialorder %v1746_v4, 8.507059e+37 }
0x1ad2   :  { %v3201_v5 = vpop.eup %3200 }
0x1ad3   :  { %v1738_v50 = vmul.f32 %v3201_v5, %v1735_v53  ;;  %vm1743_vm10 = vweird.f32 %v3201_v5 }
0x1ad4   :  { %vm1744_vm12 = vmor %vm1742_vm11, %vm1743_vm10 }
0x1ad5   :  { %v1739_v55 = vsub.f32 1.0, %v1738_v50 }
0x1ad7   :  { %v1740_v56 = vmul.f32 %v3201_v5, %v1739_v55 }
0x1ad9   :  { %v1741_v54 = vadd.f32 %v3201_v5, %v1740_v56 }
0x1adb   :  { %v1745_v44 = vsel %vm1744_vm12, %v3201_v5, %v1741_v54 }
0x1adc   :  { %v1750_v58 = vsel %vm1747_vm13, %v1749_v63, %v1745_v44 }
0x1add   :  { %v1751_v9 = vmul.f32 %v1750_v58, %v1729_v24 }
0x1adf   :  { %1753 = vrot.lane.b32.xlu1 %v1751_v9, %s3408_s14 }
0x1b51   :  { %v1754_v60 = vpop.permute.xlu1 %1753 }
0x1b52   :  { %2954 = vmatmul.msk.f32.vlgmr.msra.gmra.mxu3 %vm207_vm1, %v1754_v60  ;;  %2958 = vmatmul.msk.f32.vlgmr.msra.gmra.mxu0 %vm207_vm1, %v1754_v60 }
0x1b53   :  { %1920 = vmatpush.msra.mxu3 %v3878_v13 }
0x1b5a   :  { %2956 = vmatmul.msk.f32.vlgmr.msrb.gmra.mxu3 %vm152_vm8, %v3959_v20 }
0x1b62   :  { %2960 = vmatmul.msk.f32.vlgmr.msra.gmra.mxu3 %vm152_vm8, %v1542_v21 }
0x1bd5   :  { %v1774_v62 = vpop.f32.mrf.mxu3 }
0x1bd6   :  { %v1798_v15 = vadd.f32 %v1797_v11, %v1774_v62 }
0x1bd8   :  { %v1800_v28 = vadd.f32 %v3944_v23, %v1798_v15 }
0x1bdd   :  { %v1818_v3 = vpop.f32.mrf.mxu3 }
0x1bde   :  { %v1819_v26 = vadd.f32 %v3890_v37, %v1818_v3 }
0x1be0   :  { %1842 = vrot.lane.b32.xlu2 %v1819_v26, %s3401_s29  ;;  %v1821_v31 = vadd.f32 %v1819_v26, %v1800_v28  ;;  %v1877_v26 = vpop.f32.mrf.mxu0 }
0x1be2   :  { %v2957_v32 = vmul.f32 -1.442695, %v1821_v31 }
0x1be4   :  { %3202 = vpow2.f32 %v2957_v32 }
0x1be5   :  { %v1922_v15 = vpop.f32.mrf.mxu3 }
0x1bea   :  { %v3203_v33 = vpop.eup %3202 }
0x1beb   :  { %v1825_v36 = vadd.f32 1.0, %v3203_v33 }
0x1bed   :  { %3204 = vrcp.f32 %v1825_v36  ;;  %v1837_v21 = vand.u32 2147483648, %v1825_v36  ;;  %vm1831_vm2 = vweird.f32 %v1825_v36  ;;  %v1835_v53 = vand.u32 2147483647, %v1825_v36 }
0x1bef   :  { %v1838_v50 = vor.u32 1.1754944e-38, %v1837_v21  ;;  %vm1836_vm5 = vcmp.eq.f32.partialorder %v1835_v53, 8.507059e+37 }
0x1bf3   :  { %v3205_v35 = vpop.eup %3204 }
0x1bf4   :  { %v1827_v20 = vmul.f32 %v3205_v35, %v1825_v36  ;;  %vm1832_vm14 = vweird.f32 %v3205_v35 }
0x1bf5   :  { %vm1833_vm3 = vmor %vm1831_vm2, %vm1832_vm14 }
0x1bf6   :  { %v1828_v40 = vsub.f32 1.0, %v1827_v20 }
0x1bf8   :  { %v1829_v51 = vmul.f32 %v3205_v35, %v1828_v40 }
0x1bfa   :  { %v1830_v24 = vadd.f32 %v3205_v35, %v1829_v51 }
0x1bfc   :  { %v1834_v5 = vsel %vm1833_vm3, %v3205_v35, %v1830_v24 }
0x1bfd   :  { %v1839_v43 = vsel %vm1836_vm5, %v1838_v50, %v1834_v5 }
0x1bfe   :  { %v1852_v44 = vsub.f32 1.0, %v1839_v43  ;;  %v1858_v60 = vmul.f32 %v1839_v43, %v3955_v30 }
0x1c3a   :  { %v1843_v55 = vpop.permute.xlu2 %1842 }
0x1c3b   :  { %v1845_v56 = vmul.f32 %v1843_v55, %v1839_v43 }
0x1c3d   :  { %1847 = vrot.lane.b32.xlu0 %v1845_v56, %s3402_s0 }
0x1caf   :  { %v1848_v4 = vpop.permute.xlu0 %1847 }
0x1cb0   :  { %v1850_v54 = vadd.f32 %v1848_v4, %v1800_v28 }
0x1cb2   :  { %3206 = vtanh.f32 %v1850_v54 }
0x1cb8   :  { %v3207_v63 = vpop.eup %3206 }
0x1cb9   :  { %1854 = vrot.lane.b32.xlu1 %v3207_v63, %s3403_s9 }
0x1d2b   :  { %v1855_v58 = vpop.permute.xlu1 %1854 }
0x1d2c   :  { %v1857_v9 = vmul.f32 %v1855_v58, %v1852_v44 }
0x1d2e   :  { %v4045_v62 = vadd.f32 %v1858_v60, %v1857_v9 }
0x1d30   :  { %1881 = vrot.lane.b32.xlu2 %v4045_v62, %s3403_s9 }
0x1d8a   :  { %v4049_v3 = vpop.permute.xlu2 %1881 }
0x1d8b   :  { %2959 = vmatmul.msk.f32.vlgmr.msra.gmra.mxu2 %vm152_vm8, %v4049_v3 }
0x1e0e   :  { %v1902_v11 = vpop.f32.mrf.mxu2 }
0x1e0f   :  { %v1903_v28 = vadd.f32 %v1902_v11, %v1877_v26 }
0x1e11   :  { %v1925_v31 = vadd.f32 %v1922_v15, %v1903_v28  ;;  %1933 = sbr.rel (%p2962_p2) target bundleno = 7703 (0x1e17), region = 37 }
0x1e13   :  { %v1926_v32 = vadd.f32 %v3966_v27, %v1925_v31 }
0x1e15   :  { %1928 = vst.msk [vmem:[#allocation6 + $0x10] sm:$0xff] %vm1035_vm0, %v1926_v32 }
0x1e16   :  { %1934 = vst.msk [vmem:[#allocation2] sm:$0xff] %vm152_vm8, %v3895_v49 }
0x1e17 PF:  { %s2963_s26 = sld [smem:[#allocation3 + $0x2]] }
0x1e1d   :  { %p2964_p3 = scmp.ne.s32.totalorder %s2963_s26, 0 }
0x1e1f   :  { %1939 = sbr.rel (%p2964_p3) target bundleno = 8207 (0x200f), region = 41 }
0x1e24   :  { %v1940_v30 = vsel %vm1035_vm0, %v1926_v32, -inf  ;;  %1979 = vmatpush.msra.mxu0 %v3833_v18  ;;  %v3410_v56 = vmov 0.0  }
0x1e25   :  { %1941 = vmax.xlane.f32.xlu0 %v1940_v30 }
0x1e26   :  { %1980 = vmatpush.msra.mxu0 %v3839_v1 }
0x1e28   :  { %1981 = vmatpush.msra.mxu0 %v3845_v47 }
0x1e98   :  { %v1942_v33 = vpop.xlane.xlu0 %1941 }
0x1e99   :  { %vm1943_vm6 = vcmp.eq.f32.partialorder %v1926_v32, %v1942_v33 }
0x1e9a   :  { %v1944_v36 = vsel %vm1943_vm6, %v3490_v12, 24 }
0x1e9b   :  { %v1945_v35 = vsel %vm1035_vm0, %v1944_v36, 2147483647 }
0x1e9c   :  { %v1947_v49 = vshra.s32 %v1945_v35, 16  ;;  %v1946_v40 = vand.u32 65535, %v1945_v35 }
0x1e9e   :  { %v1949_v20 = vcvt.s32.f32 %v1947_v49  ;;  %v1948_v24 = vcvt.s32.f32 %v1946_v40 }
0x1ea0   :  { %1950 = vmin.xlane.f32.xlu0 %v1949_v20 }
0x1f13   :  { %v1951_v51 = vpop.xlane.xlu0 %1950 }
0x1f14   :  { %vm1952_vm7 = vcmp.eq.f32.partialorder %v1949_v20, %v1951_v51  ;;  %v1957_v53 = vcvt.f32.s32 %v1951_v51 }
0x1f15   :  { %v1953_v21 = vsel %vm1952_vm7, %v1948_v24, inf }
0x1f16   :  { %1954 = vmin.xlane.f32.xlu1 %v1953_v21  ;;  %v1958_v50 = vshll.u32 %v1957_v53, 16 }
0x1f89   :  { %v1955_v5 = vpop.xlane.xlu1 %1954 }
0x1f8a   :  { %v1956_v55 = vcvt.f32.s32 %v1955_v5 }
0x1f8c   :  { %v1959_v43 = vadd.s32 %v1958_v50, %v1956_v55 }
0x1f8e   :  { %vm1960_vm9 = vcmp.eq.s32.totalorder %v3490_v12, %v1959_v43 }
0x1f8f   :  { %v2965_v4 = vsel %vm1960_vm9, 1.0, %v3410_v56 }
0x1f90   :  { %2966 = vmatmul.msk.f32.vlgmr.msra.gmra.mxu0 %vm1035_vm0, %v2965_v4 }
0x200d   :  { %v1983_v54 = vpop.f32.mrf.mxu0 }
0x200e   :  { %1986 = vst.msk [vmem:[#allocation2] sm:$0xff] %vm152_vm8, %v1983_v54 }
0x200f PF:  { %2003 = vmatpush.msra.mxu2 %v3729_v42  ;;  %2053 = vmatpush.msra.mxu0 %v3754_v10  ;;  %s2982_s27 = sld [smem:[#allocation3 + $0x3]] }
0x2010   :  { %2967 = vmatmul.msk.f32.vlgmr.msra.gmra.mxu2 %vm152_vm8, %v4049_v3  ;;  %3007 = vmatpush.msra.mxu1 %v3754_v10 }
0x2011   :  { %3210 = vset.pattern.permute.xlu2 %v3399_v2  ;;  %3209 = vset.pattern.permute.xlu1 %v3399_v2 }
0x2012   :  { %3208 = vset.pattern.permute.xlu0 %v3399_v2  ;;  %2240 = vmatpush.msrb.mxu0 %v3902_v48 }
0x2013   :  { %2216 = vmatpush.msra.mxu3 %v3914_v45 }
0x2015   :  { %2217 = vmatpush.msra.mxu3 %v3919_v7  ;;  %p2983_p4 = scmp.ne.s32.totalorder %s2982_s27, 1 }
0x2017   :  { %2261 = vmatpush.msrb.mxu3 %v3743_v41 }
0x2093   :  { %v2005_v63 = vpop.f32.mrf.mxu2 }
0x2094   :  { %v2008_v44 = vadd.f32 %v2005_v63, %v3766_v16  ;;  %v2010_v58 = vadd.f32 %v2005_v63, %v3773_v25  ;;  %v2009_v9 = vadd.f32 %v2005_v63, %v3769_v22  ;;  %v2011_v60 = vadd.f32 %v2005_v63, %v3777_v29 }
0x2095   :  { %v2012_v15 = vadd.f32 %v2005_v63, %v3781_v34  ;;  %v2013_v32 = vadd.f32 %v2005_v63, %v3785_v38 }
0x2096   :  { %3226 = vtanh.f32 %v2008_v44 }
0x2097   :  { %3228 = vtanh.f32 %v2010_v58 }
0x2098   :  { %3230 = vtanh.f32 %v2009_v9 }
0x2099   :  { %3232 = vtanh.f32 %v2011_v60 }
0x209a   :  { %3234 = vtanh.f32 %v2012_v15 }
0x209b   :  { %3236 = vtanh.f32 %v2013_v32 }
0x209c   :  { %v3227_v26 = vpop.eup %3226 }
0x209d   :  { %v3229_v11 = vpop.eup %3228  ;;  %2968 = vmatmul.msk.f32.vlgmr.msra.gmra.mxu0 %vm152_vm8, %v3227_v26 }
0x209e   :  { %2970 = vmatmul.msk.f32.vlgmr.msra.gmra.mxu1 %vm152_vm8, %v3229_v11  ;;  %2319 = vmatpush.msra.mxu0 %v3928_v14  ;;  %v3231_v28 = vpop.eup %3230 }
0x209f   :  { %v3233_v31 = vpop.eup %3232 }
0x20a0   :  { %2320 = vmatpush.msra.mxu0 %v3934_v8  ;;  %v3235_v30 = vpop.eup %3234 }
0x20a1   :  { %v3237_v33 = vpop.eup %3236 }
0x20a5   :  { %2969 = vmatmul.msk.f32.gmra.mxu0 %vm152_vm8, %v3231_v28 }
0x20a6   :  { %2971 = vmatmul.msk.f32.gmra.mxu1 %vm152_vm8, %v3233_v31 }
0x20ae   :  { %2972 = vmatmul.msk.f32.gmra.mxu1 %vm152_vm8, %v3235_v30 }
0x20b6   :  { %2973 = vmatmul.msk.f32.gmra.mxu1 %vm152_vm8, %v3237_v33 }
0x211a   :  { %v2055_v36 = vpop.f32.mrf.mxu0 }
0x211b   :  { %v2061_v35 = vpop.f32.mrf.mxu1  ;;  %v2073_v53 = vsub.f32 %v2055_v36, %v3792_v57 }
0x211c   :  { %v2075_v5 = vsub.f32 %v2061_v35, %v3792_v57 }
0x211d   :  { %v2079_v50 = vmul.f32 1.442695, %v2073_v53 }
0x211e   :  { %v2083_v43 = vmul.f32 1.442695, %v2075_v5 }
0x2122   :  { %v2058_v49 = vpop.f32.mrf.mxu0 }
0x2123   :  { %v2074_v20 = vsub.f32 %v2058_v49, %v3792_v57  ;;  %v2064_v40 = vpop.f32.mrf.mxu1 }
0x2124   :  { %v2076_v51 = vsub.f32 %v2064_v40, %v3792_v57 }
0x2125   :  { %v2081_v24 = vmul.f32 1.442695, %v2074_v20 }
0x2126   :  { %v2085_v21 = vmul.f32 1.442695, %v2076_v51 }
0x2127   :  { %3238 = vpow2.f32 %v2081_v24 }
0x2128   :  { %3240 = vpow2.f32 %v2085_v21 }
0x2129   :  { %3242 = vpow2.f32 %v2079_v50 }
0x212a   :  { %3244 = vpow2.f32 %v2083_v43 }
0x212b   :  { %v2067_v55 = vpop.f32.mrf.mxu1 }
0x212c   :  { %v2077_v60 = vsub.f32 %v2067_v55, %v3792_v57 }
0x212d   :  { %v3239_v56 = vpop.eup %3238 }
0x212e   :  { %v3241_v4 = vpop.eup %3240  ;;  %2098 = vperm.xlu2 %3210, %v3239_v56   ;;  %v2087_v26 = vmul.f32 1.442695, %v2077_v60 }
0x212f   :  { %2108 = vperm.xlu1 %3209, %v3241_v4   ;;  %v3243_v44 = vpop.eup %3242 }
0x2130   :  { %v3245_v58 = vpop.eup %3244 }
0x2133   :  { %v2070_v54 = vpop.f32.mrf.mxu1 }
0x2134   :  { %v2078_v63 = vsub.f32 %v2070_v54, %v3792_v57 }
0x2136   :  { %v2089_v9 = vmul.f32 1.442695, %v2078_v63  ;;  %2093 = vperm.xlu2 %3210, %v3243_v44  }
0x2137   :  { %2103 = vperm.xlu1 %3209, %v3245_v58  }
0x2138   :  { %3246 = vpow2.f32 %v2089_v9 }
0x2139   :  { %3248 = vpow2.f32 %v2087_v26 }
0x213e   :  { %v3247_v11 = vpop.eup %3246 }
0x213f   :  { %2118 = vperm.xlu0 %3208, %v3247_v11   ;;  %v3249_v15 = vpop.eup %3248 }
0x2147   :  { %2113 = vperm.xlu0 %3208, %v3249_v15  }
0x2188   :  { %v2099_v28 = vpop.permute.xlu2 %2098 }
0x2189   :  { %v2122_v32 = vmul.f32 %v2099_v28, %v3677_v0 }
0x2190   :  { %v2094_v31 = vpop.permute.xlu2 %2093 }
0x2191   :  { %v2121_v30 = vmul.f32 %v2094_v31, %v3717_v6 }
0x2193   :  { %v3221_v33 = vpack.i.bf16 %v2121_v30, %v2122_v32 }
0x2195   :  { %3222 = vrot.lane.b32.xlu2 %v3221_v33, %s3407_s30 }
0x21a1   :  { %v2109_v36 = vpop.permute.xlu1 %2108 }
0x21a2   :  { %v2124_v49 = vmul.f32 %v2109_v36, %v3642_v19 }
0x21a9   :  { %v2104_v35 = vpop.permute.xlu1 %2103 }
0x21aa   :  { %v2123_v20 = vmul.f32 %v2104_v35, %v3649_v59 }
0x21ac   :  { %v3216_v40 = vpack.i.bf16 %v2123_v20, %v2124_v49 }
0x21ae   :  { %3217 = vrot.lane.b32.xlu1 %v3216_v40, %s3407_s30 }
0x21b1   :  { %v2119_v51 = vpop.permute.xlu0 %2118 }
0x21b2   :  { %v2126_v21 = vmul.f32 %v2119_v51, %v3707_v52 }
0x21b9   :  { %v2114_v24 = vpop.permute.xlu0 %2113 }
0x21ba   :  { %v2125_v53 = vmul.f32 %v2114_v24, %v3670_v61 }
0x21bc   :  { %v3211_v5 = vpack.i.bf16 %v2125_v53, %v2126_v21 }
0x21be   :  { %3212 = vrot.lane.b32.xlu0 %v3211_v5, %s3407_s30 }
0x21ef   :  { %v3223_v60 = vpop.permute.xlu2 %3222 }
0x21f0   :  { %v3224_v31 = vunpack.i.l.bf16 %v3223_v60  ;;  %v3225_v30 = vunpack.i.h.bf16 %v3223_v60 }
0x21f2   :  { %v2152_v36 = vsel %vm992_vm15, %v3239_v56, %v3224_v31  ;;  %v2151_v35 = vsel %vm992_vm15, %v3243_v44, %v3225_v30 }
0x2220   :  { %v3218_v50 = vpop.permute.xlu1 %3217 }
0x2221   :  { %v3219_v63 = vunpack.i.l.bf16 %v3218_v50  ;;  %v3220_v26 = vunpack.i.h.bf16 %v3218_v50 }
0x2223   :  { %v2154_v32 = vsel %vm992_vm15, %v3241_v4, %v3219_v63  ;;  %v2153_v33 = vsel %vm992_vm15, %v3245_v58, %v3220_v26 }
0x2230   :  { %v3213_v55 = vpop.permute.xlu0 %3212 }
0x2231   :  { %v3215_v43 = vunpack.i.h.bf16 %v3213_v55  ;;  %v3214_v54 = vunpack.i.l.bf16 %v3213_v55 }
0x2233   :  { %v2156_v9 = vsel %vm992_vm15, %v3247_v11, %v3214_v54  ;;  %v2155_v28 = vsel %vm992_vm15, %v3249_v15, %v3215_v43  ;;  %v1987_v15 = vld [vmem:[#allocation2] sm:$0xff] }
0x2234   :  { %2167 = vmatpush.msrb.mxu2 %v2156_v9  ;;  %2976 = vmatmul.msk.f32.vlgmr.msrb.gmra.mxu0 %vm152_vm8, %v1987_v15 }
0x2236   :  { %2168 = vmatpush.msrb.mxu2 %v2155_v28 }
0x2238   :  { %2169 = vmatpush.msrb.mxu2 %v2154_v32 }
0x223a   :  { %2170 = vmatpush.msrb.mxu2 %v2153_v33 }
0x223c   :  { %2171 = vmatpush.msrb.mxu2 %v2152_v36 }
0x223e   :  { %2172 = vmatpush.msrb.mxu2 %v2151_v35 }
0x223f   :  { %2974 = vmatmul.msk.f32.vlgmr.msrb.gmra.mxu2 %vm1257_vm4, %v3863_v46 }
0x2240   :  { %2345 = vmatpush.msra.mxu2 %v3952_v39 }
0x22b1   :  { %v2242_v63 = vpop.f32.mrf.mxu0 }
0x22c2   :  { %v2174_v11 = vpop.f32.mrf.mxu2 }
0x22c3   :  { %2179 = vperm.xlu0 %3208, %v2174_v11  }
0x2335   :  { %v2180_v4 = vpop.permute.xlu0 %2179 }
0x2336   :  { %3250 = vrcp.f32 %v2180_v4  ;;  %v2193_v56 = vand.u32 2147483648, %v2180_v4  ;;  %v2191_v44 = vand.u32 2147483647, %v2180_v4  ;;  %vm2187_vm11 = vweird.f32 %v2180_v4 }
0x2338   :  { %v2194_v24 = vor.u32 1.1754944e-38, %v2193_v56  ;;  %vm2192_vm13 = vcmp.eq.f32.partialorder %v2191_v44, 8.507059e+37 }
0x233c   :  { %v3251_v58 = vpop.eup %3250 }
0x233d   :  { %v2183_v49 = vmul.f32 %v3251_v58, %v2180_v4  ;;  %vm2188_vm10 = vweird.f32 %v3251_v58 }
0x233e   :  { %vm2189_vm12 = vmor %vm2187_vm11, %vm2188_vm10 }
0x233f   :  { %v2184_v20 = vsub.f32 1.0, %v2183_v49 }
0x2341   :  { %v2185_v40 = vmul.f32 %v3251_v58, %v2184_v20 }
0x2343   :  { %v2186_v51 = vadd.f32 %v3251_v58, %v2185_v40 }
0x2345   :  { %v2190_v21 = vsel %vm2189_vm12, %v3251_v58, %v2186_v51 }
0x2346   :  { %v2195_v53 = vsel %vm2192_vm13, %v2194_v24, %v2190_v21 }
0x2347   :  { %v2196_v5 = vmul.f32 %v2195_v53, %v2174_v11 }
0x2349   :  { %2198 = vrot.lane.b32.xlu1 %v2196_v5, %s3408_s14 }
0x23bb   :  { %v2199_v50 = vpop.permute.xlu1 %2198 }
0x23bc   :  { %2975 = vmatmul.msk.f32.vlgmr.msra.gmra.mxu3 %vm207_vm1, %v2199_v50  ;;  %2979 = vmatmul.msk.f32.vlgmr.msra.gmra.mxu0 %vm207_vm1, %v2199_v50 }
0x23bd   :  { %2365 = vmatpush.msra.mxu3 %v3878_v13 }
0x23c4   :  { %2977 = vmatmul.msk.f32.vlgmr.msrb.gmra.mxu3 %vm152_vm8, %v4049_v3 }
0x23cc   :  { %2981 = vmatmul.msk.f32.vlgmr.msra.gmra.mxu3 %vm152_vm8, %v1987_v15 }
0x243f   :  { %v2219_v55 = vpop.f32.mrf.mxu3 }
0x2440   :  { %v2243_v9 = vadd.f32 %v2242_v63, %v2219_v55 }
0x2442   :  { %v2245_v60 = vadd.f32 %v3944_v23, %v2243_v9 }
0x2447   :  { %v2263_v43 = vpop.f32.mrf.mxu3 }
0x2448   :  { %v2264_v54 = vadd.f32 %v3890_v37, %v2263_v43  ;;  %v2322_v43 = vpop.f32.mrf.mxu0 }
0x244a   :  { %2287 = vrot.lane.b32.xlu2 %v2264_v54, %s3401_s29  ;;  %v2266_v26 = vadd.f32 %v2264_v54, %v2245_v60 }
0x244c   :  { %v2978_v28 = vmul.f32 -1.442695, %v2266_v26 }
0x244e   :  { %3252 = vpow2.f32 %v2978_v28 }
0x244f   :  { %v2367_v63 = vpop.f32.mrf.mxu3 }
0x2454   :  { %v3253_v31 = vpop.eup %3252 }
0x2455   :  { %v2270_v32 = vadd.f32 1.0, %v3253_v31 }
0x2457   :  { %3254 = vrcp.f32 %v2270_v32  ;;  %v2282_v11 = vand.u32 2147483648, %v2270_v32  ;;  %vm2276_vm2 = vweird.f32 %v2270_v32  ;;  %v2280_v15 = vand.u32 2147483647, %v2270_v32 }
0x2459   :  { %v2283_v58 = vor.u32 1.1754944e-38, %v2282_v11  ;;  %vm2281_vm5 = vcmp.eq.f32.partialorder %v2280_v15, 8.507059e+37 }
0x245d   :  { %v3255_v30 = vpop.eup %3254 }
0x245e   :  { %v2272_v3 = vmul.f32 %v3255_v30, %v2270_v32  ;;  %vm2277_vm14 = vweird.f32 %v3255_v30 }
0x245f   :  { %vm2278_vm3 = vmor %vm2276_vm2, %vm2277_vm14 }
0x2460   :  { %v2273_v33 = vsub.f32 1.0, %v2272_v3 }
0x2462   :  { %v2274_v36 = vmul.f32 %v3255_v30, %v2273_v33 }
0x2464   :  { %v2275_v35 = vadd.f32 %v3255_v30, %v2274_v36 }
0x2466   :  { %v2279_v4 = vsel %vm2278_vm3, %v3255_v30, %v2275_v35 }
0x2467   :  { %v2284_v20 = vsel %vm2281_vm5, %v2283_v58, %v2279_v4 }
0x2468   :  { %v2297_v24 = vsub.f32 1.0, %v2284_v20  ;;  %v2303_v5 = vmul.f32 %v2284_v20, %v4045_v62 }
0x24a4   :  { %v2288_v49 = vpop.permute.xlu2 %2287 }
0x24a5   :  { %v2290_v56 = vmul.f32 %v2288_v49, %v2284_v20 }
0x24a7   :  { %2292 = vrot.lane.b32.xlu0 %v2290_v56, %s3402_s0 }
0x2519   :  { %v2293_v40 = vpop.permute.xlu0 %2292 }
0x251a   :  { %v2295_v44 = vadd.f32 %v2293_v40, %v2245_v60 }
0x251c   :  { %3256 = vtanh.f32 %v2295_v44 }
0x2522   :  { %v3257_v51 = vpop.eup %3256 }
0x2523   :  { %2299 = vrot.lane.b32.xlu1 %v3257_v51, %s3403_s9 }
0x2595   :  { %v2300_v21 = vpop.permute.xlu1 %2299 }
0x2596   :  { %v2302_v53 = vmul.f32 %v2300_v21, %v2297_v24 }
0x2598   :  { %v4130_v50 = vadd.f32 %v2303_v5, %v2302_v53 }
0x259a   :  { %2326 = vrot.lane.b32.xlu2 %v4130_v50, %s3403_s9 }
0x25f4   :  { %v4134_v55 = vpop.permute.xlu2 %2326 }
0x25f5   :  { %2980 = vmatmul.msk.f32.vlgmr.msra.gmra.mxu2 %vm152_vm8, %v4134_v55 }
0x2678   :  { %v2347_v54 = vpop.f32.mrf.mxu2 }
0x2679   :  { %v2348_v9 = vadd.f32 %v2347_v54, %v2322_v43 }
0x267b   :  { %v2370_v60 = vadd.f32 %v2367_v63, %v2348_v9  ;;  %2378 = sbr.rel (%p2983_p4) target bundleno = 9857 (0x2681), region = 45 }
0x267d   :  { %v2371_v26 = vadd.f32 %v3966_v27, %v2370_v60 }
0x267f   :  { %2373 = vst.msk [vmem:[#allocation6 + $0x18] sm:$0xff] %vm1035_vm0, %v2371_v26 }
0x2680   :  { %2379 = vst.msk [vmem:[#allocation2] sm:$0xff] %vm152_vm8, %v3938_v17 }
0x2681 PF:  { %s2984_s3 = sld [smem:[#allocation3 + $0x3]] }
0x2687   :  { %p2985_p5 = scmp.ne.s32.totalorder %s2984_s3, 0 }
0x2689   :  { %2384 = sbr.rel (%p2985_p5) target bundleno = 10361 (0x2879), region = 49 }
0x268e   :  { %v2385_v62 = vsel %vm1035_vm0, %v2371_v26, -inf  ;;  %2424 = vmatpush.msra.mxu0 %v3833_v18  ;;  %v3411_v4 = vmov 0.0  }
0x268f   :  { %2386 = vmax.xlane.f32.xlu0 %v2385_v62 }
0x2690   :  { %2425 = vmatpush.msra.mxu0 %v3839_v1 }
0x2692   :  { %2426 = vmatpush.msra.mxu0 %v3845_v47 }
0x2702   :  { %v2387_v28 = vpop.xlane.xlu0 %2386 }
0x2703   :  { %vm2388_vm6 = vcmp.eq.f32.partialorder %v2371_v26, %v2387_v28 }
0x2704   :  { %v2389_v31 = vsel %vm2388_vm6, %v3490_v12, 24 }
0x2705   :  { %v2390_v32 = vsel %vm1035_vm0, %v2389_v31, 2147483647 }
0x2706   :  { %v2392_v17 = vshra.s32 %v2390_v32, 16  ;;  %v2391_v3 = vand.u32 65535, %v2390_v32 }
0x2708   :  { %v2394_v30 = vcvt.s32.f32 %v2392_v17  ;;  %v2393_v36 = vcvt.s32.f32 %v2391_v3 }
0x270a   :  { %2395 = vmin.xlane.f32.xlu0 %v2394_v30 }
0x277d   :  { %v2396_v33 = vpop.xlane.xlu0 %2395 }
0x277e   :  { %vm2397_vm7 = vcmp.eq.f32.partialorder %v2394_v30, %v2396_v33  ;;  %v2402_v18 = vcvt.f32.s32 %v2396_v33 }
0x277f   :  { %v2398_v35 = vsel %vm2397_vm7, %v2393_v36, inf }
0x2780   :  { %2399 = vmin.xlane.f32.xlu1 %v2398_v35  ;;  %v2403_v1 = vshll.u32 %v2402_v18, 16 }
0x27f3   :  { %v2400_v11 = vpop.xlane.xlu1 %2399 }
0x27f4   :  { %v2401_v15 = vcvt.f32.s32 %v2400_v11 }
0x27f6   :  { %v2404_v47 = vadd.s32 %v2403_v1, %v2401_v15 }
0x27f8   :  { %vm2405_vm9 = vcmp.eq.s32.totalorder %v3490_v12, %v2404_v47 }
0x27f9   :  { %v2986_v58 = vsel %vm2405_vm9, 1.0, %v3411_v4 }
0x27fa   :  { %2987 = vmatmul.msk.f32.vlgmr.msra.gmra.mxu0 %vm1035_vm0, %v2986_v58 }
0x2877   :  { %v2428_v49 = vpop.f32.mrf.mxu0 }
0x2878   :  { %2431 = vst.msk [vmem:[#allocation2] sm:$0xff] %vm152_vm8, %v2428_v49 }
0x2879 PF:  { %2448 = vmatpush.msra.mxu2 %v3729_v42  ;;  %2498 = vmatpush.msra.mxu0 %v3754_v10  ;;  %s2838_s28 = sshll.u32 %s4236_s6, 4  ;;  %s3413_s8 = smov 128   ;;  %s2839_s28 = int_to_ptr.hbm [resolvable:$true] %s2838_s28 }
0x287a   :  { %2988 = vmatmul.msk.f32.vlgmr.msra.gmra.mxu2 %vm152_vm8, %v4134_v55  ;;  %3008 = vmatpush.msra.mxu1 %v3754_v10  ;;  %s3414_s10 = smov [#allocation9]   ;;  %s3415_s15 = smov [#allocation6]  }
0x287b   :  { %3260 = vset.pattern.permute.xlu2 %v3399_v2  ;;  %3259 = vset.pattern.permute.xlu1 %v3399_v2  ;;  %s2850_s12 = sshll.u32 %s3414_s10, 4  ;;  %s2823_s6 = sshll.u32 %s3415_s15, 4  ;;  %s2851_s12 = int_to_ptr.vmem [resolvable:$true] %s2850_s12  ;;  %s2824_s6 = int_to_ptr.vmem [resolvable:$true] %s2823_s6 }
0x287c   :  { %3258 = vset.pattern.permute.xlu0 %v3399_v2  ;;  %2685 = vmatpush.msrb.mxu0 %v3902_v48  ;;  %s2825_s18 = sshll.u32 %s4235_s5, 4  ;;  %s2826_s18 = int_to_ptr.hbm [resolvable:$true] %s2825_s18 }
0x287d   :  { %2661 = vmatpush.msra.mxu3 %v3914_v45 }
0x287f   :  { %2662 = vmatpush.msra.mxu3 %v3919_v7 }
0x2881   :  { %2706 = vmatpush.msrb.mxu3 %v3743_v41 }
0x28fd   :  { %v2450_v12 = vpop.f32.mrf.mxu2 }
0x28fe   :  { %v2453_v42 = vadd.f32 %v2450_v12, %v3766_v16  ;;  %v2455_v20 = vadd.f32 %v2450_v12, %v3773_v25  ;;  %v2454_v10 = vadd.f32 %v2450_v12, %v3769_v22  ;;  %v2456_v56 = vadd.f32 %v2450_v12, %v3777_v29 }
0x28ff   :  { %v2457_v41 = vadd.f32 %v2450_v12, %v3781_v34  ;;  %v2458_v22 = vadd.f32 %v2450_v12, %v3785_v38 }
0x2900   :  { %3276 = vtanh.f32 %v2453_v42 }
0x2901   :  { %3278 = vtanh.f32 %v2455_v20 }
0x2902   :  { %3280 = vtanh.f32 %v2454_v10 }
0x2903   :  { %3282 = vtanh.f32 %v2456_v56 }
0x2904   :  { %3284 = vtanh.f32 %v2457_v41 }
0x2905   :  { %3286 = vtanh.f32 %v2458_v22 }
0x2906   :  { %v3277_v2 = vpop.eup %3276 }
0x2907   :  { %v3279_v40 = vpop.eup %3278  ;;  %2989 = vmatmul.msk.f32.vlgmr.msra.gmra.mxu0 %vm152_vm8, %v3277_v2 }
0x2908   :  { %2991 = vmatmul.msk.f32.vlgmr.msra.gmra.mxu1 %vm152_vm8, %v3279_v40  ;;  %2764 = vmatpush.msra.mxu0 %v3928_v14  ;;  %v3281_v16 = vpop.eup %3280 }
0x2909   :  { %v3283_v25 = vpop.eup %3282 }
0x290a   :  { %2765 = vmatpush.msra.mxu0 %v3934_v8  ;;  %v3285_v29 = vpop.eup %3284 }
0x290b   :  { %v3287_v48 = vpop.eup %3286 }
0x290f   :  { %2990 = vmatmul.msk.f32.gmra.mxu0 %vm152_vm8, %v3281_v16 }
0x2910   :  { %2992 = vmatmul.msk.f32.gmra.mxu1 %vm152_vm8, %v3283_v25 }
0x2918   :  { %2993 = vmatmul.msk.f32.gmra.mxu1 %vm152_vm8, %v3285_v29 }
0x2920   :  { %2994 = vmatmul.msk.f32.gmra.mxu1 %vm152_vm8, %v3287_v48  ;;  %v2432_v48 = vld [vmem:[#allocation2] sm:$0xff] }
0x2921   :  { %2997 = vmatmul.msk.f32.vlgmr.msrb.gmra.mxu0 %vm152_vm8, %v2432_v48 }
0x2984   :  { %v2500_v45 = vpop.f32.mrf.mxu0 }
0x2985   :  { %v2506_v7 = vpop.f32.mrf.mxu1  ;;  %v2518_v21 = vsub.f32 %v2500_v45, %v3792_v57 }
0x2986   :  { %v2520_v38 = vsub.f32 %v2506_v7, %v3792_v57 }
0x2987   :  { %v2524_v53 = vmul.f32 1.442695, %v2518_v21 }
0x2988   :  { %v2528_v43 = vmul.f32 1.442695, %v2520_v38 }
0x298c   :  { %v2503_v14 = vpop.f32.mrf.mxu0 }
0x298d   :  { %v2519_v34 = vsub.f32 %v2503_v14, %v3792_v57  ;;  %v2509_v8 = vpop.f32.mrf.mxu1 }
0x298e   :  { %v2521_v44 = vsub.f32 %v2509_v8, %v3792_v57 }
0x298f   :  { %v2526_v51 = vmul.f32 1.442695, %v2519_v34 }
0x2990   :  { %v2530_v24 = vmul.f32 1.442695, %v2521_v44 }
0x2991   :  { %3288 = vpow2.f32 %v2526_v51 }
0x2992   :  { %3290 = vpow2.f32 %v2530_v24 }
0x2993   :  { %3292 = vpow2.f32 %v2524_v53 }
0x2994   :  { %3294 = vpow2.f32 %v2528_v43 }
0x2995   :  { %v2512_v5 = vpop.f32.mrf.mxu1 }
0x2996   :  { %v2522_v31 = vsub.f32 %v2512_v5, %v3792_v57 }
0x2997   :  { %v3289_v54 = vpop.eup %3288 }
0x2998   :  { %v3291_v63 = vpop.eup %3290  ;;  %2543 = vperm.xlu2 %3260, %v3289_v54   ;;  %v2532_v32 = vmul.f32 1.442695, %v2522_v31 }
0x2999   :  { %2553 = vperm.xlu1 %3259, %v3291_v63   ;;  %v3293_v26 = vpop.eup %3292 }
0x299a   :  { %v3295_v62 = vpop.eup %3294 }
0x299d   :  { %v2515_v9 = vpop.f32.mrf.mxu1 }
0x299e   :  { %v2523_v60 = vsub.f32 %v2515_v9, %v3792_v57 }
0x29a0   :  { %v2534_v28 = vmul.f32 1.442695, %v2523_v60  ;;  %2538 = vperm.xlu2 %3260, %v3293_v26  }
0x29a1   :  { %2548 = vperm.xlu1 %3259, %v3295_v62  }
0x29a2   :  { %3296 = vpow2.f32 %v2534_v28 }
0x29a3   :  { %3298 = vpow2.f32 %v2532_v32 }
0x29a8   :  { %v3297_v17 = vpop.eup %3296 }
0x29a9   :  { %2563 = vperm.xlu0 %3258, %v3297_v17   ;;  %v3299_v30 = vpop.eup %3298 }
0x29b1   :  { %2558 = vperm.xlu0 %3258, %v3299_v30  }
0x29f2   :  { %v2544_v3 = vpop.permute.xlu2 %2543 }
0x29f3   :  { %v2567_v36 = vmul.f32 %v2544_v3, %v3677_v0 }
0x29fa   :  { %v2539_v33 = vpop.permute.xlu2 %2538 }
0x29fb   :  { %v2566_v35 = vmul.f32 %v2539_v33, %v3717_v6 }
0x29fd   :  { %v3271_v18 = vpack.i.bf16 %v2566_v35, %v2567_v36 }
0x29ff   :  { %3272 = vrot.lane.b32.xlu2 %v3271_v18, %s3407_s30 }
0x2a0b   :  { %v2554_v11 = vpop.permute.xlu1 %2553 }
0x2a0c   :  { %v2569_v57 = vmul.f32 %v2554_v11, %v3642_v19 }
0x2a13   :  { %v2549_v1 = vpop.permute.xlu1 %2548 }
0x2a14   :  { %v2568_v15 = vmul.f32 %v2549_v1, %v3649_v59 }
0x2a16   :  { %v3266_v47 = vpack.i.bf16 %v2568_v15, %v2569_v57 }
0x2a18   :  { %3267 = vrot.lane.b32.xlu1 %v3266_v47, %s3407_s30 }
0x2a1b   :  { %v2564_v4 = vpop.permute.xlu0 %2563 }
0x2a1c   :  { %v2571_v49 = vmul.f32 %v2564_v4, %v3707_v52 }
0x2a23   :  { %v2559_v58 = vpop.permute.xlu0 %2558 }
0x2a24   :  { %v2570_v0 = vmul.f32 %v2559_v58, %v3670_v61 }
0x2a26   :  { %v3261_v12 = vpack.i.bf16 %v2570_v0, %v2571_v49 }
0x2a28   :  { %3262 = vrot.lane.b32.xlu0 %v3261_v12, %s3407_s30 }
0x2a59   :  { %v3273_v59 = vpop.permute.xlu2 %3272 }
0x2a5a   :  { %v3274_v41 = vunpack.i.l.bf16 %v3273_v59  ;;  %v3275_v61 = vunpack.i.h.bf16 %v3273_v59 }
0x2a5c   :  { %v2597_v25 = vsel %vm992_vm15, %v3289_v54, %v3274_v41  ;;  %v2596_v22 = vsel %vm992_vm15, %v3293_v26, %v3275_v61 }
0x2a8a   :  { %v3268_v6 = vpop.permute.xlu1 %3267 }
0x2a8b   :  { %v3269_v56 = vunpack.i.l.bf16 %v3268_v6  ;;  %v3270_v2 = vunpack.i.h.bf16 %v3268_v6 }
0x2a8d   :  { %v2599_v52 = vsel %vm992_vm15, %v3291_v63, %v3269_v56  ;;  %v2598_v16 = vsel %vm992_vm15, %v3295_v62, %v3270_v2  ;;  %v2687_v63 = vpop.f32.mrf.mxu0 }
0x2a9a   :  { %v3263_v42 = vpop.permute.xlu0 %3262 }
0x2a9b   :  { %v3265_v20 = vunpack.i.h.bf16 %v3263_v42  ;;  %v3264_v10 = vunpack.i.l.bf16 %v3263_v42 }
0x2a9d   :  { %v2601_v19 = vsel %vm992_vm15, %v3297_v17, %v3264_v10  ;;  %v2600_v40 = vsel %vm992_vm15, %v3299_v30, %v3265_v20 }
0x2a9e   :  { %2612 = vmatpush.msrb.mxu2 %v2601_v19 }
0x2aa0   :  { %2613 = vmatpush.msrb.mxu2 %v2600_v40 }
0x2aa2   :  { %2614 = vmatpush.msrb.mxu2 %v2599_v52 }
0x2aa4   :  { %2615 = vmatpush.msrb.mxu2 %v2598_v16 }
0x2aa6   :  { %2616 = vmatpush.msrb.mxu2 %v2597_v25 }
0x2aa8   :  { %2617 = vmatpush.msrb.mxu2 %v2596_v22 }
0x2aa9   :  { %2995 = vmatmul.msk.f32.vlgmr.msrb.gmra.mxu2 %vm1257_vm4, %v3863_v46 }
0x2aaa   :  { %2790 = vmatpush.msra.mxu2 %v3952_v39 }
0x2b2c   :  { %v2619_v29 = vpop.f32.mrf.mxu2 }
0x2b2d   :  { %2624 = vperm.xlu0 %3258, %v2619_v29  }
0x2b9f   :  { %v2625_v45 = vpop.permute.xlu0 %2624 }
0x2ba0   :  { %3300 = vrcp.f32 %v2625_v45  ;;  %v2638_v8 = vand.u32 2147483648, %v2625_v45  ;;  %v2636_v51 = vand.u32 2147483647, %v2625_v45  ;;  %vm2632_vm15 = vweird.f32 %v2625_v45 }
0x2ba2   :  { %v2639_v46 = vor.u32 1.1754944e-38, %v2638_v8  ;;  %vm2637_vm4 = vcmp.eq.f32.partialorder %v2636_v51, 8.507059e+37 }
0x2ba6   :  { %v3301_v7 = vpop.eup %3300 }
0x2ba7   :  { %v2628_v14 = vmul.f32 %v3301_v7, %v2625_v45  ;;  %vm2633_vm10 = vweird.f32 %v3301_v7 }
0x2ba8   :  { %vm2634_vm11 = vmor %vm2632_vm15, %vm2633_vm10 }
0x2ba9   :  { %v2629_v34 = vsub.f32 1.0, %v2628_v14 }
0x2bab   :  { %v2630_v44 = vmul.f32 %v3301_v7, %v2629_v34 }
0x2bad   :  { %v2631_v24 = vadd.f32 %v3301_v7, %v2630_v44 }
0x2baf   :  { %v2635_v21 = vsel %vm2634_vm11, %v3301_v7, %v2631_v24 }
0x2bb0   :  { %v2640_v39 = vsel %vm2637_vm4, %v2639_v46, %v2635_v21 }
0x2bb1   :  { %v2641_v38 = vmul.f32 %v2640_v39, %v2619_v29 }
0x2bb3   :  { %2643 = vrot.lane.b32.xlu1 %v2641_v38, %s3408_s14 }
0x2c25   :  { %v2644_v53 = vpop.permute.xlu1 %2643 }
0x2c26   :  { %2996 = vmatmul.msk.f32.vlgmr.msra.gmra.mxu3 %vm207_vm1, %v2644_v53  ;;  %3000 = vmatmul.msk.f32.vlgmr.msra.gmra.mxu0 %vm207_vm1, %v2644_v53 }
0x2c27   :  { %2810 = vmatpush.msra.mxu3 %v3878_v13 }
0x2c2e   :  { %2998 = vmatmul.msk.f32.vlgmr.msrb.gmra.mxu3 %vm152_vm8, %v4134_v55 }
0x2c36   :  { %3002 = vmatmul.msk.f32.vlgmr.msra.gmra.mxu3 %vm152_vm8, %v2432_v48 }
0x2ca9   :  { %v2664_v5 = vpop.f32.mrf.mxu3 }
0x2caa   :  { %v2688_v9 = vadd.f32 %v2687_v63, %v2664_v5 }
0x2cac   :  { %v2690_v60 = vadd.f32 %v3944_v23, %v2688_v9 }
0x2cb1   :  { %v2708_v43 = vpop.f32.mrf.mxu3 }
0x2cb2   :  { %v2709_v54 = vadd.f32 %v3890_v37, %v2708_v43 }
0x2cb4   :  { %2732 = vrot.lane.b32.xlu2 %v2709_v54, %s3401_s29  ;;  %v2711_v26 = vadd.f32 %v2709_v54, %v2690_v60  ;;  %s3412_s29 = smov [#allocation7]  }
0x2cb5   :  { %s2836_s30 = sshll.u32 %s3412_s29, 4  ;;  %s2837_s30 = int_to_ptr.vmem [resolvable:$true] %s2836_s30 }
0x2cb6   :  { %v2999_v62 = vmul.f32 -1.442695, %v2711_v26  ;;  %2844 = dma.vmem_to_hbm [thread:$0]  %s2837_s30, 768, %s2839_s28, [#allocation8], %s3413_s8, %s3413_s8, %s3405_s11  }
0x2cb8   :  { %3302 = vpow2.f32 %v2999_v62 }
0x2cb9   :  { %v2812_v6 = vpop.f32.mrf.mxu3 }
0x2cbe   :  { %v3303_v28 = vpop.eup %3302 }
0x2cbf   :  { %v2715_v13 = vadd.f32 1.0, %v3303_v28 }
0x2cc1   :  { %3304 = vrcp.f32 %v2715_v13  ;;  %v2727_v3 = vand.u32 2147483648, %v2715_v13  ;;  %vm2721_vm12 = vweird.f32 %v2715_v13  ;;  %v2725_v37 = vand.u32 2147483647, %v2715_v13 }
0x2cc3   :  { %v2728_v36 = vor.u32 1.1754944e-38, %v2727_v3  ;;  %vm2726_vm14 = vcmp.eq.f32.partialorder %v2725_v37, 8.507059e+37 }
0x2cc7   :  { %v3305_v31 = vpop.eup %3304 }
0x2cc8   :  { %v2717_v55 = vmul.f32 %v3305_v31, %v2715_v13  ;;  %vm2722_vm1 = vweird.f32 %v3305_v31 }
0x2cc9   :  { %vm2723_vm13 = vmor %vm2721_vm12, %vm2722_vm1 }
0x2cca   :  { %v2718_v32 = vsub.f32 1.0, %v2717_v55 }
0x2ccc   :  { %v2719_v17 = vmul.f32 %v3305_v31, %v2718_v32 }
0x2cce   :  { %v2720_v30 = vadd.f32 %v3305_v31, %v2719_v17 }
0x2cd0   :  { %v2724_v33 = vsel %vm2723_vm13, %v3305_v31, %v2720_v30 }
0x2cd1   :  { %v2729_v35 = vsel %vm2726_vm14, %v2728_v36, %v2724_v33 }
0x2cd2   :  { %v2742_v15 = vsub.f32 1.0, %v2729_v35  ;;  %v2748_v58 = vmul.f32 %v2729_v35, %v4130_v50  ;;  %v2767_v50 = vpop.f32.mrf.mxu0 }
0x2d0e   :  { %v2733_v23 = vpop.permute.xlu2 %2732 }
0x2d0f   :  { %v2735_v18 = vmul.f32 %v2733_v23, %v2729_v35 }
0x2d11   :  { %2737 = vrot.lane.b32.xlu0 %v2735_v18, %s3402_s0 }
0x2d83   :  { %v2738_v11 = vpop.permute.xlu0 %2737 }
0x2d84   :  { %v2740_v1 = vadd.f32 %v2738_v11, %v2690_v60 }
0x2d86   :  { %3306 = vtanh.f32 %v2740_v1 }
0x2d8c   :  { %v3307_v57 = vpop.eup %3306 }
0x2d8d   :  { %2744 = vrot.lane.b32.xlu1 %v3307_v57, %s3403_s9 }
0x2dff   :  { %v2745_v47 = vpop.permute.xlu1 %2744 }
0x2e00   :  { %v2747_v4 = vmul.f32 %v2745_v47, %v2742_v15 }
0x2e02   :  { %v2749_v49 = vadd.f32 %v2748_v58, %v2747_v4 }
0x2e04   :  { %2771 = vrot.lane.b32.xlu2 %v2749_v49, %s3403_s9  ;;  %s2852_s9 = sshll.u32 %s4237_s7, 4  ;;  %s2853_s9 = int_to_ptr.hbm [resolvable:$true] %s2852_s9 }
0x2e05   :  { %2855 = dma.vmem_to_hbm [thread:$0]  %s2851_s12, 128, %s2853_s9, [#allocation8]  }
0x2e5e   :  { %v2772_v0 = vpop.permute.xlu2 %2771 }
0x2e5f   :  { %3001 = vmatmul.msk.f32.vlgmr.msra.gmra.mxu2 %vm152_vm8, %v2772_v0 }
0x2ee2   :  { %v2792_v12 = vpop.f32.mrf.mxu2 }
0x2ee3   :  { %v2793_v42 = vadd.f32 %v2792_v12, %v2767_v50 }
0x2ee5   :  { %v2815_v20 = vadd.f32 %v2812_v6, %v2793_v42 }
0x2ee7   :  { %v2816_v10 = vadd.f32 %v3966_v27, %v2815_v20 }
0x2ee9   :  { %2818 = vst.msk [vmem:[#allocation6 + $0x20] sm:$0xff] %vm1035_vm0, %v2816_v10 }
0x2eea   :  { %2831 = dma.vmem_to_hbm [thread:$0]  %s2824_s6, 640, %s2826_s18, [#allocation4], %s3413_s8, %s3413_s8, %s3405_s11  }
0x2eeb   :  { %3394 = dma.done.wait [#allocation4], 640  }
0x2eec   :  { %3395 = vsyncadd [#allocation4], 4294966656 }
0x2eed   :  { %3396 = dma.done.wait [#allocation8], 896  }
0x2eee   :  { %3397 = vsyncadd [#allocation8], 4294966400 }
0x2eef   :  { %2868 = vsyncpa [#allocation4], 1 }
0x2ef0   :  { %2869 = vsyncpa [#allocation8], 1 }
0x2ef1   :  { %2870 = vsyncpa [#allocation5], 1 }

</bundles_post_ra>
